<compile_context>
chip_gen: v5e
topology: v5e:2x2
jax: 0.10.0
libtpu: 0.0.40
codegen_flags: <defaults>
</compile_context>

<pallas_src>
import functools

import jax
import jax.numpy as jnp
from jax.experimental import pallas as pl
from jax.experimental.pallas import tpu as pltpu


_PARALLEL = pltpu.CompilerParams(dimension_semantics=("parallel",))


# ---------------------------------------------------------------------------
# Kernels (refs are 2D: the batch dim is squeezed out via block_shape=None).
# ---------------------------------------------------------------------------
def _pointwise_kernel(x_ref, w_ref, sb_ref, o_ref, *, relu):
    # x: (HW, Cin) @ w: (Cin, Cout), folded-BN affine, optional ReLU.
    y = jnp.dot(x_ref[...], w_ref[...], preferred_element_type=jnp.float32)
    y = y * sb_ref[0:1, :] + sb_ref[1:2, :]
    if relu:
        y = jnp.maximum(y, 0.0)
    o_ref[...] = y.astype(o_ref.dtype)


def _conv23_kernel(p_ref, w2_ref, sb2_ref, w3_ref, sb3_ref, y_ref, pool_ref):
    # Fused: 3x3 conv (im2col GEMM) + BN + ReLU, then 1x1 conv + BN,
    # plus the global average pool needed by channel attention (so the
    # bottleneck output is not re-read from HBM just to pool it).
    h = jnp.dot(p_ref[...], w2_ref[...], preferred_element_type=jnp.float32)
    h = jnp.maximum(h * sb2_ref[0:1, :] + sb2_ref[1:2, :], 0.0)
    y = jnp.dot(h, w3_ref[...], preferred_element_type=jnp.float32)
    y = y * sb3_ref[0:1, :] + sb3_ref[1:2, :]
    y_ref[...] = y.astype(y_ref.dtype)
    pool_ref[...] = jnp.mean(y, axis=0, keepdims=True).astype(pool_ref.dtype)


def _ca_apply_kernel(y_ref, ca_ref, yca_ref, mean_ref, max_ref):
    # Channel-attention multiply + the per-pixel channel mean/max that feed
    # the spatial-attention 7x7 conv.
    y = y_ref[...] * ca_ref[...]
    yca_ref[...] = y.astype(yca_ref.dtype)
    mean_ref[...] = jnp.mean(y, axis=1, keepdims=True).astype(mean_ref.dtype)
    max_ref[...] = jnp.max(y, axis=1, keepdims=True).astype(max_ref.dtype)


def _sa_apply_kernel(yca_ref, p_ref, w_ref, ysa_ref, pool_ref):
    # Spatial-attention 7x7 conv (GEMM on 49*2-wide patches; weight column is
    # pre-broadcast across Ce so the matmul output is not 1 lane wide),
    # sigmoid, multiply, plus the global average pool needed by ECA.
    s = jnp.dot(p_ref[...], w_ref[...], preferred_element_type=jnp.float32)
    y = yca_ref[...] * jax.nn.sigmoid(s)
    ysa_ref[...] = y.astype(ysa_ref.dtype)
    pool_ref[...] = jnp.mean(y, axis=0, keepdims=True).astype(pool_ref.dtype)


def _eca_res_kernel(ysa_ref, eca_ref, res_ref, o_ref):
    # ECA channel-scale multiply + residual add + final ReLU.
    y = ysa_ref[...] * eca_ref[...] + res_ref[...]
    o_ref[...] = jnp.maximum(y, 0.0).astype(o_ref.dtype)


# ---------------------------------------------------------------------------
# pallas_call wrappers.
# ---------------------------------------------------------------------------
def _row_spec(hw, c):
    # (N, hw, c) array -> per-grid-step block (hw, c) for sample n.
    return pl.BlockSpec((None, hw, c), lambda n: (n, 0, 0))


def _full_spec(shape):
    # Weight / scale tables: full array resident for every grid step.
    nd = len(shape)
    return pl.BlockSpec(shape, lambda n: (0,) * nd)


def _pointwise(x, w, sb, relu):
    n, hw, cin = x.shape
    cout = w.shape[1]
    return pl.pallas_call(
        functools.partial(_pointwise_kernel, relu=relu),
        out_shape=jax.ShapeDtypeStruct((n, hw, cout), jnp.float32),
        grid_spec=pltpu.PrefetchScalarGridSpec(
            num_scalar_prefetch=0, grid=(n,),
            in_specs=[_row_spec(hw, cin), _full_spec(w.shape),
                      _full_spec(sb.shape)],
            out_specs=_row_spec(hw, cout)),
        compiler_params=_PARALLEL,
    )(x, w, sb)


def _conv23(patches, w2, sb2, w3, sb3):
    n, hw, k9 = patches.shape
    ce = w3.shape[1]
    return pl.pallas_call(
        _conv23_kernel,
        out_shape=(jax.ShapeDtypeStruct((n, hw, ce), jnp.float32),
                   jax.ShapeDtypeStruct((n, 1, ce), jnp.float32)),
        grid_spec=pltpu.PrefetchScalarGridSpec(
            num_scalar_prefetch=0, grid=(n,),
            in_specs=[_row_spec(hw, k9), _full_spec(w2.shape),
                      _full_spec(sb2.shape), _full_spec(w3.shape),
                      _full_spec(sb3.shape)],
            out_specs=(_row_spec(hw, ce), _row_spec(1, ce))),
        compiler_params=_PARALLEL,
    )(patches, w2, sb2, w3, sb3)


def _ca_apply(y3, ca):
    n, hw, ce = y3.shape
    return pl.pallas_call(
        _ca_apply_kernel,
        out_shape=(jax.ShapeDtypeStruct((n, hw, ce), jnp.float32),
                   jax.ShapeDtypeStruct((n, hw, 1), jnp.float32),
                   jax.ShapeDtypeStruct((n, hw, 1), jnp.float32)),
        grid_spec=pltpu.PrefetchScalarGridSpec(
            num_scalar_prefetch=0, grid=(n,),
            in_specs=[_row_spec(hw, ce), _row_spec(1, ce)],
            out_specs=(_row_spec(hw, ce), _row_spec(hw, 1), _row_spec(hw, 1))),
        compiler_params=_PARALLEL,
    )(y3, ca)


def _sa_apply(yca, patches, wsa):
    n, hw, ce = yca.shape
    k = patches.shape[2]
    return pl.pallas_call(
        _sa_apply_kernel,
        out_shape=(jax.ShapeDtypeStruct((n, hw, ce), jnp.float32),
                   jax.ShapeDtypeStruct((n, 1, ce), jnp.float32)),
        grid_spec=pltpu.PrefetchScalarGridSpec(
            num_scalar_prefetch=0, grid=(n,),
            in_specs=[_row_spec(hw, ce), _row_spec(hw, k),
                      _full_spec(wsa.shape)],
            out_specs=(_row_spec(hw, ce), _row_spec(1, ce))),
        compiler_params=_PARALLEL,
    )(yca, patches, wsa)


def _eca_res(ysa, eca, res):
    n, hw, ce = ysa.shape
    return pl.pallas_call(
        _eca_res_kernel,
        out_shape=jax.ShapeDtypeStruct((n, hw, ce), jnp.float32),
        grid_spec=pltpu.PrefetchScalarGridSpec(
            num_scalar_prefetch=0, grid=(n,),
            in_specs=[_row_spec(hw, ce), _row_spec(1, ce), _row_spec(hw, ce)],
            out_specs=_row_spec(hw, ce)),
        compiler_params=_PARALLEL,
    )(ysa, eca, res)


# ---------------------------------------------------------------------------
# Glue: layout, BN folding, im2col, tiny pooled-vector ops.
# ---------------------------------------------------------------------------
def _fold_bn(gamma, beta, mean, var, eps):
    scale = gamma / jnp.sqrt(var + eps)
    bias = beta - mean * scale
    return jnp.stack([scale, bias], axis=0)            # (2, C)


def _im2col(x_nhwc, k, pad, stride):
    n, h, w, c = x_nhwc.shape
    ho = (h + 2 * pad - k) // stride + 1
    wo = (w + 2 * pad - k) // stride + 1
    xp = jnp.pad(x_nhwc, ((0, 0), (pad, pad), (pad, pad), (0, 0)))
    taps = []
    for kh in range(k):
        for kw in range(k):
            taps.append(xp[:, kh:kh + (ho - 1) * stride + 1:stride,
                           kw:kw + (wo - 1) * stride + 1:stride, :])
    return jnp.concatenate(taps, axis=-1), ho, wo


@functools.partial(jax.jit, static_argnames=("stride", "downsampling"))
def resblock_cbam_forward(x_nchw, params, stride=1, downsampling=False,
                          eps=1e-5):
    n, cin, h, w = x_nchw.shape
    p = params["w1"].shape[0]                 # places
    ce = params["w3"].shape[0]                # places * expansion

    x_nhwc = jnp.transpose(x_nchw, (0, 2, 3, 1)).astype(jnp.float32)

    # --- bottleneck stage 1: 1x1 conv + BN + ReLU ---------------------------
    w1 = jnp.transpose(params["w1"].reshape(p, cin), (1, 0))
    sb1 = _fold_bn(params["g1"], params["b1"], params["m1"], params["v1"], eps)
    y1 = _pointwise(x_nhwc.reshape(n, h * w, cin), w1, sb1, relu=True)
    y1 = y1.reshape(n, h, w, p)

    # --- bottleneck stages 2+3 fused: 3x3(stride)+BN+ReLU then 1x1+BN -------
    # TODO(synk): im2col patches are materialized in HBM by XLA glue; for
    # large H*W this should move in-kernel with halo DMA to cut bytes ~9x.
    patches, ho, wo = _im2col(y1, 3, 1, stride)
    hw2 = ho * wo
    w2 = jnp.transpose(params["w2"], (2, 3, 1, 0)).reshape(9 * p, p)
    sb2 = _fold_bn(params["g2"], params["b2"], params["m2"], params["v2"], eps)
    w3 = jnp.transpose(params["w3"].reshape(ce, p), (1, 0))
    sb3 = _fold_bn(params["g3"], params["b3"], params["m3"], params["v3"], eps)
    y3, pool3 = _conv23(patches.reshape(n, hw2, 9 * p), w2, sb2, w3, sb3)

    # --- CBAM channel attention (tiny fc on the pooled vector -> glue) ------
    wfc = params["wfc"].reshape(ce, ce)
    ca = jax.nn.sigmoid(
        jnp.einsum("nc,oc->no", pool3[:, 0, :], wfc,
                   precision=jax.lax.Precision.HIGHEST) + params["bfc"][None, :])
    yca, sa_mean, sa_max = _ca_apply(y3, ca[:, None, :])

    # --- CBAM spatial attention: 7x7 conv over [mean_c, max_c] --------------
    sa_in = jnp.concatenate([sa_mean, sa_max], axis=-1).reshape(n, ho, wo, 2)
    sa_patches, _, _ = _im2col(sa_in, 7, 3, 1)
    wsa = jnp.transpose(params["wsa"], (2, 3, 1, 0)).reshape(49 * 2, 1)
    wsa = jnp.tile(wsa, (1, ce))      # broadcast -> lane-dense GEMM output
    ysa, pool_sa = _sa_apply(yca, sa_patches.reshape(n, hw2, 49 * 2), wsa)

    # --- ECA: conv1d(k=3, pad=1) over the channel axis of the pooled vector -
    we = params["weca"].reshape(3)
    pp = jnp.pad(pool_sa[:, 0, :], ((0, 0), (1, 1)))
    eca = jax.nn.sigmoid(we[0] * pp[:, :-2] + we[1] * pp[:, 1:-1]
                         + we[2] * pp[:, 2:])

    # --- residual ------------------------------------------------------------
    if downsampling:
        wd = jnp.transpose(params["wd"].reshape(ce, cin), (1, 0))
        sbd = _fold_bn(params["gd"], params["bd"], params["md"],
                       params["vd"], eps)
        x_sub = x_nhwc[:, ::stride, ::stride, :].reshape(n, hw2, cin)
        residual = _pointwise(x_sub, wd, sbd, relu=False)
    else:
        if cin != ce or stride != 1:
            raise ValueError("identity residual requires in_places == "
                             "places*expansion and stride == 1")
        residual = x_nhwc.reshape(n, hw2, cin)

    out = _eca_res(ysa, eca[:, None, :], residual)
    return jnp.transpose(out.reshape(n, ho, wo, ce), (0, 3, 1, 2))


# ---------------------------------------------------------------------------
# Pure-JAX reference of ResBlock_CBAM.forward (eval-mode BN) for verification.
# ---------------------------------------------------------------------------
def _reference(x, params, stride=1, downsampling=False, eps=1e-5):
    hp = jax.lax.Precision.HIGHEST

    def conv(a, w, s=1, pad=0):
        return jax.lax.conv_general_dilated(
            a, w, (s, s), ((pad, pad), (pad, pad)),
            dimension_numbers=("NCHW", "OIHW", "NCHW"), precision=hp)

    def bn(y, g, b, m, v):
        sc = g / jnp.sqrt(v + eps)
        return y * sc[None, :, None, None] + (b - m * sc)[None, :, None, None]

    out = jax.nn.relu(bn(conv(x, params["w1"]),
                         params["g1"], params["b1"], params["m1"], params["v1"]))
    out = jax.nn.relu(bn(conv(out, params["w2"], stride, 1),
                         params["g2"], params["b2"], params["m2"], params["v2"]))
    out = bn(conv(out, params["w3"]),
             params["g3"], params["b3"], params["m3"], params["v3"])
    # CBAM channel attention
    pooled = jnp.mean(out, axis=(2, 3), keepdims=True)
    ca = jax.nn.sigmoid(conv(pooled, params["wfc"])
                        + params["bfc"][None, :, None, None])
    out = out * ca
    # CBAM spatial attention
    sa_in = jnp.concatenate([jnp.mean(out, axis=1, keepdims=True),
                             jnp.max(out, axis=1, keepdims=True)], axis=1)
    out = out * jax.nn.sigmoid(conv(sa_in, params["wsa"], 1, 3))
    # ECA
    pe = jnp.mean(out, axis=(2, 3))
    ppe = jnp.pad(pe, ((0, 0), (1, 1)))
    we = params["weca"].reshape(3)
    eca = jax.nn.sigmoid(we[0] * ppe[:, :-2] + we[1] * ppe[:, 1:-1]
                         + we[2] * ppe[:, 2:])
    out = out * eca[:, :, None, None]
    # residual
    if downsampling:
        residual = bn(conv(x, params["wd"], stride),
                      params["gd"], params["bd"], params["md"], params["vd"])
    else:
        residual = x
    return jax.nn.relu(out + residual)


def _make_params(key, cin, p, ce, downsampling):
    ks = jax.random.split(key, 24)

    def bn_params(i, c):
        return (1.0 + 0.1 * jax.random.normal(ks[i], (c,)),
                0.1 * jax.random.normal(ks[i + 1], (c,)),
                0.1 * jax.random.normal(ks[i + 2], (c,)),
                jnp.abs(jax.random.normal(ks[i + 3], (c,))) + 0.5)

    prm = {}
    prm["w1"] = 0.2 * jax.random.normal(ks[0], (p, cin, 1, 1))
    prm["g1"], prm["b1"], prm["m1"], prm["v1"] = bn_params(1, p)
    prm["w2"] = 0.2 * jax.random.normal(ks[5], (p, p, 3, 3))
    prm["g2"], prm["b2"], prm["m2"], prm["v2"] = bn_params(6, p)
    prm["w3"] = 0.2 * jax.random.normal(ks[10], (ce, p, 1, 1))
    prm["g3"], prm["b3"], prm["m3"], prm["v3"] = bn_params(11, ce)
    prm["wfc"] = 0.2 * jax.random.normal(ks[15], (ce, ce, 1, 1))
    prm["bfc"] = 0.1 * jax.random.normal(ks[16], (ce,))
    prm["wsa"] = 0.2 * jax.random.normal(ks[17], (1, 2, 7, 7))
    prm["weca"] = 0.2 * jax.random.normal(ks[18], (1, 1, 3))
    if downsampling:
        prm["wd"] = 0.2 * jax.random.normal(ks[19], (ce, cin, 1, 1))
        prm["gd"], prm["bd"], prm["md"], prm["vd"] = bn_params(20, ce)
    return prm


if __name__ == "__main__":
    # TODO(synk): BatchNorm uses eval/running-stats semantics; training-mode
    # batch statistics are not computed in-kernel.
    key = jax.random.PRNGKey(0)
    kx, kp, kp2 = jax.random.split(key, 3)

    # Config 1: ResBlock_CBAM(in_places=4, places=4), stride=1, identity skip.
    N, CIN, H, W = 2, 4, 16, 16
    P1, CE1 = 4, 4
    x = jax.random.normal(kx, (N, CIN, H, W), dtype=jnp.float32)
    params1 = _make_params(kp, CIN, P1, CE1, downsampling=False)

    out1 = resblock_cbam_forward(x, params1, stride=1, downsampling=False)
    out1 = jax.block_until_ready(out1)
    ref1 = _reference(x, params1, stride=1, downsampling=False)
    assert out1.shape == (N, CE1, H, W)
    assert jnp.allclose(out1, ref1, atol=1e-4, rtol=1e-4), \
        float(jnp.max(jnp.abs(out1 - ref1)))

    # Config 2: downsampling path (stride=2, channel expansion 4 -> 8).
    P2, CE2 = 8, 8
    params2 = _make_params(kp2, CIN, P2, CE2, downsampling=True)
    out2 = resblock_cbam_forward(x, params2, stride=2, downsampling=True)
    out2 = jax.block_until_ready(out2)
    ref2 = _reference(x, params2, stride=2, downsampling=True)
    assert out2.shape == (N, CE2, H // 2, W // 2)
    assert jnp.allclose(out2, ref2, atol=1e-4, rtol=1e-4), \
        float(jnp.max(jnp.abs(out2 - ref2)))

    print("KERNEL_OK")
</pallas_src>

<mosaic_0001>
module attributes {stable_mosaic.version = 11 : i64} {
  func.func @_pointwise_kernel(%arg0: i32, %arg1: memref<1x256x4xf32, #tpu.memory_space<vmem>>, %arg2: memref<4x4xf32, #tpu.memory_space<vmem>>, %arg3: memref<2x4xf32, #tpu.memory_space<vmem>>, %arg4: memref<1x256x4xf32, #tpu.memory_space<vmem>>) attributes {dimension_semantics = [#tpu.dimension_semantics<parallel>], iteration_bounds = array<i64: 2>, scalar_prefetch = 0 : i64, scratch_operands = 0 : i64, tpu.core_type = #tpu.core_type<tc>, window_params = [{transform_indices = @transform_0, window_bounds = array<i64: 1, 256, 4>}, {pipeline_mode = #tpu.pipeline_mode<synchronous>, transform_indices = @transform_1, window_bounds = array<i64: 4, 4>}, {pipeline_mode = #tpu.pipeline_mode<synchronous>, transform_indices = @transform_2, window_bounds = array<i64: 2, 4>}, {transform_indices = @transform_3, window_bounds = array<i64: 1, 256, 4>}]} {
    %c0 = arith.constant 0 : index
    %c0_0 = arith.constant 0 : index
    %c0_1 = arith.constant 0 : index
    %0 = vector.load %arg1[%c0, %c0_0, %c0_1] : memref<1x256x4xf32, #tpu.memory_space<vmem>>, vector<1x256x4xf32>
    %1 = vector.shape_cast %0 : vector<1x256x4xf32> to vector<256x4xf32>
    %c0_2 = arith.constant 0 : index
    %c0_3 = arith.constant 0 : index
    %2 = vector.load %arg2[%c0_2, %c0_3] : memref<4x4xf32, #tpu.memory_space<vmem>>, vector<4x4xf32>
    %cst = arith.constant dense<0.000000e+00> : vector<256x4xf32>
    %3 = tpu.matmul %1, %2, %cst {dimension_numbers = #tpu.dot_dimension_numbers<[1], [0], [0], [1], [0, 0, 1, 1], [], []>} : vector<256x4xf32>, vector<4x4xf32>, vector<256x4xf32> -> vector<256x4xf32>
    %c0_4 = arith.constant 0 : index
    %c0_5 = arith.constant 0 : index
    %4 = vector.load %arg3[%c0_4, %c0_5] : memref<2x4xf32, #tpu.memory_space<vmem>>, vector<1x4xf32>
    %5 = vector.broadcast %4 : vector<1x4xf32> to vector<256x4xf32>
    %6 = arith.mulf %3, %5 : vector<256x4xf32>
    %c1 = arith.constant 1 : index
    %c0_6 = arith.constant 0 : index
    %7 = vector.load %arg3[%c1, %c0_6] : memref<2x4xf32, #tpu.memory_space<vmem>>, vector<1x4xf32>
    %8 = vector.broadcast %7 : vector<1x4xf32> to vector<256x4xf32>
    %9 = arith.addf %6, %8 : vector<256x4xf32>
    %cst_7 = arith.constant 0.000000e+00 : f32
    %10 = vector.broadcast %cst_7 : f32 to vector<256x4xf32>
    %11 = arith.maximumf %9, %10 : vector<256x4xf32>
    %c0_8 = arith.constant 0 : index
    %c0_9 = arith.constant 0 : index
    %c0_10 = arith.constant 0 : index
    %12 = vector.load %arg4[%c0_8, %c0_9, %c0_10] : memref<1x256x4xf32, #tpu.memory_space<vmem>>, vector<1x256x4xf32>
    %13 = vector.shape_cast %12 : vector<1x256x4xf32> to vector<256x4xf32>
    %14 = vector.shape_cast %11 : vector<256x4xf32> to vector<1x256x4xf32>
    tpu.vector_store %arg4[%c0_8, %c0_9, %c0_10], %14 {strides = array<i32>} : memref<1x256x4xf32, #tpu.memory_space<vmem>>, vector<1x256x4xf32>,
    return
  }
  func.func @transform_0(%arg0: i32) -> (i32, i32, i32) {
    %c0_i32 = arith.constant 0 : i32
    %c0_i32_0 = arith.constant 0 : i32
    %c0_i32_1 = arith.constant 0 : i32
    return %arg0, %c0_i32, %c0_i32_0 : i32, i32, i32
  }
  func.func @transform_1(%arg0: i32) -> (i32, i32) {
    %c0_i32 = arith.constant 0 : i32
    %c0_i32_0 = arith.constant 0 : i32
    %c0_i32_1 = arith.constant 0 : i32
    return %c0_i32, %c0_i32_0 : i32, i32
  }
  func.func @transform_2(%arg0: i32) -> (i32, i32) {
    %c0_i32 = arith.constant 0 : i32
    %c0_i32_0 = arith.constant 0 : i32
    %c0_i32_1 = arith.constant 0 : i32
    return %c0_i32, %c0_i32_0 : i32, i32
  }
  func.func @transform_3(%arg0: i32) -> (i32, i32, i32) {
    %c0_i32 = arith.constant 0 : i32
    %c0_i32_0 = arith.constant 0 : i32
    %c0_i32_1 = arith.constant 0 : i32
    return %arg0, %c0_i32, %c0_i32_0 : i32, i32, i32
  }
}

module attributes {stable_mosaic.version = 11 : i64} {
  func.func @_conv23_kernel(%arg0: i32, %arg1: memref<1x256x36xf32, #tpu.memory_space<vmem>>, %arg2: memref<36x4xf32, #tpu.memory_space<vmem>>, %arg3: memref<2x4xf32, #tpu.memory_space<vmem>>, %arg4: memref<4x4xf32, #tpu.memory_space<vmem>>, %arg5: memref<2x4xf32, #tpu.memory_space<vmem>>, %arg6: memref<1x256x4xf32, #tpu.memory_space<vmem>>, %arg7: memref<1x1x4xf32, #tpu.memory_space<vmem>>) attributes {dimension_semantics = [#tpu.dimension_semantics<parallel>], iteration_bounds = array<i64: 2>, scalar_prefetch = 0 : i64, scratch_operands = 0 : i64, tpu.core_type = #tpu.core_type<tc>, window_params = [{transform_indices = @transform_0, window_bounds = array<i64: 1, 256, 36>}, {pipeline_mode = #tpu.pipeline_mode<synchronous>, transform_indices = @transform_1, window_bounds = array<i64: 36, 4>}, {pipeline_mode = #tpu.pipeline_mode<synchronous>, transform_indices = @transform_2, window_bounds = array<i64: 2, 4>}, {pipeline_mode = #tpu.pipeline_mode<synchronous>, transform_indices = @transform_3, window_bounds = array<i64: 4, 4>}, {pipeline_mode = #tpu.pipeline_mode<synchronous>, transform_indices = @transform_4, window_bounds = array<i64: 2, 4>}, {transform_indices = @transform_5, window_bounds = array<i64: 1, 256, 4>}, {transform_indices = @transform_6, window_bounds = array<i64: 1, 1, 4>}]} {
    %c0 = arith.constant 0 : index
    %c0_0 = arith.constant 0 : index
    %c0_1 = arith.constant 0 : index
    %0 = vector.load %arg1[%c0, %c0_0, %c0_1] : memref<1x256x36xf32, #tpu.memory_space<vmem>>, vector<1x256x36xf32>
    %1 = vector.shape_cast %0 : vector<1x256x36xf32> to vector<256x36xf32>
    %c0_2 = arith.constant 0 : index
    %c0_3 = arith.constant 0 : index
    %2 = vector.load %arg2[%c0_2, %c0_3] : memref<36x4xf32, #tpu.memory_space<vmem>>, vector<36x4xf32>
    %cst = arith.constant dense<0.000000e+00> : vector<256x4xf32>
    %3 = tpu.matmul %1, %2, %cst {dimension_numbers = #tpu.dot_dimension_numbers<[1], [0], [0], [1], [0, 0, 1, 1], [], []>} : vector<256x36xf32>, vector<36x4xf32>, vector<256x4xf32> -> vector<256x4xf32>
    %c0_4 = arith.constant 0 : index
    %c0_5 = arith.constant 0 : index
    %4 = vector.load %arg3[%c0_4, %c0_5] : memref<2x4xf32, #tpu.memory_space<vmem>>, vector<1x4xf32>
    %5 = vector.broadcast %4 : vector<1x4xf32> to vector<256x4xf32>
    %6 = arith.mulf %3, %5 : vector<256x4xf32>
    %c1 = arith.constant 1 : index
    %c0_6 = arith.constant 0 : index
    %7 = vector.load %arg3[%c1, %c0_6] : memref<2x4xf32, #tpu.memory_space<vmem>>, vector<1x4xf32>
    %8 = vector.broadcast %7 : vector<1x4xf32> to vector<256x4xf32>
    %9 = arith.addf %6, %8 : vector<256x4xf32>
    %cst_7 = arith.constant 0.000000e+00 : f32
    %10 = vector.broadcast %cst_7 : f32 to vector<256x4xf32>
    %11 = arith.maximumf %9, %10 : vector<256x4xf32>
    %c0_8 = arith.constant 0 : index
    %c0_9 = arith.constant 0 : index
    %12 = vector.load %arg4[%c0_8, %c0_9] : memref<4x4xf32, #tpu.memory_space<vmem>>, vector<4x4xf32>
    %cst_10 = arith.constant dense<0.000000e+00> : vector<256x4xf32>
    %13 = tpu.matmul %11, %12, %cst_10 {dimension_numbers = #tpu.dot_dimension_numbers<[1], [0], [0], [1], [0, 0, 1, 1], [], []>} : vector<256x4xf32>, vector<4x4xf32>, vector<256x4xf32> -> vector<256x4xf32>
    %c0_11 = arith.constant 0 : index
    %c0_12 = arith.constant 0 : index
    %14 = vector.load %arg5[%c0_11, %c0_12] : memref<2x4xf32, #tpu.memory_space<vmem>>, vector<1x4xf32>
    %15 = vector.broadcast %14 : vector<1x4xf32> to vector<256x4xf32>
    %16 = arith.mulf %13, %15 : vector<256x4xf32>
    %c1_13 = arith.constant 1 : index
    %c0_14 = arith.constant 0 : index
    %17 = vector.load %arg5[%c1_13, %c0_14] : memref<2x4xf32, #tpu.memory_space<vmem>>, vector<1x4xf32>
    %18 = vector.broadcast %17 : vector<1x4xf32> to vector<256x4xf32>
    %19 = arith.addf %16, %18 : vector<256x4xf32>
    %c0_15 = arith.constant 0 : index
    %c0_16 = arith.constant 0 : index
    %c0_17 = arith.constant 0 : index
    %20 = vector.load %arg6[%c0_15, %c0_16, %c0_17] : memref<1x256x4xf32, #tpu.memory_space<vmem>>, vector<1x256x4xf32>
    %21 = vector.shape_cast %20 : vector<1x256x4xf32> to vector<256x4xf32>
    %22 = vector.shape_cast %19 : vector<256x4xf32> to vector<1x256x4xf32>
    tpu.vector_store %arg6[%c0_15, %c0_16, %c0_17], %22 {strides = array<i32>} : memref<1x256x4xf32, #tpu.memory_space<vmem>>, vector<1x256x4xf32>,
    %cst_18 = arith.constant dense<0.000000e+00> : vector<4xf32>
    %23 = vector.multi_reduction <add>, %19, %cst_18 [0] : vector<256x4xf32> to vector<4xf32>
    %24 = vector.shape_cast %23 : vector<4xf32> to vector<1x4xf32>
    %cst_19 = arith.constant 2.560000e+02 : f32
    %25 = vector.broadcast %cst_19 : f32 to vector<1x4xf32>
    %26 = arith.divf %24, %25 : vector<1x4xf32>
    %c0_20 = arith.constant 0 : index
    %c0_21 = arith.constant 0 : index
    %c0_22 = arith.constant 0 : index
    %27 = vector.load %arg7[%c0_20, %c0_21, %c0_22] : memref<1x1x4xf32, #tpu.memory_space<vmem>>, vector<1x1x4xf32>
    %28 = vector.shape_cast %27 : vector<1x1x4xf32> to vector<1x4xf32>
    %29 = vector.shape_cast %26 : vector<1x4xf32> to vector<1x1x4xf32>
    tpu.vector_store %arg7[%c0_20, %c0_21, %c0_22], %29 {strides = array<i32>} : memref<1x1x4xf32, #tpu.memory_space<vmem>>, vector<1x1x4xf32>,
    return
  }
  func.func @transform_0(%arg0: i32) -> (i32, i32, i32) {
    %c0_i32 = arith.constant 0 : i32
    %c0_i32_0 = arith.constant 0 : i32
    %c0_i32_1 = arith.constant 0 : i32
    return %arg0, %c0_i32, %c0_i32_0 : i32, i32, i32
  }
  func.func @transform_1(%arg0: i32) -> (i32, i32) {
    %c0_i32 = arith.constant 0 : i32
    %c0_i32_0 = arith.constant 0 : i32
    %c0_i32_1 = arith.constant 0 : i32
    return %c0_i32, %c0_i32_0 : i32, i32
  }
  func.func @transform_2(%arg0: i32) -> (i32, i32) {
    %c0_i32 = arith.constant 0 : i32
    %c0_i32_0 = arith.constant 0 : i32
    %c0_i32_1 = arith.constant 0 : i32
    return %c0_i32, %c0_i32_0 : i32, i32
  }
  func.func @transform_3(%arg0: i32) -> (i32, i32) {
    %c0_i32 = arith.constant 0 : i32
    %c0_i32_0 = arith.constant 0 : i32
    %c0_i32_1 = arith.constant 0 : i32
    return %c0_i32, %c0_i32_0 : i32, i32
  }
  func.func @transform_4(%arg0: i32) -> (i32, i32) {
    %c0_i32 = arith.constant 0 : i32
    %c0_i32_0 = arith.constant 0 : i32
    %c0_i32_1 = arith.constant 0 : i32
    return %c0_i32, %c0_i32_0 : i32, i32
  }
  func.func @transform_5(%arg0: i32) -> (i32, i32, i32) {
    %c0_i32 = arith.constant 0 : i32
    %c0_i32_0 = arith.constant 0 : i32
    %c0_i32_1 = arith.constant 0 : i32
    return %arg0, %c0_i32, %c0_i32_0 : i32, i32, i32
  }
  func.func @transform_6(%arg0: i32) -> (i32, i32, i32) {
    %c0_i32 = arith.constant 0 : i32
    %c0_i32_0 = arith.constant 0 : i32
    %c0_i32_1 = arith.constant 0 : i32
    return %arg0, %c0_i32, %c0_i32_0 : i32, i32, i32
  }
}

module attributes {stable_mosaic.version = 11 : i64} {
  func.func @_ca_apply_kernel(%arg0: i32, %arg1: memref<1x256x4xf32, #tpu.memory_space<vmem>>, %arg2: memref<1x1x4xf32, #tpu.memory_space<vmem>>, %arg3: memref<1x256x4xf32, #tpu.memory_space<vmem>>, %arg4: memref<1x256x1xf32, #tpu.memory_space<vmem>>, %arg5: memref<1x256x1xf32, #tpu.memory_space<vmem>>) attributes {dimension_semantics = [#tpu.dimension_semantics<parallel>], iteration_bounds = array<i64: 2>, scalar_prefetch = 0 : i64, scratch_operands = 0 : i64, tpu.core_type = #tpu.core_type<tc>, window_params = [{transform_indices = @transform_0, window_bounds = array<i64: 1, 256, 4>}, {transform_indices = @transform_1, window_bounds = array<i64: 1, 1, 4>}, {transform_indices = @transform_2, window_bounds = array<i64: 1, 256, 4>}, {transform_indices = @transform_3, window_bounds = array<i64: 1, 256, 1>}, {transform_indices = @transform_4, window_bounds = array<i64: 1, 256, 1>}]} {
    %c0 = arith.constant 0 : index
    %c0_0 = arith.constant 0 : index
    %c0_1 = arith.constant 0 : index
    %0 = vector.load %arg1[%c0, %c0_0, %c0_1] : memref<1x256x4xf32, #tpu.memory_space<vmem>>, vector<1x256x4xf32>
    %1 = vector.shape_cast %0 : vector<1x256x4xf32> to vector<256x4xf32>
    %c0_2 = arith.constant 0 : index
    %c0_3 = arith.constant 0 : index
    %c0_4 = arith.constant 0 : index
    %2 = vector.load %arg2[%c0_2, %c0_3, %c0_4] : memref<1x1x4xf32, #tpu.memory_space<vmem>>, vector<1x1x4xf32>
    %3 = vector.shape_cast %2 : vector<1x1x4xf32> to vector<1x4xf32>
    %4 = vector.broadcast %3 : vector<1x4xf32> to vector<256x4xf32>
    %5 = arith.mulf %1, %4 : vector<256x4xf32>
    %c0_5 = arith.constant 0 : index
    %c0_6 = arith.constant 0 : index
    %c0_7 = arith.constant 0 : index
    %6 = vector.load %arg3[%c0_5, %c0_6, %c0_7] : memref<1x256x4xf32, #tpu.memory_space<vmem>>, vector<1x256x4xf32>
    %7 = vector.shape_cast %6 : vector<1x256x4xf32> to vector<256x4xf32>
    %8 = vector.shape_cast %5 : vector<256x4xf32> to vector<1x256x4xf32>
    tpu.vector_store %arg3[%c0_5, %c0_6, %c0_7], %8 {strides = array<i32>} : memref<1x256x4xf32, #tpu.memory_space<vmem>>, vector<1x256x4xf32>,
    %cst = arith.constant dense<0.000000e+00> : vector<256xf32>
    %9 = vector.multi_reduction <add>, %5, %cst [1] : vector<256x4xf32> to vector<256xf32>
    %10 = vector.shape_cast %9 : vector<256xf32> to vector<256x1xf32>
    %cst_8 = arith.constant 4.000000e+00 : f32
    %11 = vector.broadcast %cst_8 : f32 to vector<256x1xf32>
    %12 = arith.divf %10, %11 : vector<256x1xf32>
    %c0_9 = arith.constant 0 : index
    %c0_10 = arith.constant 0 : index
    %c0_11 = arith.constant 0 : index
    %13 = vector.load %arg4[%c0_9, %c0_10, %c0_11] : memref<1x256x1xf32, #tpu.memory_space<vmem>>, vector<1x256x1xf32>
    %14 = vector.shape_cast %13 : vector<1x256x1xf32> to vector<256x1xf32>
    %15 = vector.shape_cast %12 : vector<256x1xf32> to vector<1x256x1xf32>
    tpu.vector_store %arg4[%c0_9, %c0_10, %c0_11], %15 {strides = array<i32>} : memref<1x256x1xf32, #tpu.memory_space<vmem>>, vector<1x256x1xf32>,
    %cst_12 = arith.constant dense<0xFF800000> : vector<256xf32>
    %16 = vector.multi_reduction <maximumf>, %5, %cst_12 [1] : vector<256x4xf32> to vector<256xf32>
    %17 = vector.shape_cast %16 : vector<256xf32> to vector<256x1xf32>
    %c0_13 = arith.constant 0 : index
    %c0_14 = arith.constant 0 : index
    %c0_15 = arith.constant 0 : index
    %18 = vector.load %arg5[%c0_13, %c0_14, %c0_15] : memref<1x256x1xf32, #tpu.memory_space<vmem>>, vector<1x256x1xf32>
    %19 = vector.shape_cast %18 : vector<1x256x1xf32> to vector<256x1xf32>
    %20 = vector.shape_cast %17 : vector<256x1xf32> to vector<1x256x1xf32>
    tpu.vector_store %arg5[%c0_13, %c0_14, %c0_15], %20 {strides = array<i32>} : memref<1x256x1xf32, #tpu.memory_space<vmem>>, vector<1x256x1xf32>,
    return
  }
  func.func @transform_0(%arg0: i32) -> (i32, i32, i32) {
    %c0_i32 = arith.constant 0 : i32
    %c0_i32_0 = arith.constant 0 : i32
    %c0_i32_1 = arith.constant 0 : i32
    return %arg0, %c0_i32, %c0_i32_0 : i32, i32, i32
  }
  func.func @transform_1(%arg0: i32) -> (i32, i32, i32) {
    %c0_i32 = arith.constant 0 : i32
    %c0_i32_0 = arith.constant 0 : i32
    %c0_i32_1 = arith.constant 0 : i32
    return %arg0, %c0_i32, %c0_i32_0 : i32, i32, i32
  }
  func.func @transform_2(%arg0: i32) -> (i32, i32, i32) {
    %c0_i32 = arith.constant 0 : i32
    %c0_i32_0 = arith.constant 0 : i32
    %c0_i32_1 = arith.constant 0 : i32
    return %arg0, %c0_i32, %c0_i32_0 : i32, i32, i32
  }
  func.func @transform_3(%arg0: i32) -> (i32, i32, i32) {
    %c0_i32 = arith.constant 0 : i32
    %c0_i32_0 = arith.constant 0 : i32
    %c0_i32_1 = arith.constant 0 : i32
    return %arg0, %c0_i32, %c0_i32_0 : i32, i32, i32
  }
  func.func @transform_4(%arg0: i32) -> (i32, i32, i32) {
    %c0_i32 = arith.constant 0 : i32
    %c0_i32_0 = arith.constant 0 : i32
    %c0_i32_1 = arith.constant 0 : i32
    return %arg0, %c0_i32, %c0_i32_0 : i32, i32, i32
  }
}

module attributes {stable_mosaic.version = 11 : i64} {
  func.func @_sa_apply_kernel(%arg0: i32, %arg1: memref<1x256x4xf32, #tpu.memory_space<vmem>>, %arg2: memref<1x256x98xf32, #tpu.memory_space<vmem>>, %arg3: memref<98x4xf32, #tpu.memory_space<vmem>>, %arg4: memref<1x256x4xf32, #tpu.memory_space<vmem>>, %arg5: memref<1x1x4xf32, #tpu.memory_space<vmem>>) attributes {dimension_semantics = [#tpu.dimension_semantics<parallel>], iteration_bounds = array<i64: 2>, scalar_prefetch = 0 : i64, scratch_operands = 0 : i64, tpu.core_type = #tpu.core_type<tc>, window_params = [{transform_indices = @transform_0, window_bounds = array<i64: 1, 256, 4>}, {transform_indices = @transform_1, window_bounds = array<i64: 1, 256, 98>}, {pipeline_mode = #tpu.pipeline_mode<synchronous>, transform_indices = @transform_2, window_bounds = array<i64: 98, 4>}, {transform_indices = @transform_3, window_bounds = array<i64: 1, 256, 4>}, {transform_indices = @transform_4, window_bounds = array<i64: 1, 1, 4>}]} {
    %c0 = arith.constant 0 : index
    %c0_0 = arith.constant 0 : index
    %c0_1 = arith.constant 0 : index
    %0 = vector.load %arg2[%c0, %c0_0, %c0_1] : memref<1x256x98xf32, #tpu.memory_space<vmem>>, vector<1x256x98xf32>
    %1 = vector.shape_cast %0 : vector<1x256x98xf32> to vector<256x98xf32>
    %c0_2 = arith.constant 0 : index
    %c0_3 = arith.constant 0 : index
    %2 = vector.load %arg3[%c0_2, %c0_3] : memref<98x4xf32, #tpu.memory_space<vmem>>, vector<98x4xf32>
    %cst = arith.constant dense<0.000000e+00> : vector<256x4xf32>
    %3 = tpu.matmul %1, %2, %cst {dimension_numbers = #tpu.dot_dimension_numbers<[1], [0], [0], [1], [0, 0, 1, 1], [], []>} : vector<256x98xf32>, vector<98x4xf32>, vector<256x4xf32> -> vector<256x4xf32>
    %c0_4 = arith.constant 0 : index
    %c0_5 = arith.constant 0 : index
    %c0_6 = arith.constant 0 : index
    %4 = vector.load %arg1[%c0_4, %c0_5, %c0_6] : memref<1x256x4xf32, #tpu.memory_space<vmem>>, vector<1x256x4xf32>
    %5 = vector.shape_cast %4 : vector<1x256x4xf32> to vector<256x4xf32>
    %6 = arith.negf %3 : vector<256x4xf32>
    %7 = math.exp %6 : vector<256x4xf32>
    %cst_7 = arith.constant 1.000000e+00 : f32
    %8 = vector.broadcast %cst_7 : f32 to vector<256x4xf32>
    %9 = arith.addf %8, %7 : vector<256x4xf32>
    %10 = arith.divf %8, %9 : vector<256x4xf32>
    %11 = arith.mulf %5, %10 : vector<256x4xf32>
    %c0_8 = arith.constant 0 : index
    %c0_9 = arith.constant 0 : index
    %c0_10 = arith.constant 0 : index
    %12 = vector.load %arg4[%c0_8, %c0_9, %c0_10] : memref<1x256x4xf32, #tpu.memory_space<vmem>>, vector<1x256x4xf32>
    %13 = vector.shape_cast %12 : vector<1x256x4xf32> to vector<256x4xf32>
    %14 = vector.shape_cast %11 : vector<256x4xf32> to vector<1x256x4xf32>
    tpu.vector_store %arg4[%c0_8, %c0_9, %c0_10], %14 {strides = array<i32>} : memref<1x256x4xf32, #tpu.memory_space<vmem>>, vector<1x256x4xf32>,
    %cst_11 = arith.constant dense<0.000000e+00> : vector<4xf32>
    %15 = vector.multi_reduction <add>, %11, %cst_11 [0] : vector<256x4xf32> to vector<4xf32>
    %16 = vector.shape_cast %15 : vector<4xf32> to vector<1x4xf32>
    %cst_12 = arith.constant 2.560000e+02 : f32
    %17 = vector.broadcast %cst_12 : f32 to vector<1x4xf32>
    %18 = arith.divf %16, %17 : vector<1x4xf32>
    %c0_13 = arith.constant 0 : index
    %c0_14 = arith.constant 0 : index
    %c0_15 = arith.constant 0 : index
    %19 = vector.load %arg5[%c0_13, %c0_14, %c0_15] : memref<1x1x4xf32, #tpu.memory_space<vmem>>, vector<1x1x4xf32>
    %20 = vector.shape_cast %19 : vector<1x1x4xf32> to vector<1x4xf32>
    %21 = vector.shape_cast %18 : vector<1x4xf32> to vector<1x1x4xf32>
    tpu.vector_store %arg5[%c0_13, %c0_14, %c0_15], %21 {strides = array<i32>} : memref<1x1x4xf32, #tpu.memory_space<vmem>>, vector<1x1x4xf32>,
    return
  }
  func.func @transform_0(%arg0: i32) -> (i32, i32, i32) {
    %c0_i32 = arith.constant 0 : i32
    %c0_i32_0 = arith.constant 0 : i32
    %c0_i32_1 = arith.constant 0 : i32
    return %arg0, %c0_i32, %c0_i32_0 : i32, i32, i32
  }
  func.func @transform_1(%arg0: i32) -> (i32, i32, i32) {
    %c0_i32 = arith.constant 0 : i32
    %c0_i32_0 = arith.constant 0 : i32
    %c0_i32_1 = arith.constant 0 : i32
    return %arg0, %c0_i32, %c0_i32_0 : i32, i32, i32
  }
  func.func @transform_2(%arg0: i32) -> (i32, i32) {
    %c0_i32 = arith.constant 0 : i32
    %c0_i32_0 = arith.constant 0 : i32
    %c0_i32_1 = arith.constant 0 : i32
    return %c0_i32, %c0_i32_0 : i32, i32
  }
  func.func @transform_3(%arg0: i32) -> (i32, i32, i32) {
    %c0_i32 = arith.constant 0 : i32
    %c0_i32_0 = arith.constant 0 : i32
    %c0_i32_1 = arith.constant 0 : i32
    return %arg0, %c0_i32, %c0_i32_0 : i32, i32, i32
  }
  func.func @transform_4(%arg0: i32) -> (i32, i32, i32) {
    %c0_i32 = arith.constant 0 : i32
    %c0_i32_0 = arith.constant 0 : i32
    %c0_i32_1 = arith.constant 0 : i32
    return %arg0, %c0_i32, %c0_i32_0 : i32, i32, i32
  }
}

module attributes {stable_mosaic.version = 11 : i64} {
  func.func @_eca_res_kernel(%arg0: i32, %arg1: memref<1x256x4xf32, #tpu.memory_space<vmem>>, %arg2: memref<1x1x4xf32, #tpu.memory_space<vmem>>, %arg3: memref<1x256x4xf32, #tpu.memory_space<vmem>>, %arg4: memref<1x256x4xf32, #tpu.memory_space<vmem>>) attributes {dimension_semantics = [#tpu.dimension_semantics<parallel>], iteration_bounds = array<i64: 2>, scalar_prefetch = 0 : i64, scratch_operands = 0 : i64, tpu.core_type = #tpu.core_type<tc>, window_params = [{transform_indices = @transform_0, window_bounds = array<i64: 1, 256, 4>}, {transform_indices = @transform_1, window_bounds = array<i64: 1, 1, 4>}, {transform_indices = @transform_2, window_bounds = array<i64: 1, 256, 4>}, {transform_indices = @transform_3, window_bounds = array<i64: 1, 256, 4>}]} {
    %c0 = arith.constant 0 : index
    %c0_0 = arith.constant 0 : index
    %c0_1 = arith.constant 0 : index
    %0 = vector.load %arg1[%c0, %c0_0, %c0_1] : memref<1x256x4xf32, #tpu.memory_space<vmem>>, vector<1x256x4xf32>
    %1 = vector.shape_cast %0 : vector<1x256x4xf32> to vector<256x4xf32>
    %c0_2 = arith.constant 0 : index
    %c0_3 = arith.constant 0 : index
    %c0_4 = arith.constant 0 : index
    %2 = vector.load %arg2[%c0_2, %c0_3, %c0_4] : memref<1x1x4xf32, #tpu.memory_space<vmem>>, vector<1x1x4xf32>
    %3 = vector.shape_cast %2 : vector<1x1x4xf32> to vector<1x4xf32>
    %4 = vector.broadcast %3 : vector<1x4xf32> to vector<256x4xf32>
    %5 = arith.mulf %1, %4 : vector<256x4xf32>
    %c0_5 = arith.constant 0 : index
    %c0_6 = arith.constant 0 : index
    %c0_7 = arith.constant 0 : index
    %6 = vector.load %arg3[%c0_5, %c0_6, %c0_7] : memref<1x256x4xf32, #tpu.memory_space<vmem>>, vector<1x256x4xf32>
    %7 = vector.shape_cast %6 : vector<1x256x4xf32> to vector<256x4xf32>
    %8 = arith.addf %5, %7 : vector<256x4xf32>
    %cst = arith.constant 0.000000e+00 : f32
    %9 = vector.broadcast %cst : f32 to vector<256x4xf32>
    %10 = arith.maximumf %8, %9 : vector<256x4xf32>
    %c0_8 = arith.constant 0 : index
    %c0_9 = arith.constant 0 : index
    %c0_10 = arith.constant 0 : index
    %11 = vector.load %arg4[%c0_8, %c0_9, %c0_10] : memref<1x256x4xf32, #tpu.memory_space<vmem>>, vector<1x256x4xf32>
    %12 = vector.shape_cast %11 : vector<1x256x4xf32> to vector<256x4xf32>
    %13 = vector.shape_cast %10 : vector<256x4xf32> to vector<1x256x4xf32>
    tpu.vector_store %arg4[%c0_8, %c0_9, %c0_10], %13 {strides = array<i32>} : memref<1x256x4xf32, #tpu.memory_space<vmem>>, vector<1x256x4xf32>,
    return
  }
  func.func @transform_0(%arg0: i32) -> (i32, i32, i32) {
    %c0_i32 = arith.constant 0 : i32
    %c0_i32_0 = arith.constant 0 : i32
    %c0_i32_1 = arith.constant 0 : i32
    return %arg0, %c0_i32, %c0_i32_0 : i32, i32, i32
  }
  func.func @transform_1(%arg0: i32) -> (i32, i32, i32) {
    %c0_i32 = arith.constant 0 : i32
    %c0_i32_0 = arith.constant 0 : i32
    %c0_i32_1 = arith.constant 0 : i32
    return %arg0, %c0_i32, %c0_i32_0 : i32, i32, i32
  }
  func.func @transform_2(%arg0: i32) -> (i32, i32, i32) {
    %c0_i32 = arith.constant 0 : i32
    %c0_i32_0 = arith.constant 0 : i32
    %c0_i32_1 = arith.constant 0 : i32
    return %arg0, %c0_i32, %c0_i32_0 : i32, i32, i32
  }
  func.func @transform_3(%arg0: i32) -> (i32, i32, i32) {
    %c0_i32 = arith.constant 0 : i32
    %c0_i32_0 = arith.constant 0 : i32
    %c0_i32_1 = arith.constant 0 : i32
    return %arg0, %c0_i32, %c0_i32_0 : i32, i32, i32
  }
}

</mosaic_0001>

<bundles_post_ra>
// kernel: resblock_cbam_forward.5
= control target key start
LH: loop header
LB: loop body
LE: loop exit
PB: predicated region body
PF: predicated region fallthrough
CT: control target
= control target key end

     0   :  { %s692_s12 = smov 0   ;;  %s925_s0 = inlined_call_operand.vmem [shape: f32[2,256,4], index: 0, kind: input, shape index: {}]   ;;  %s926_s1 = inlined_call_operand.vmem [shape: f32[4,4], index: 1, kind: input, shape index: {}]   ;;  %s927_s2 = inlined_call_operand.vmem [shape: f32[2,4], index: 2, kind: input, shape index: {}]   ;;  %s928_s3 = inlined_call_operand.vmem [shape: f32[2,256,4], index: 3, kind: output, shape index: {}]  }
   0x1 LB: > { %s605_s13 = sadd.s32 4294967295, %s670_s12   ;;  %p609_p0 = scmp.ge.s32.totalorder %s670_s12, 1  ;;  %s670_s12 = sphi %s692_s12, %s13_s12  }
   0x2   : > { %p137_p1 = scmp.lt.s32.totalorder %s670_s12, 3 }
   0x4   : > { %p138_p2 = pnand %p609_p0, %p137_p1 }
   0x5   : > { %p161_p3 = scmp.lt.s32.totalorder (!%p138_p2), %s605_s13, 1 }
   0x6   : > { %141 = sbr.rel (%p138_p2) target bundleno = 211 (0xd3), region = 32 }
   0xb   : > { %v203_v0 = vld [vmem:[%s926_s1] sm:$0xf]  ;;  %vm301_vm0 = vcmask 1043456   ;;  %s930_s13 = smov (!%p161_p3, %s605_s13), 1  ;;  %vm204_vm1 = vcmask 31744  }
   0xc   : > { %652 = vmatpush.msk.msra.mxu2 %vm301_vm0, %v203_v0  ;;  %653 = vmatpush.msk.msra.mxu3 %vm301_vm0, %v203_v0  ;;  %s649_s16 = sshll.u32 %s930_s13, 8  ;;  %v780_v33 = vld [vmem:[%s927_s2] ss:$0 sm:$0xff]  ;;  %v785_v34 = vld [vmem:[%s927_s2 + $0x1] ss:$0 sm:$0xff] }
   0xd   : > { %614 = vmatpush.msk.msra.mxu0 %vm301_vm0, %v203_v0  ;;  %651 = vmatpush.msk.msra.mxu1 %vm301_vm0, %v203_v0  ;;  %s711_s19 = scalar_lea.vmem %s925_s0, %s649_s16  ;;  %s796_s26 = scalar_lea.vmem %s928_s3, %s649_s16 }
   0xe   : > { %v187_v1 = vld [vmem:[%s711_s19 + $0x80] sm:$0xff]  ;;  %v188_v5 = vld [vmem:[%s711_s19 + $0x88] sm:$0xff]  ;;  %v189_v9 = vld [vmem:[%s711_s19 + $0x90] sm:$0xff] }
   0xf   : > { %v195_v2 = vld [vmem:[%s711_s19 + $0xc0] sm:$0xff]  ;;  %631 = vmatmul.msk.f32.vlgmr.msra.gmra.mxu2 %vm204_vm1, %v187_v1  ;;  %v196_v6 = vld [vmem:[%s711_s19 + $0xc8] sm:$0xff]  ;;  %v197_v10 = vld [vmem:[%s711_s19 + $0xd0] sm:$0xff] }
  0x10   : > { %v171_v3 = vld [vmem:[%s711_s19] sm:$0xff]  ;;  %639 = vmatmul.msk.f32.vlgmr.msra.gmra.mxu3 %vm204_vm1, %v195_v2  ;;  %v172_v7 = vld [vmem:[%s711_s19 + $0x8] sm:$0xff]  ;;  %v173_v11 = vld [vmem:[%s711_s19 + $0x10] sm:$0xff] }
  0x11   : > { %v179_v4 = vld [vmem:[%s711_s19 + $0x40] sm:$0xff]  ;;  %615 = vmatmul.msk.f32.vlgmr.msra.gmra.mxu0 %vm204_vm1, %v171_v3  ;;  %v180_v8 = vld [vmem:[%s711_s19 + $0x48] sm:$0xff]  ;;  %v181_v12 = vld [vmem:[%s711_s19 + $0x50] sm:$0xff] }
  0x12   : > { %623 = vmatmul.msk.f32.vlgmr.msra.gmra.mxu1 %vm204_vm1, %v179_v4  ;;  %v190_v13 = vld [vmem:[%s711_s19 + $0x98] sm:$0xff]  ;;  %v191_v17 = vld [vmem:[%s711_s19 + $0xa0] sm:$0xff]  ;;  %v192_v21 = vld [vmem:[%s711_s19 + $0xa8] sm:$0xff] }
  0x13   : > { %v198_v14 = vld [vmem:[%s711_s19 + $0xd8] sm:$0xff]  ;;  %v199_v18 = vld [vmem:[%s711_s19 + $0xe0] sm:$0xff]  ;;  %v200_v22 = vld [vmem:[%s711_s19 + $0xe8] sm:$0xff] }
  0x14   : > { %v174_v15 = vld [vmem:[%s711_s19 + $0x18] sm:$0xff]  ;;  %v175_v19 = vld [vmem:[%s711_s19 + $0x20] sm:$0xff]  ;;  %v176_v23 = vld [vmem:[%s711_s19 + $0x28] sm:$0xff] }
  0x15   : > { %v182_v16 = vld [vmem:[%s711_s19 + $0x58] sm:$0xff]  ;;  %v183_v20 = vld [vmem:[%s711_s19 + $0x60] sm:$0xff]  ;;  %v184_v24 = vld [vmem:[%s711_s19 + $0x68] sm:$0xff] }
  0x16   : > { %v193_v25 = vld [vmem:[%s711_s19 + $0xb0] sm:$0xff]  ;;  %v194_v29 = vld [vmem:[%s711_s19 + $0xb8] sm:$0xff] }
  0x17   : > { %632 = vmatmul.msk.f32.gmra.mxu2 %vm204_vm1, %v188_v5  ;;  %v201_v26 = vld [vmem:[%s711_s19 + $0xf0] sm:$0xff]  ;;  %v202_v30 = vld [vmem:[%s711_s19 + $0xf8] sm:$0xff] }
  0x18   : > { %640 = vmatmul.msk.f32.gmra.mxu3 %vm204_vm1, %v196_v6  ;;  %v177_v27 = vld [vmem:[%s711_s19 + $0x30] sm:$0xff]  ;;  %v178_v31 = vld [vmem:[%s711_s19 + $0x38] sm:$0xff] }
  0x19   : > { %616 = vmatmul.msk.f32.gmra.mxu0 %vm204_vm1, %v172_v7  ;;  %v185_v28 = vld [vmem:[%s711_s19 + $0x70] sm:$0xff]  ;;  %v186_v32 = vld [vmem:[%s711_s19 + $0x78] sm:$0xff] }
  0x1a   : > { %624 = vmatmul.msk.f32.gmra.mxu1 %vm204_vm1, %v180_v8 }
  0x1f   : > { %633 = vmatmul.msk.f32.gmra.mxu2 %vm204_vm1, %v189_v9 }
  0x20   : > { %641 = vmatmul.msk.f32.gmra.mxu3 %vm204_vm1, %v197_v10 }
  0x21   : > { %617 = vmatmul.msk.f32.gmra.mxu0 %vm204_vm1, %v173_v11 }
  0x22   : > { %625 = vmatmul.msk.f32.gmra.mxu1 %vm204_vm1, %v181_v12 }
  0x27   : > { %634 = vmatmul.msk.f32.gmra.mxu2 %vm204_vm1, %v190_v13 }
  0x28   : > { %642 = vmatmul.msk.f32.gmra.mxu3 %vm204_vm1, %v198_v14 }
  0x29   : > { %618 = vmatmul.msk.f32.gmra.mxu0 %vm204_vm1, %v174_v15 }
  0x2a   : > { %626 = vmatmul.msk.f32.gmra.mxu1 %vm204_vm1, %v182_v16 }
  0x2f   : > { %635 = vmatmul.msk.f32.gmra.mxu2 %vm204_vm1, %v191_v17 }
  0x30   : > { %643 = vmatmul.msk.f32.gmra.mxu3 %vm204_vm1, %v199_v18 }
  0x31   : > { %619 = vmatmul.msk.f32.gmra.mxu0 %vm204_vm1, %v175_v19 }
  0x32   : > { %627 = vmatmul.msk.f32.gmra.mxu1 %vm204_vm1, %v183_v20 }
  0x37   : > { %636 = vmatmul.msk.f32.gmra.mxu2 %vm204_vm1, %v192_v21 }
  0x38   : > { %644 = vmatmul.msk.f32.gmra.mxu3 %vm204_vm1, %v200_v22 }
  0x39   : > { %620 = vmatmul.msk.f32.gmra.mxu0 %vm204_vm1, %v176_v23 }
  0x3a   : > { %628 = vmatmul.msk.f32.gmra.mxu1 %vm204_vm1, %v184_v24 }
  0x3f   : > { %637 = vmatmul.msk.f32.gmra.mxu2 %vm204_vm1, %v193_v25 }
  0x40   : > { %645 = vmatmul.msk.f32.gmra.mxu3 %vm204_vm1, %v201_v26 }
  0x41   : > { %621 = vmatmul.msk.f32.gmra.mxu0 %vm204_vm1, %v177_v27 }
  0x42   : > { %629 = vmatmul.msk.f32.gmra.mxu1 %vm204_vm1, %v185_v28 }
  0x47   : > { %638 = vmatmul.msk.f32.gmra.mxu2 %vm204_vm1, %v194_v29 }
  0x48   : > { %646 = vmatmul.msk.f32.gmra.mxu3 %vm204_vm1, %v202_v30 }
  0x49   : > { %622 = vmatmul.msk.f32.gmra.mxu0 %vm204_vm1, %v178_v31 }
  0x4a   : > { %630 = vmatmul.msk.f32.gmra.mxu1 %vm204_vm1, %v186_v32 }
  0x8e   : > { %v322_v35 = vpop.f32.mrf.mxu0 }
  0x8f   : > { %v346_v36 = vpop.f32.mrf.mxu1  ;;  %v420_v37 = vmul.f32 %v780_v33, %v322_v35 }
  0x90   : > { %v428_v38 = vmul.f32 %v780_v33, %v346_v36 }
  0x91   : > { %v454_v39 = vadd.f32 %v785_v34, %v420_v37 }
  0x92   : > { %v462_v40 = vadd.f32 %v785_v34, %v428_v38  ;;  %v370_v43 = vpop.f32.mrf.mxu2 }
  0x93   : > { %v486_v41 = vmax.f32 %v454_v39, 0.0  ;;  %v394_v44 = vpop.f32.mrf.mxu3  ;;  %v436_v45 = vmul.f32 %v780_v33, %v370_v43 }
  0x94   : > { %v494_v42 = vmax.f32 %v462_v40, 0.0  ;;  %v444_v46 = vmul.f32 %v780_v33, %v394_v44 }
  0x95   : > { %518 = vst.msk [vmem:[%s796_s26] sm:$0xff] %vm204_vm1, %v486_v41  ;;  %v470_v47 = vadd.f32 %v785_v34, %v436_v45 }
  0x96   : > { %526 = vst.msk [vmem:[%s796_s26 + $0x40] sm:$0xff] %vm204_vm1, %v494_v42  ;;  %v478_v48 = vadd.f32 %v785_v34, %v444_v46  ;;  %v325_v49 = vpop.f32.mrf.mxu0 }
  0x97   : > { %v349_v50 = vpop.f32.mrf.mxu1  ;;  %v421_v51 = vmul.f32 %v780_v33, %v325_v49  ;;  %v502_v53 = vmax.f32 %v470_v47, 0.0 }
  0x98   : > { %v429_v52 = vmul.f32 %v780_v33, %v349_v50  ;;  %v510_v54 = vmax.f32 %v478_v48, 0.0 }
  0x99   : > { %v455_v55 = vadd.f32 %v785_v34, %v421_v51  ;;  %534 = vst.msk [vmem:[%s796_s26 + $0x80] sm:$0xff] %vm204_vm1, %v502_v53 }
  0x9a   : > { %v463_v56 = vadd.f32 %v785_v34, %v429_v52  ;;  %542 = vst.msk [vmem:[%s796_s26 + $0xc0] sm:$0xff] %vm204_vm1, %v510_v54  ;;  %v373_v59 = vpop.f32.mrf.mxu2 }
  0x9b   : > { %v487_v57 = vmax.f32 %v455_v55, 0.0  ;;  %v397_v60 = vpop.f32.mrf.mxu3  ;;  %v437_v61 = vmul.f32 %v780_v33, %v373_v59 }
  0x9c   : > { %v495_v58 = vmax.f32 %v463_v56, 0.0  ;;  %v445_v62 = vmul.f32 %v780_v33, %v397_v60 }
  0x9d   : > { %519 = vst.msk [vmem:[%s796_s26 + $0x8] sm:$0xff] %vm204_vm1, %v487_v57  ;;  %v471_v63 = vadd.f32 %v785_v34, %v437_v61 }
  0x9e   : > { %527 = vst.msk [vmem:[%s796_s26 + $0x48] sm:$0xff] %vm204_vm1, %v495_v58  ;;  %v479_v0 = vadd.f32 %v785_v34, %v445_v62  ;;  %v328_v1 = vpop.f32.mrf.mxu0 }
  0x9f   : > { %v352_v2 = vpop.f32.mrf.mxu1  ;;  %v422_v3 = vmul.f32 %v780_v33, %v328_v1  ;;  %v503_v5 = vmax.f32 %v471_v63, 0.0 }
  0xa0   : > { %v430_v4 = vmul.f32 %v780_v33, %v352_v2  ;;  %v511_v6 = vmax.f32 %v479_v0, 0.0 }
  0xa1   : > { %v456_v7 = vadd.f32 %v785_v34, %v422_v3  ;;  %535 = vst.msk [vmem:[%s796_s26 + $0x88] sm:$0xff] %vm204_vm1, %v503_v5 }
  0xa2   : > { %v464_v8 = vadd.f32 %v785_v34, %v430_v4  ;;  %543 = vst.msk [vmem:[%s796_s26 + $0xc8] sm:$0xff] %vm204_vm1, %v511_v6  ;;  %v376_v11 = vpop.f32.mrf.mxu2 }
  0xa3   : > { %v488_v9 = vmax.f32 %v456_v7, 0.0  ;;  %v400_v12 = vpop.f32.mrf.mxu3  ;;  %v438_v13 = vmul.f32 %v780_v33, %v376_v11 }
  0xa4   : > { %v496_v10 = vmax.f32 %v464_v8, 0.0  ;;  %v446_v14 = vmul.f32 %v780_v33, %v400_v12 }
  0xa5   : > { %520 = vst.msk [vmem:[%s796_s26 + $0x10] sm:$0xff] %vm204_vm1, %v488_v9  ;;  %v472_v15 = vadd.f32 %v785_v34, %v438_v13 }
  0xa6   : > { %528 = vst.msk [vmem:[%s796_s26 + $0x50] sm:$0xff] %vm204_vm1, %v496_v10  ;;  %v480_v16 = vadd.f32 %v785_v34, %v446_v14  ;;  %v331_v17 = vpop.f32.mrf.mxu0 }
  0xa7   : > { %v355_v18 = vpop.f32.mrf.mxu1  ;;  %v423_v19 = vmul.f32 %v780_v33, %v331_v17  ;;  %v504_v21 = vmax.f32 %v472_v15, 0.0 }
  0xa8   : > { %v431_v20 = vmul.f32 %v780_v33, %v355_v18  ;;  %v512_v22 = vmax.f32 %v480_v16, 0.0 }
  0xa9   : > { %v457_v23 = vadd.f32 %v785_v34, %v423_v19  ;;  %536 = vst.msk [vmem:[%s796_s26 + $0x90] sm:$0xff] %vm204_vm1, %v504_v21 }
  0xaa   : > { %v465_v24 = vadd.f32 %v785_v34, %v431_v20  ;;  %544 = vst.msk [vmem:[%s796_s26 + $0xd0] sm:$0xff] %vm204_vm1, %v512_v22  ;;  %v379_v27 = vpop.f32.mrf.mxu2 }
  0xab   : > { %v489_v25 = vmax.f32 %v457_v23, 0.0  ;;  %v403_v28 = vpop.f32.mrf.mxu3  ;;  %v439_v29 = vmul.f32 %v780_v33, %v379_v27 }
  0xac   : > { %v497_v26 = vmax.f32 %v465_v24, 0.0  ;;  %v447_v30 = vmul.f32 %v780_v33, %v403_v28 }
  0xad   : > { %521 = vst.msk [vmem:[%s796_s26 + $0x18] sm:$0xff] %vm204_vm1, %v489_v25  ;;  %v473_v31 = vadd.f32 %v785_v34, %v439_v29 }
  0xae   : > { %529 = vst.msk [vmem:[%s796_s26 + $0x58] sm:$0xff] %vm204_vm1, %v497_v26  ;;  %v481_v32 = vadd.f32 %v785_v34, %v447_v30  ;;  %v334_v35 = vpop.f32.mrf.mxu0 }
  0xaf   : > { %v358_v36 = vpop.f32.mrf.mxu1  ;;  %v424_v37 = vmul.f32 %v780_v33, %v334_v35  ;;  %v505_v39 = vmax.f32 %v473_v31, 0.0 }
  0xb0   : > { %v432_v38 = vmul.f32 %v780_v33, %v358_v36  ;;  %v513_v40 = vmax.f32 %v481_v32, 0.0 }
  0xb1   : > { %v458_v41 = vadd.f32 %v785_v34, %v424_v37  ;;  %537 = vst.msk [vmem:[%s796_s26 + $0x98] sm:$0xff] %vm204_vm1, %v505_v39 }
  0xb2   : > { %v466_v42 = vadd.f32 %v785_v34, %v432_v38  ;;  %545 = vst.msk [vmem:[%s796_s26 + $0xd8] sm:$0xff] %vm204_vm1, %v513_v40  ;;  %v382_v45 = vpop.f32.mrf.mxu2 }
  0xb3   : > { %v490_v43 = vmax.f32 %v458_v41, 0.0  ;;  %v406_v46 = vpop.f32.mrf.mxu3  ;;  %v440_v47 = vmul.f32 %v780_v33, %v382_v45 }
  0xb4   : > { %v498_v44 = vmax.f32 %v466_v42, 0.0  ;;  %v448_v48 = vmul.f32 %v780_v33, %v406_v46 }
  0xb5   : > { %522 = vst.msk [vmem:[%s796_s26 + $0x20] sm:$0xff] %vm204_vm1, %v490_v43  ;;  %v474_v49 = vadd.f32 %v785_v34, %v440_v47 }
  0xb6   : > { %530 = vst.msk [vmem:[%s796_s26 + $0x60] sm:$0xff] %vm204_vm1, %v498_v44  ;;  %v482_v50 = vadd.f32 %v785_v34, %v448_v48  ;;  %v337_v51 = vpop.f32.mrf.mxu0 }
  0xb7   : > { %v361_v52 = vpop.f32.mrf.mxu1  ;;  %v425_v53 = vmul.f32 %v780_v33, %v337_v51  ;;  %v506_v55 = vmax.f32 %v474_v49, 0.0 }
  0xb8   : > { %v433_v54 = vmul.f32 %v780_v33, %v361_v52  ;;  %v514_v56 = vmax.f32 %v482_v50, 0.0 }
  0xb9   : > { %v459_v57 = vadd.f32 %v785_v34, %v425_v53  ;;  %538 = vst.msk [vmem:[%s796_s26 + $0xa0] sm:$0xff] %vm204_vm1, %v506_v55 }
  0xba   : > { %v467_v58 = vadd.f32 %v785_v34, %v433_v54  ;;  %546 = vst.msk [vmem:[%s796_s26 + $0xe0] sm:$0xff] %vm204_vm1, %v514_v56  ;;  %v385_v61 = vpop.f32.mrf.mxu2 }
  0xbb   : > { %v491_v59 = vmax.f32 %v459_v57, 0.0  ;;  %v409_v62 = vpop.f32.mrf.mxu3  ;;  %v441_v63 = vmul.f32 %v780_v33, %v385_v61 }
  0xbc   : > { %v499_v60 = vmax.f32 %v467_v58, 0.0  ;;  %v449_v0 = vmul.f32 %v780_v33, %v409_v62 }
  0xbd   : > { %523 = vst.msk [vmem:[%s796_s26 + $0x28] sm:$0xff] %vm204_vm1, %v491_v59  ;;  %v475_v1 = vadd.f32 %v785_v34, %v441_v63 }
  0xbe   : > { %531 = vst.msk [vmem:[%s796_s26 + $0x68] sm:$0xff] %vm204_vm1, %v499_v60  ;;  %v483_v2 = vadd.f32 %v785_v34, %v449_v0  ;;  %v340_v3 = vpop.f32.mrf.mxu0 }
  0xbf   : > { %v364_v4 = vpop.f32.mrf.mxu1  ;;  %v426_v5 = vmul.f32 %v780_v33, %v340_v3  ;;  %v507_v7 = vmax.f32 %v475_v1, 0.0 }
  0xc0   : > { %v434_v6 = vmul.f32 %v780_v33, %v364_v4  ;;  %v515_v8 = vmax.f32 %v483_v2, 0.0 }
  0xc1   : > { %v460_v9 = vadd.f32 %v785_v34, %v426_v5  ;;  %539 = vst.msk [vmem:[%s796_s26 + $0xa8] sm:$0xff] %vm204_vm1, %v507_v7 }
  0xc2   : > { %v468_v10 = vadd.f32 %v785_v34, %v434_v6  ;;  %547 = vst.msk [vmem:[%s796_s26 + $0xe8] sm:$0xff] %vm204_vm1, %v515_v8  ;;  %v388_v13 = vpop.f32.mrf.mxu2 }
  0xc3   : > { %v492_v11 = vmax.f32 %v460_v9, 0.0  ;;  %v412_v14 = vpop.f32.mrf.mxu3  ;;  %v442_v15 = vmul.f32 %v780_v33, %v388_v13 }
  0xc4   : > { %v500_v12 = vmax.f32 %v468_v10, 0.0  ;;  %v450_v16 = vmul.f32 %v780_v33, %v412_v14 }
  0xc5   : > { %524 = vst.msk [vmem:[%s796_s26 + $0x30] sm:$0xff] %vm204_vm1, %v492_v11  ;;  %v476_v17 = vadd.f32 %v785_v34, %v442_v15 }
  0xc6   : > { %532 = vst.msk [vmem:[%s796_s26 + $0x70] sm:$0xff] %vm204_vm1, %v500_v12  ;;  %v484_v18 = vadd.f32 %v785_v34, %v450_v16  ;;  %v343_v19 = vpop.f32.mrf.mxu0 }
  0xc7   : > { %v367_v20 = vpop.f32.mrf.mxu1  ;;  %v427_v21 = vmul.f32 %v780_v33, %v343_v19  ;;  %v508_v23 = vmax.f32 %v476_v17, 0.0 }
  0xc8   : > { %v435_v22 = vmul.f32 %v780_v33, %v367_v20  ;;  %v516_v24 = vmax.f32 %v484_v18, 0.0 }
  0xc9   : > { %v461_v25 = vadd.f32 %v785_v34, %v427_v21  ;;  %540 = vst.msk [vmem:[%s796_s26 + $0xb0] sm:$0xff] %vm204_vm1, %v508_v23 }
  0xca   : > { %v469_v26 = vadd.f32 %v785_v34, %v435_v22  ;;  %548 = vst.msk [vmem:[%s796_s26 + $0xf0] sm:$0xff] %vm204_vm1, %v516_v24  ;;  %v391_v29 = vpop.f32.mrf.mxu2 }
  0xcb   : > { %v493_v27 = vmax.f32 %v461_v25, 0.0  ;;  %v415_v30 = vpop.f32.mrf.mxu3  ;;  %v443_v31 = vmul.f32 %v780_v33, %v391_v29 }
  0xcc   : > { %v501_v28 = vmax.f32 %v469_v26, 0.0  ;;  %v451_v32 = vmul.f32 %v780_v33, %v415_v30 }
  0xcd   : > { %525 = vst.msk [vmem:[%s796_s26 + $0x38] sm:$0xff] %vm204_vm1, %v493_v27  ;;  %v477_v35 = vadd.f32 %v785_v34, %v443_v31 }
  0xce   : > { %533 = vst.msk [vmem:[%s796_s26 + $0x78] sm:$0xff] %vm204_vm1, %v501_v28  ;;  %v485_v36 = vadd.f32 %v785_v34, %v451_v32 }
  0xcf   : > { %v509_v37 = vmax.f32 %v477_v35, 0.0 }
  0xd0   : > { %v517_v38 = vmax.f32 %v485_v36, 0.0 }
  0xd1   : > { %541 = vst.msk [vmem:[%s796_s26 + $0xb8] sm:$0xff] %vm204_vm1, %v509_v37 }
  0xd2   : > { %549 = vst.msk [vmem:[%s796_s26 + $0xf8] sm:$0xff] %vm204_vm1, %v517_v38 }
  0xd3 PF: > { %s13_s12 = sadd.s32 1, %s670_s12  }
  0xd4   : > { %p10_p4 = scmp.ge.s32.totalorder %s13_s12, 4  }
  0xd6   :  { %12 = sbr.rel (!%p10_p4) target bundleno = 1 (0x1), region = 62 }

// kernel: resblock_cbam_forward.7
= control target key start
LH: loop header
LB: loop body
LE: loop exit
PB: predicated region body
PF: predicated region fallthrough
CT: control target
= control target key end

     0   :  { %s829_s15 = smov 0   ;;  %s1385_s0 = inlined_call_operand.vmem [shape: f32[2,256,4], index: 0, kind: input, shape index: {}]   ;;  %s1386_s1 = inlined_call_operand.vmem [shape: f32[2,1,4], index: 1, kind: input, shape index: {}]   ;;  %s1387_s2 = inlined_call_operand.vmem [shape: f32[2,256,4], index: 2, kind: output, shape index: {0}]   ;;  %s1388_s3 = inlined_call_operand.vmem [shape: f32[2,256,1], index: 3, kind: output, shape index: {1}]   ;;  %s1389_s4 = inlined_call_operand.vmem [shape: f32[2,256,1], index: 4, kind: output, shape index: {2}]  }
   0x1 LB: > { %s764_s16 = sadd.s32 4294967295, %s801_s15   ;;  %p768_p0 = scmp.ge.s32.totalorder %s801_s15, 1  ;;  %s801_s15 = sphi %s829_s15, %s15_s15  }
   0x2   : > { %p175_p1 = scmp.lt.s32.totalorder %s801_s15, 3 }
   0x4   : > { %p176_p2 = pnand %p768_p0, %p175_p1 }
   0x5   : > { %p214_p3 = scmp.lt.s32.totalorder (!%p176_p2), %s764_s16, 1 }
   0x6   : > { %179 = sbr.rel (%p176_p2) target bundleno = 303 (0x12f), region = 28 }
   0xb   : > { %s1391_s16 = smov (!%p214_p3, %s764_s16), 1  ;;  %vm305_vm0 = vcmask 31744   ;;  %vm473_vm2 = vcmask 7168  }
   0xc   : > { %s837_s17 = sshll.u32 %s1391_s16, 8  ;;  %s221_s20 = scalar_lea.vmem %s1386_s1, %s1391_s16 }
   0xd   : > { %s846_s23 = scalar_lea.vmem %s1385_s0, %s837_s17  ;;  %v848_v0 = vld [vmem:[%s221_s20] ss:$0 sm:$0xff]  ;;  %s854_s26 = scalar_lea.vmem %s1387_s2, %s837_s17 }
   0xe   : > { %v237_v1 = vld [vmem:[%s846_s23] sm:$0xff]  ;;  %v239_v3 = vld [vmem:[%s846_s23 + $0x10] sm:$0xff]  ;;  %v238_v7 = vld [vmem:[%s846_s23 + $0x8] sm:$0xff]  ;;  %s1176_s29 = scalar_lea.vmem %s1388_s3, %s837_s17  ;;  %s1310_s6 = scalar_lea.vmem %s1389_s4, %s837_s17 }
   0xf   : > { %v241_v2 = vld [vmem:[%s846_s23 + $0x20] sm:$0xff]  ;;  %v860_v4 = vmul.f32 %v848_v0, %v237_v1  ;;  %v866_v6 = vmul.f32 %v848_v0, %v239_v3  ;;  %v242_v8 = vld [vmem:[%s846_s23 + $0x28] sm:$0xff]  ;;  %v240_v12 = vld [vmem:[%s846_s23 + $0x18] sm:$0xff]  ;;  %v884_v13 = vmul.f32 %v848_v0, %v238_v7 }
  0x10   : > { %v863_v5 = vmul.f32 %v848_v0, %v241_v2  ;;  %v243_v14 = vld [vmem:[%s846_s23 + $0x30] sm:$0xff]  ;;  %v891_v15 = vmul.f32 %v848_v0, %v242_v8  ;;  %v245_v16 = vld [vmem:[%s846_s23 + $0x40] sm:$0xff]  ;;  %v898_v17 = vmul.f32 %v848_v0, %v240_v12  ;;  %v244_v18 = vld [vmem:[%s846_s23 + $0x38] sm:$0xff] }
  0x11   : > { %v338_v9 = vsel %vm305_vm0, %v860_v4, 0.0  ;;  %306 = vst.msk [vmem:[%s854_s26] sm:$0xff] %vm305_vm0, %v860_v4  ;;  %v344_v11 = vsel %vm305_vm0, %v866_v6, 0.0  ;;  %v905_v19 = vmul.f32 %v848_v0, %v243_v14  ;;  %v246_v20 = vld [vmem:[%s846_s23 + $0x48] sm:$0xff]  ;;  %v912_v21 = vmul.f32 %v848_v0, %v245_v16  ;;  %v248_v22 = vld [vmem:[%s846_s23 + $0x58] sm:$0xff]  ;;  %v247_v26 = vld [vmem:[%s846_s23 + $0x50] sm:$0xff] }
  0x12   : > { %v350_v10 = vsel %vm305_vm0, %v863_v5, 0.0  ;;  %339 = vadd.xlane.f32.xlu0 %v338_v9  ;;  %310 = vst.msk [vmem:[%s854_s26 + $0x20] sm:$0xff] %vm305_vm0, %v863_v5  ;;  %345 = vadd.xlane.f32.xlu1 %v344_v11  ;;  %v341_v23 = vsel %vm305_vm0, %v884_v13, 0.0  ;;  %v353_v24 = vsel %vm305_vm0, %v891_v15, 0.0  ;;  %v923_v25 = vmul.f32 %v848_v0, %v244_v18  ;;  %v249_v29 = vld [vmem:[%s846_s23 + $0x60] sm:$0xff]  ;;  %v251_v31 = vld [vmem:[%s846_s23 + $0x70] sm:$0xff] }
  0x13   : > { %351 = vadd.xlane.f32.xlu2 %v350_v10  ;;  %308 = vst.msk [vmem:[%s854_s26 + $0x10] sm:$0xff] %vm305_vm0, %v866_v6  ;;  %v347_v27 = vsel %vm305_vm0, %v898_v17, 0.0  ;;  %v932_v28 = vmul.f32 %v848_v0, %v246_v20  ;;  %v939_v30 = vmul.f32 %v848_v0, %v248_v22  ;;  %v946_v32 = vmul.f32 %v848_v0, %v247_v26  ;;  %v250_v33 = vld [vmem:[%s846_s23 + $0x68] sm:$0xff]  ;;  %v252_v35 = vld [vmem:[%s846_s23 + $0x78] sm:$0xff]  ;;  %v253_v39 = vld [vmem:[%s846_s23 + $0x80] sm:$0xff] }
  0x14   : > { %307 = vst.msk [vmem:[%s854_s26 + $0x8] sm:$0xff] %vm305_vm0, %v884_v13  ;;  %v953_v34 = vmul.f32 %v848_v0, %v249_v29  ;;  %v960_v36 = vmul.f32 %v848_v0, %v251_v31  ;;  %v254_v37 = vld [vmem:[%s846_s23 + $0x88] sm:$0xff]  ;;  %v967_v38 = vmul.f32 %v848_v0, %v250_v33  ;;  %v974_v40 = vmul.f32 %v848_v0, %v252_v35  ;;  %v255_v41 = vld [vmem:[%s846_s23 + $0x90] sm:$0xff]  ;;  %v257_v48 = vld [vmem:[%s846_s23 + $0xa0] sm:$0xff] }
  0x15   : > { %311 = vst.msk [vmem:[%s854_s26 + $0x28] sm:$0xff] %vm305_vm0, %v891_v15  ;;  %v356_v42 = vsel %vm305_vm0, %v905_v19, 0.0  ;;  %v362_v43 = vsel %vm305_vm0, %v912_v21, 0.0  ;;  %v985_v44 = vmul.f32 %v848_v0, %v254_v37  ;;  %v359_v45 = vsel %vm305_vm0, %v923_v25, 0.0  ;;  %v256_v49 = vld [vmem:[%s846_s23 + $0x98] sm:$0xff]  ;;  %v258_v51 = vld [vmem:[%s846_s23 + $0xa8] sm:$0xff] }
  0x16   : > { %309 = vst.msk [vmem:[%s854_s26 + $0x18] sm:$0xff] %vm305_vm0, %v898_v17  ;;  %v993_v46 = vmul.f32 %v848_v0, %v253_v39  ;;  %v999_v47 = vmul.f32 %v848_v0, %v255_v41  ;;  %v1010_v50 = vmul.f32 %v848_v0, %v257_v48  ;;  %v1014_v52 = vmul.f32 %v848_v0, %v256_v49  ;;  %v260_v57 = vld [vmem:[%s846_s23 + $0xb8] sm:$0xff]  ;;  %v259_v58 = vld [vmem:[%s846_s23 + $0xb0] sm:$0xff]  ;;  %v261_v60 = vld [vmem:[%s846_s23 + $0xc0] sm:$0xff] }
  0x17   : > { %312 = vst.msk [vmem:[%s854_s26 + $0x30] sm:$0xff] %vm305_vm0, %v905_v19  ;;  %v1020_v53 = vmul.f32 %v848_v0, %v258_v51  ;;  %v365_v54 = vsel %vm305_vm0, %v932_v28, 0.0  ;;  %v371_v55 = vsel %vm305_vm0, %v939_v30, 0.0  ;;  %v368_v56 = vsel %vm305_vm0, %v946_v32, 0.0  ;;  %v263_v3 = vld [vmem:[%s846_s23 + $0xd0] sm:$0xff]  ;;  %v262_v7 = vld [vmem:[%s846_s23 + $0xc8] sm:$0xff] }
  0x18   : > { %314 = vst.msk [vmem:[%s854_s26 + $0x40] sm:$0xff] %vm305_vm0, %v912_v21  ;;  %v1037_v59 = vmul.f32 %v848_v0, %v260_v57  ;;  %v1041_v61 = vmul.f32 %v848_v0, %v259_v58  ;;  %v1047_v62 = vmul.f32 %v848_v0, %v261_v60  ;;  %v374_v63 = vsel %vm305_vm0, %v953_v34, 0.0  ;;  %v264_v9 = vld [vmem:[%s846_s23 + $0xd8] sm:$0xff]  ;;  %v266_v18 = vld [vmem:[%s846_s23 + $0xe8] sm:$0xff]  ;;  %v265_v20 = vld [vmem:[%s846_s23 + $0xe0] sm:$0xff] }
  0x19   : > { %313 = vst.msk [vmem:[%s854_s26 + $0x38] sm:$0xff] %vm305_vm0, %v923_v25  ;;  %v380_v1 = vsel %vm305_vm0, %v960_v36, 0.0  ;;  %v377_v2 = vsel %vm305_vm0, %v967_v38, 0.0  ;;  %v1064_v8 = vmul.f32 %v848_v0, %v263_v3  ;;  %v1068_v10 = vmul.f32 %v848_v0, %v262_v7  ;;  %v268_v33 = vld [vmem:[%s846_s23 + $0xf8] sm:$0xff] }
  0x1a   : > { %342 = vadd.xlane.f32.xlu0 %v341_v23  ;;  %315 = vst.msk [vmem:[%s854_s26 + $0x48] sm:$0xff] %vm305_vm0, %v932_v28  ;;  %348 = vadd.xlane.f32.xlu1 %v347_v27  ;;  %v1074_v11 = vmul.f32 %v848_v0, %v264_v9  ;;  %v383_v12 = vsel %vm305_vm0, %v974_v40, 0.0  ;;  %v389_v14 = vsel %vm305_vm0, %v985_v44, 0.0  ;;  %v386_v16 = vsel %vm305_vm0, %v993_v46, 0.0  ;;  %v267_v23 = vld [vmem:[%s846_s23 + $0xf0] sm:$0xff] }
  0x1b   : > { %354 = vadd.xlane.f32.xlu2 %v353_v24  ;;  %317 = vst.msk [vmem:[%s854_s26 + $0x58] sm:$0xff] %vm305_vm0, %v939_v30  ;;  %v1091_v22 = vmul.f32 %v848_v0, %v266_v18  ;;  %v1095_v24 = vmul.f32 %v848_v0, %v265_v20  ;;  %v1101_v26 = vmul.f32 %v848_v0, %v267_v23  ;;  %v392_v27 = vsel %vm305_vm0, %v999_v47, 0.0 }
  0x1c   : > { %316 = vst.msk [vmem:[%s854_s26 + $0x50] sm:$0xff] %vm305_vm0, %v946_v32  ;;  %v398_v29 = vsel %vm305_vm0, %v1010_v50, 0.0  ;;  %v395_v31 = vsel %vm305_vm0, %v1014_v52, 0.0  ;;  %v1117_v35 = vmul.f32 %v848_v0, %v268_v33  ;;  %v401_v37 = vsel %vm305_vm0, %v1020_v53, 0.0 }
  0x1d   : > { %318 = vst.msk [vmem:[%s854_s26 + $0x60] sm:$0xff] %vm305_vm0, %v953_v34  ;;  %v407_v39 = vsel %vm305_vm0, %v1037_v59, 0.0  ;;  %v404_v41 = vsel %vm305_vm0, %v1041_v61, 0.0  ;;  %v416_v0 = vsel %vm305_vm0, %v1064_v8, 0.0  ;;  %v425_v48 = vsel %vm305_vm0, %v1091_v22, 0.0 }
  0x1e   : > { %320 = vst.msk [vmem:[%s854_s26 + $0x70] sm:$0xff] %vm305_vm0, %v960_v36  ;;  %v422_v49 = vsel %vm305_vm0, %v1095_v24, 0.0  ;;  %v428_v51 = vsel %vm305_vm0, %v1101_v26, 0.0  ;;  %v515_v57 = vsel %vm305_vm0, %v898_v17, -inf  ;;  %v512_v58 = vsel %vm305_vm0, %v866_v6, -inf }
  0x1f   : > { %319 = vst.msk [vmem:[%s854_s26 + $0x68] sm:$0xff] %vm305_vm0, %v967_v38  ;;  %v803_v60 = vmov 4.0   ;;  %v527_v6 = vsel %vm305_vm0, %v923_v25, -inf  ;;  %v542_v9 = vsel %vm305_vm0, %v953_v34, -inf  ;;  %v539_v25 = vsel %vm305_vm0, %v939_v30, -inf }
  0x20   : > { %321 = vst.msk [vmem:[%s854_s26 + $0x78] sm:$0xff] %vm305_vm0, %v974_v40  ;;  %793 = vrcp.f32 %v803_v60  ;;  %v551_v18 = vsel %vm305_vm0, %v974_v40, -inf  ;;  %v548_v20 = vsel %vm305_vm0, %v960_v36, -inf  ;;  %v560_v33 = vsel %vm305_vm0, %v999_v47, -inf }
  0x21   : > { %323 = vst.msk [vmem:[%s854_s26 + $0x88] sm:$0xff] %vm305_vm0, %v985_v44 }
  0x22   : > { %357 = vadd.xlane.f32.xlu0 %v356_v42  ;;  %322 = vst.msk [vmem:[%s854_s26 + $0x80] sm:$0xff] %vm305_vm0, %v993_v46  ;;  %360 = vadd.xlane.f32.xlu1 %v359_v45  ;;  %v410_v42 = vsel %vm305_vm0, %v1047_v62, 0.0  ;;  %v419_v45 = vsel %vm305_vm0, %v1074_v11, 0.0 }
  0x23   : > { %363 = vadd.xlane.f32.xlu2 %v362_v43  ;;  %324 = vst.msk [vmem:[%s854_s26 + $0x90] sm:$0xff] %vm305_vm0, %v999_v47  ;;  %v413_v43 = vsel %vm305_vm0, %v1068_v10, 0.0 }
  0x24   : > { %326 = vst.msk [vmem:[%s854_s26 + $0xa0] sm:$0xff] %vm305_vm0, %v1010_v50 }
  0x25   : > { %325 = vst.msk [vmem:[%s854_s26 + $0x98] sm:$0xff] %vm305_vm0, %v1014_v52 }
  0x26   : > { %327 = vst.msk [vmem:[%s854_s26 + $0xa8] sm:$0xff] %vm305_vm0, %v1020_v53 }
  0x27   : > { %329 = vst.msk [vmem:[%s854_s26 + $0xb8] sm:$0xff] %vm305_vm0, %v1037_v59 }
  0x28   : > { %328 = vst.msk [vmem:[%s854_s26 + $0xb0] sm:$0xff] %vm305_vm0, %v1041_v61 }
  0x29   : > { %330 = vst.msk [vmem:[%s854_s26 + $0xc0] sm:$0xff] %vm305_vm0, %v1047_v62 }
  0x2a   : > { %366 = vadd.xlane.f32.xlu0 %v365_v54  ;;  %369 = vadd.xlane.f32.xlu1 %v368_v56  ;;  %332 = vst.msk [vmem:[%s854_s26 + $0xd0] sm:$0xff] %vm305_vm0, %v1064_v8  ;;  %v506_v54 = vsel %vm305_vm0, %v860_v4, -inf  ;;  %v509_v56 = vsel %vm305_vm0, %v884_v13, -inf  ;;  %v518_v4 = vsel %vm305_vm0, %v863_v5, -inf  ;;  %v521_v13 = vsel %vm305_vm0, %v891_v15, -inf }
  0x2b   : > { %372 = vadd.xlane.f32.xlu2 %v371_v55  ;;  %331 = vst.msk [vmem:[%s854_s26 + $0xc8] sm:$0xff] %vm305_vm0, %v1068_v10  ;;  %v431_v55 = vsel %vm305_vm0, %v1117_v35, 0.0  ;;  %v530_v5 = vsel %vm305_vm0, %v912_v21, -inf  ;;  %v536_v15 = vsel %vm305_vm0, %v946_v32, -inf }
  0x2c   : > { %333 = vst.msk [vmem:[%s854_s26 + $0xd8] sm:$0xff] %vm305_vm0, %v1074_v11 }
  0x2d   : > { %335 = vst.msk [vmem:[%s854_s26 + $0xe8] sm:$0xff] %vm305_vm0, %v1091_v22 }
  0x2e   : > { %334 = vst.msk [vmem:[%s854_s26 + $0xe0] sm:$0xff] %vm305_vm0, %v1095_v24 }
  0x2f   : > { %336 = vst.msk [vmem:[%s854_s26 + $0xf0] sm:$0xff] %vm305_vm0, %v1101_v26 }
  0x30   : > { %337 = vst.msk [vmem:[%s854_s26 + $0xf8] sm:$0xff] %vm305_vm0, %v1117_v35 }
  0x32   : > { %375 = vadd.xlane.f32.xlu0 %v374_v63  ;;  %378 = vadd.xlane.f32.xlu1 %v377_v2  ;;  %v524_v63 = vsel %vm305_vm0, %v905_v19, -inf  ;;  %v533_v2 = vsel %vm305_vm0, %v932_v28, -inf }
  0x33   : > { %381 = vadd.xlane.f32.xlu2 %v380_v1  ;;  %v794_v1 = vpop.eup %793 }
  0x34   : > { %v435_v17 = vmul.f32 4.0, %v794_v1  ;;  %vm439_vm1 = vweird.f32 %v794_v1 }
  0x36   : > { %v436_v3 = vsub.f32 1.0, %v435_v17 }
  0x38   : > { %v437_v19 = vmul.f32 %v794_v1, %v436_v3  ;;  %v596_v3 = vsel %vm305_vm0, %v1101_v26, -inf }
  0x3a   : > { %384 = vadd.xlane.f32.xlu0 %v383_v12  ;;  %387 = vadd.xlane.f32.xlu1 %v386_v16  ;;  %v438_v7 = vadd.f32 %v794_v1, %v437_v19 }
  0x3b   : > { %390 = vadd.xlane.f32.xlu2 %v389_v14  ;;  %v545_v14 = vsel %vm305_vm0, %v967_v38, -inf }
  0x3c   : > { %v1170_v28 = vsel %vm439_vm1, %v794_v1, %v438_v7  ;;  %v584_v1 = vsel %vm305_vm0, %v1064_v8, -inf }
  0x42   : > { %393 = vadd.xlane.f32.xlu0 %v392_v27  ;;  %396 = vadd.xlane.f32.xlu1 %v395_v31  ;;  %v554_v31 = vsel %vm305_vm0, %v993_v46, -inf }
  0x43   : > { %399 = vadd.xlane.f32.xlu2 %v398_v29 }
  0x4a   : > { %402 = vadd.xlane.f32.xlu0 %v401_v37  ;;  %405 = vadd.xlane.f32.xlu1 %v404_v41  ;;  %v557_v37 = vsel %vm305_vm0, %v985_v44, -inf }
  0x4b   : > { %408 = vadd.xlane.f32.xlu2 %v407_v39 }
  0x52   : > { %411 = vadd.xlane.f32.xlu0 %v410_v42  ;;  %414 = vadd.xlane.f32.xlu1 %v413_v43  ;;  %v569_v43 = vsel %vm305_vm0, %v1020_v53, -inf }
  0x53   : > { %417 = vadd.xlane.f32.xlu2 %v416_v0  ;;  %v563_v0 = vsel %vm305_vm0, %v1014_v52, -inf }
  0x5a   : > { %420 = vadd.xlane.f32.xlu0 %v419_v45  ;;  %423 = vadd.xlane.f32.xlu1 %v422_v49  ;;  %v566_v45 = vsel %vm305_vm0, %v1010_v50, -inf }
  0x5b   : > { %426 = vadd.xlane.f32.xlu2 %v425_v48 }
  0x62   : > { %429 = vadd.xlane.f32.xlu0 %v428_v51  ;;  %432 = vadd.xlane.f32.xlu1 %v431_v55  ;;  %v578_v55 = vsel %vm305_vm0, %v1047_v62, -inf }
  0x63   : > { %507 = vmax.xlane.f32.xlu2 %v506_v54  ;;  %v572_v54 = vsel %vm305_vm0, %v1041_v61, -inf }
  0x6a   : > { %510 = vmax.xlane.f32.xlu0 %v509_v56  ;;  %513 = vmax.xlane.f32.xlu1 %v512_v58  ;;  %v575_v56 = vsel %vm305_vm0, %v1037_v59, -inf }
  0x6b   : > { %516 = vmax.xlane.f32.xlu2 %v515_v57 }
  0x72   : > { %519 = vmax.xlane.f32.xlu0 %v518_v4  ;;  %522 = vmax.xlane.f32.xlu1 %v521_v13  ;;  %v581_v4 = vsel %vm305_vm0, %v1068_v10, -inf }
  0x73   : > { %525 = vmax.xlane.f32.xlu2 %v524_v63  ;;  %v587_v63 = vsel %vm305_vm0, %v1074_v11, -inf }
  0x7a   : > { %528 = vmax.xlane.f32.xlu0 %v527_v6  ;;  %531 = vmax.xlane.f32.xlu1 %v530_v5  ;;  %v593_v5 = vsel %vm305_vm0, %v1091_v22, -inf  ;;  %v599_v22 = vsel %vm305_vm0, %v1117_v35, -inf }
  0x7b   : > { %534 = vmax.xlane.f32.xlu2 %v533_v2  ;;  %v590_v2 = vsel %vm305_vm0, %v1095_v24, -inf }
  0x82   : > { %537 = vmax.xlane.f32.xlu0 %v536_v15  ;;  %540 = vmax.xlane.f32.xlu1 %v539_v25 }
  0x83   : > { %543 = vmax.xlane.f32.xlu2 %v542_v9 }
  0x85   : > { %v340_v21 = vpop.xlane.xlu0 %339  ;;  %v346_v12 = vpop.xlane.xlu1 %345 }
  0x86   : > { %v352_v32 = vpop.xlane.xlu2 %351  ;;  %v441_v34 = vmul.f32 %v1170_v28, %v340_v21  ;;  %v443_v16 = vmul.f32 %v1170_v28, %v346_v12 }
  0x87   : > { %v445_v30 = vmul.f32 %v1170_v28, %v352_v32 }
  0x88   : > { %474 = vst.msk [vmem:[%s1176_s29] sm:$0xff] %vm473_vm2, %v441_v34 }
  0x89   : > { %478 = vst.msk [vmem:[%s1176_s29 + $0x20] sm:$0xff] %vm473_vm2, %v445_v30 }
  0x8a   : > { %546 = vmax.xlane.f32.xlu0 %v545_v14  ;;  %476 = vst.msk [vmem:[%s1176_s29 + $0x10] sm:$0xff] %vm473_vm2, %v443_v16  ;;  %549 = vmax.xlane.f32.xlu1 %v548_v20 }
  0x8b   : > { %552 = vmax.xlane.f32.xlu2 %v551_v18 }
  0x8d   : > { %v343_v38 = vpop.xlane.xlu0 %342  ;;  %v349_v29 = vpop.xlane.xlu1 %348 }
  0x8e   : > { %v355_v23 = vpop.xlane.xlu2 %354  ;;  %v442_v27 = vmul.f32 %v1170_v28, %v343_v38  ;;  %v444_v36 = vmul.f32 %v1170_v28, %v349_v29 }
  0x8f   : > { %v446_v40 = vmul.f32 %v1170_v28, %v355_v23 }
  0x90   : > { %475 = vst.msk [vmem:[%s1176_s29 + $0x8] sm:$0xff] %vm473_vm2, %v442_v27 }
  0x91   : > { %479 = vst.msk [vmem:[%s1176_s29 + $0x28] sm:$0xff] %vm473_vm2, %v446_v40 }
  0x92   : > { %555 = vmax.xlane.f32.xlu0 %v554_v31  ;;  %477 = vst.msk [vmem:[%s1176_s29 + $0x18] sm:$0xff] %vm473_vm2, %v444_v36  ;;  %558 = vmax.xlane.f32.xlu1 %v557_v37 }
  0x93   : > { %561 = vmax.xlane.f32.xlu2 %v560_v33 }
  0x95   : > { %v358_v46 = vpop.xlane.xlu0 %357  ;;  %v361_v42 = vpop.xlane.xlu1 %360 }
  0x96   : > { %v364_v39 = vpop.xlane.xlu2 %363  ;;  %v447_v41 = vmul.f32 %v1170_v28, %v358_v46  ;;  %v448_v44 = vmul.f32 %v1170_v28, %v361_v42 }
  0x97   : > { %v449_v47 = vmul.f32 %v1170_v28, %v364_v39 }
  0x98   : > { %480 = vst.msk [vmem:[%s1176_s29 + $0x30] sm:$0xff] %vm473_vm2, %v447_v41 }
  0x99   : > { %482 = vst.msk [vmem:[%s1176_s29 + $0x40] sm:$0xff] %vm473_vm2, %v449_v47 }
  0x9a   : > { %564 = vmax.xlane.f32.xlu0 %v563_v0  ;;  %481 = vst.msk [vmem:[%s1176_s29 + $0x38] sm:$0xff] %vm473_vm2, %v448_v44  ;;  %567 = vmax.xlane.f32.xlu1 %v566_v45 }
  0x9b   : > { %570 = vmax.xlane.f32.xlu2 %v569_v43 }
  0x9d   : > { %v367_v52 = vpop.xlane.xlu0 %366  ;;  %v370_v51 = vpop.xlane.xlu1 %369 }
  0x9e   : > { %v373_v48 = vpop.xlane.xlu2 %372  ;;  %v450_v49 = vmul.f32 %v1170_v28, %v367_v52  ;;  %v451_v50 = vmul.f32 %v1170_v28, %v370_v51 }
  0x9f   : > { %v452_v53 = vmul.f32 %v1170_v28, %v373_v48 }
  0xa0   : > { %483 = vst.msk [vmem:[%s1176_s29 + $0x48] sm:$0xff] %vm473_vm2, %v450_v49 }
  0xa1   : > { %485 = vst.msk [vmem:[%s1176_s29 + $0x58] sm:$0xff] %vm473_vm2, %v452_v53 }
  0xa2   : > { %573 = vmax.xlane.f32.xlu0 %v572_v54  ;;  %484 = vst.msk [vmem:[%s1176_s29 + $0x50] sm:$0xff] %vm473_vm2, %v451_v50  ;;  %576 = vmax.xlane.f32.xlu1 %v575_v56 }
  0xa3   : > { %579 = vmax.xlane.f32.xlu2 %v578_v55 }
  0xa5   : > { %v376_v61 = vpop.xlane.xlu0 %375  ;;  %v379_v60 = vpop.xlane.xlu1 %378 }
  0xa6   : > { %v382_v57 = vpop.xlane.xlu2 %381  ;;  %v453_v58 = vmul.f32 %v1170_v28, %v376_v61  ;;  %v454_v59 = vmul.f32 %v1170_v28, %v379_v60 }
  0xa7   : > { %v455_v62 = vmul.f32 %v1170_v28, %v382_v57 }
  0xa8   : > { %486 = vst.msk [vmem:[%s1176_s29 + $0x60] sm:$0xff] %vm473_vm2, %v453_v58 }
  0xa9   : > { %488 = vst.msk [vmem:[%s1176_s29 + $0x70] sm:$0xff] %vm473_vm2, %v455_v62 }
  0xaa   : > { %582 = vmax.xlane.f32.xlu0 %v581_v4  ;;  %487 = vst.msk [vmem:[%s1176_s29 + $0x68] sm:$0xff] %vm473_vm2, %v454_v59  ;;  %585 = vmax.xlane.f32.xlu1 %v584_v1 }
  0xab   : > { %588 = vmax.xlane.f32.xlu2 %v587_v63 }
  0xad   : > { %v385_v10 = vpop.xlane.xlu0 %384  ;;  %v388_v6 = vpop.xlane.xlu1 %387 }
  0xae   : > { %v391_v13 = vpop.xlane.xlu2 %390  ;;  %v456_v17 = vmul.f32 %v1170_v28, %v385_v10  ;;  %v457_v8 = vmul.f32 %v1170_v28, %v388_v6 }
  0xaf   : > { %v458_v11 = vmul.f32 %v1170_v28, %v391_v13 }
  0xb0   : > { %489 = vst.msk [vmem:[%s1176_s29 + $0x78] sm:$0xff] %vm473_vm2, %v456_v17 }
  0xb1   : > { %491 = vst.msk [vmem:[%s1176_s29 + $0x88] sm:$0xff] %vm473_vm2, %v458_v11 }
  0xb2   : > { %591 = vmax.xlane.f32.xlu0 %v590_v2  ;;  %490 = vst.msk [vmem:[%s1176_s29 + $0x80] sm:$0xff] %vm473_vm2, %v457_v8  ;;  %594 = vmax.xlane.f32.xlu1 %v593_v5 }
  0xb3   : > { %597 = vmax.xlane.f32.xlu2 %v596_v3 }
  0xb5   : > { %v394_v24 = vpop.xlane.xlu0 %393  ;;  %v397_v7 = vpop.xlane.xlu1 %396 }
  0xb6   : > { %v400_v19 = vpop.xlane.xlu2 %399  ;;  %v459_v15 = vmul.f32 %v1170_v28, %v394_v24  ;;  %v460_v9 = vmul.f32 %v1170_v28, %v397_v7 }
  0xb7   : > { %v461_v26 = vmul.f32 %v1170_v28, %v400_v19 }
  0xb8   : > { %492 = vst.msk [vmem:[%s1176_s29 + $0x90] sm:$0xff] %vm473_vm2, %v459_v15 }
  0xb9   : > { %494 = vst.msk [vmem:[%s1176_s29 + $0xa0] sm:$0xff] %vm473_vm2, %v461_v26 }
  0xba   : > { %600 = vmax.xlane.f32.xlu0 %v599_v22  ;;  %493 = vst.msk [vmem:[%s1176_s29 + $0x98] sm:$0xff] %vm473_vm2, %v460_v9 }
  0xbd   : > { %v403_v25 = vpop.xlane.xlu0 %402  ;;  %v406_v30 = vpop.xlane.xlu1 %405 }
  0xbe   : > { %v409_v21 = vpop.xlane.xlu2 %408  ;;  %v462_v32 = vmul.f32 %v1170_v28, %v403_v25  ;;  %v463_v35 = vmul.f32 %v1170_v28, %v406_v30 }
  0xbf   : > { %v464_v34 = vmul.f32 %v1170_v28, %v409_v21 }
  0xc0   : > { %495 = vst.msk [vmem:[%s1176_s29 + $0xa8] sm:$0xff] %vm473_vm2, %v462_v32 }
  0xc1   : > { %497 = vst.msk [vmem:[%s1176_s29 + $0xb8] sm:$0xff] %vm473_vm2, %v464_v34 }
  0xc2   : > { %496 = vst.msk [vmem:[%s1176_s29 + $0xb0] sm:$0xff] %vm473_vm2, %v463_v35 }
  0xc5   : > { %v412_v12 = vpop.xlane.xlu0 %411  ;;  %v415_v20 = vpop.xlane.xlu1 %414 }
  0xc6   : > { %v418_v14 = vpop.xlane.xlu2 %417  ;;  %v465_v16 = vmul.f32 %v1170_v28, %v412_v12  ;;  %v466_v38 = vmul.f32 %v1170_v28, %v415_v20 }
  0xc7   : > { %v467_v18 = vmul.f32 %v1170_v28, %v418_v14 }
  0xc8   : > { %498 = vst.msk [vmem:[%s1176_s29 + $0xc0] sm:$0xff] %vm473_vm2, %v465_v16 }
  0xc9   : > { %500 = vst.msk [vmem:[%s1176_s29 + $0xd0] sm:$0xff] %vm473_vm2, %v467_v18 }
  0xca   : > { %499 = vst.msk [vmem:[%s1176_s29 + $0xc8] sm:$0xff] %vm473_vm2, %v466_v38 }
  0xcd   : > { %v421_v23 = vpop.xlane.xlu0 %420  ;;  %v424_v31 = vpop.xlane.xlu1 %423 }
  0xce   : > { %v427_v27 = vpop.xlane.xlu2 %426  ;;  %v468_v40 = vmul.f32 %v1170_v28, %v421_v23  ;;  %v469_v36 = vmul.f32 %v1170_v28, %v424_v31 }
  0xcf   : > { %v470_v29 = vmul.f32 %v1170_v28, %v427_v27 }
  0xd0   : > { %501 = vst.msk [vmem:[%s1176_s29 + $0xd8] sm:$0xff] %vm473_vm2, %v468_v40 }
  0xd1   : > { %503 = vst.msk [vmem:[%s1176_s29 + $0xe8] sm:$0xff] %vm473_vm2, %v470_v29 }
  0xd2   : > { %502 = vst.msk [vmem:[%s1176_s29 + $0xe0] sm:$0xff] %vm473_vm2, %v469_v36 }
  0xd5   : > { %v430_v33 = vpop.xlane.xlu0 %429  ;;  %v433_v39 = vpop.xlane.xlu1 %432 }
  0xd6   : > { %v508_v37 = vpop.xlane.xlu2 %507  ;;  %v471_v46 = vmul.f32 %v1170_v28, %v430_v33  ;;  %v472_v41 = vmul.f32 %v1170_v28, %v433_v39 }
  0xd7   : > { %602 = vst.msk [vmem:[%s1310_s6] sm:$0xff] %vm473_vm2, %v508_v37 }
  0xd8   : > { %504 = vst.msk [vmem:[%s1176_s29 + $0xf0] sm:$0xff] %vm473_vm2, %v471_v46 }
  0xd9   : > { %505 = vst.msk [vmem:[%s1176_s29 + $0xf8] sm:$0xff] %vm473_vm2, %v472_v41 }
  0xdd   : > { %v511_v47 = vpop.xlane.xlu0 %510  ;;  %v514_v0 = vpop.xlane.xlu1 %513 }
  0xde   : > { %v517_v42 = vpop.xlane.xlu2 %516  ;;  %603 = vst.msk [vmem:[%s1310_s6 + $0x8] sm:$0xff] %vm473_vm2, %v511_v47 }
  0xdf   : > { %604 = vst.msk [vmem:[%s1310_s6 + $0x10] sm:$0xff] %vm473_vm2, %v514_v0 }
  0xe0   : > { %605 = vst.msk [vmem:[%s1310_s6 + $0x18] sm:$0xff] %vm473_vm2, %v517_v42 }
  0xe5   : > { %v520_v44 = vpop.xlane.xlu0 %519  ;;  %v523_v43 = vpop.xlane.xlu1 %522 }
  0xe6   : > { %v526_v28 = vpop.xlane.xlu2 %525  ;;  %606 = vst.msk [vmem:[%s1310_s6 + $0x20] sm:$0xff] %vm473_vm2, %v520_v44 }
  0xe7   : > { %607 = vst.msk [vmem:[%s1310_s6 + $0x28] sm:$0xff] %vm473_vm2, %v523_v43 }
  0xe8   : > { %608 = vst.msk [vmem:[%s1310_s6 + $0x30] sm:$0xff] %vm473_vm2, %v526_v28 }
  0xed   : > { %v529_v45 = vpop.xlane.xlu0 %528  ;;  %v532_v48 = vpop.xlane.xlu1 %531 }
  0xee   : > { %v535_v52 = vpop.xlane.xlu2 %534  ;;  %609 = vst.msk [vmem:[%s1310_s6 + $0x38] sm:$0xff] %vm473_vm2, %v529_v45 }
  0xef   : > { %610 = vst.msk [vmem:[%s1310_s6 + $0x40] sm:$0xff] %vm473_vm2, %v532_v48 }
  0xf0   : > { %611 = vst.msk [vmem:[%s1310_s6 + $0x48] sm:$0xff] %vm473_vm2, %v535_v52 }
  0xf5   : > { %v538_v49 = vpop.xlane.xlu0 %537  ;;  %v541_v51 = vpop.xlane.xlu1 %540 }
  0xf6   : > { %v544_v53 = vpop.xlane.xlu2 %543  ;;  %612 = vst.msk [vmem:[%s1310_s6 + $0x50] sm:$0xff] %vm473_vm2, %v538_v49 }
  0xf7   : > { %613 = vst.msk [vmem:[%s1310_s6 + $0x58] sm:$0xff] %vm473_vm2, %v541_v51 }
  0xf8   : > { %614 = vst.msk [vmem:[%s1310_s6 + $0x60] sm:$0xff] %vm473_vm2, %v544_v53 }
  0xfd   : > { %v547_v54 = vpop.xlane.xlu0 %546  ;;  %v550_v55 = vpop.xlane.xlu1 %549 }
  0xfe   : > { %v553_v50 = vpop.xlane.xlu2 %552  ;;  %615 = vst.msk [vmem:[%s1310_s6 + $0x68] sm:$0xff] %vm473_vm2, %v547_v54 }
  0xff   : > { %616 = vst.msk [vmem:[%s1310_s6 + $0x70] sm:$0xff] %vm473_vm2, %v550_v55 }
 0x100   : > { %617 = vst.msk [vmem:[%s1310_s6 + $0x78] sm:$0xff] %vm473_vm2, %v553_v50 }
 0x105   : > { %v556_v56 = vpop.xlane.xlu0 %555  ;;  %v559_v57 = vpop.xlane.xlu1 %558 }
 0x106   : > { %v562_v61 = vpop.xlane.xlu2 %561  ;;  %618 = vst.msk [vmem:[%s1310_s6 + $0x80] sm:$0xff] %vm473_vm2, %v556_v56 }
 0x107   : > { %619 = vst.msk [vmem:[%s1310_s6 + $0x88] sm:$0xff] %vm473_vm2, %v559_v57 }
 0x108   : > { %620 = vst.msk [vmem:[%s1310_s6 + $0x90] sm:$0xff] %vm473_vm2, %v562_v61 }
 0x10d   : > { %v565_v58 = vpop.xlane.xlu0 %564  ;;  %v568_v60 = vpop.xlane.xlu1 %567 }
 0x10e   : > { %v571_v62 = vpop.xlane.xlu2 %570  ;;  %621 = vst.msk [vmem:[%s1310_s6 + $0x98] sm:$0xff] %vm473_vm2, %v565_v58 }
 0x10f   : > { %622 = vst.msk [vmem:[%s1310_s6 + $0xa0] sm:$0xff] %vm473_vm2, %v568_v60 }
 0x110   : > { %623 = vst.msk [vmem:[%s1310_s6 + $0xa8] sm:$0xff] %vm473_vm2, %v571_v62 }
 0x115   : > { %v574_v4 = vpop.xlane.xlu0 %573  ;;  %v577_v63 = vpop.xlane.xlu1 %576 }
 0x116   : > { %v580_v59 = vpop.xlane.xlu2 %579  ;;  %624 = vst.msk [vmem:[%s1310_s6 + $0xb0] sm:$0xff] %vm473_vm2, %v574_v4 }
 0x117   : > { %625 = vst.msk [vmem:[%s1310_s6 + $0xb8] sm:$0xff] %vm473_vm2, %v577_v63 }
 0x118   : > { %626 = vst.msk [vmem:[%s1310_s6 + $0xc0] sm:$0xff] %vm473_vm2, %v580_v59 }
 0x11d   : > { %v583_v1 = vpop.xlane.xlu0 %582  ;;  %v586_v13 = vpop.xlane.xlu1 %585 }
 0x11e   : > { %v589_v10 = vpop.xlane.xlu2 %588  ;;  %627 = vst.msk [vmem:[%s1310_s6 + $0xc8] sm:$0xff] %vm473_vm2, %v583_v1 }
 0x11f   : > { %628 = vst.msk [vmem:[%s1310_s6 + $0xd0] sm:$0xff] %vm473_vm2, %v586_v13 }
 0x120   : > { %629 = vst.msk [vmem:[%s1310_s6 + $0xd8] sm:$0xff] %vm473_vm2, %v589_v10 }
 0x125   : > { %v592_v17 = vpop.xlane.xlu0 %591  ;;  %v595_v6 = vpop.xlane.xlu1 %594 }
 0x126   : > { %v598_v11 = vpop.xlane.xlu2 %597  ;;  %630 = vst.msk [vmem:[%s1310_s6 + $0xe0] sm:$0xff] %vm473_vm2, %v592_v17 }
 0x127   : > { %631 = vst.msk [vmem:[%s1310_s6 + $0xe8] sm:$0xff] %vm473_vm2, %v595_v6 }
 0x128   : > { %632 = vst.msk [vmem:[%s1310_s6 + $0xf0] sm:$0xff] %vm473_vm2, %v598_v11 }
 0x12d   : > { %v601_v2 = vpop.xlane.xlu0 %600 }
 0x12e   : > { %633 = vst.msk [vmem:[%s1310_s6 + $0xf8] sm:$0xff] %vm473_vm2, %v601_v2 }
 0x12f PF: > { %s15_s15 = sadd.s32 1, %s801_s15  }
 0x130   : > { %p12_p4 = scmp.ge.s32.totalorder %s15_s15, 4  }
 0x132   :  { %14 = sbr.rel (!%p12_p4) target bundleno = 1 (0x1), region = 85 }

// kernel: resblock_cbam_forward.6
= control target key start
LH: loop header
LB: loop body
LE: loop exit
PB: predicated region body
PF: predicated region fallthrough
CT: control target
= control target key end

     0   :  { %s1229_s21 = smov 0   ;;  %s1677_s0 = inlined_call_operand.vmem [shape: f32[2,256,36], index: 0, kind: input, shape index: {}]   ;;  %s1678_s1 = inlined_call_operand.vmem [shape: f32[36,4], index: 1, kind: input, shape index: {}]   ;;  %s1679_s2 = inlined_call_operand.vmem [shape: f32[2,4], index: 2, kind: input, shape index: {}]   ;;  %s1680_s3 = inlined_call_operand.vmem [shape: f32[4,4], index: 3, kind: input, shape index: {}]   ;;  %s1681_s4 = inlined_call_operand.vmem [shape: f32[2,4], index: 4, kind: input, shape index: {}]   ;;  %s1682_s5 = inlined_call_operand.vmem [shape: f32[2,256,4], index: 5, kind: output, shape index: {0}]   ;;  %s1683_s6 = inlined_call_operand.vmem [shape: f32[2,1,4], index: 6, kind: output, shape index: {1}]  }
   0x1 LB: > { %s1085_s22 = sadd.s32 4294967295, %s1191_s21   ;;  %p1089_p0 = scmp.ge.s32.totalorder %s1191_s21, 1  ;;  %s1191_s21 = sphi %s1229_s21, %s17_s21  }
   0x2   : > { %p215_p1 = scmp.lt.s32.totalorder %s1191_s21, 3 }
   0x4   : > { %p216_p2 = pnand %p1089_p0, %p215_p1 }
   0x5   : > { %p248_p3 = scmp.lt.s32.totalorder (!%p216_p2), %s1085_s22, 1 }
   0x6   : > { %219 = sbr.rel (%p216_p2) target bundleno = 459 (0x1cb), region = 40 }
   0xb   : > { %v297_v0 = vld [vmem:[%s1678_s1 + $0x20] sm:$0xf]  ;;  %vm395_vm0 = vcmask 1043456   ;;  %v296_v1 = vld [vmem:[%s1678_s1 + $0x18] sm:$0xff]  ;;  %v295_v2 = vld [vmem:[%s1678_s1 + $0x10] sm:$0xff]  ;;  %s1685_s22 = smov (!%p248_p3, %s1085_s22), 1 }
   0xc   : > { %1094 = vmatpush.msk.msra.mxu0 %vm395_vm0, %v297_v0  ;;  %1164 = vmatpush.msk.msra.mxu2 %vm395_vm0, %v297_v0  ;;  %v294_v3 = vld [vmem:[%s1678_s1 + $0x8] sm:$0xff]  ;;  %s1162_s7 = sshll.u32 %s1685_s22, 8  ;;  %v293_v4 = vld [vmem:[%s1678_s1] sm:$0xff]  ;;  %vm298_vm1 = vcmask 293888   ;;  %vm613_vm2 = vcmask 31744   ;;  %s260_s30 = scalar_lea.vmem %s1683_s6, %s1685_s22  ;;  %vm1003_vm4 = vcmask 24576  }
   0xd   : > { %s1259_s10 = scalar_lea.vmem %s1677_s0, %s1162_s7  ;;  %v612_v31 = vld [vmem:[%s1680_s3] sm:$0xf]  ;;  %s1457_s27 = scalar_lea.vmem %s1682_s5, %s1162_s7 }
   0xe   : > { %411 = vmatpush.msra.mxu0 %v296_v1  ;;  %1165 = vmatpush.msra.mxu2 %v296_v1  ;;  %v261_v5 = vld [vmem:[%s1259_s10] sm:$0xff]  ;;  %v262_v7 = vld [vmem:[%s1259_s10 + $0x8] sm:$0xff]  ;;  %v263_v9 = vld [vmem:[%s1259_s10 + $0x10] sm:$0xff] }
   0xf   : > { %v277_v6 = vld [vmem:[%s1259_s10 + $0x80] sm:$0xff]  ;;  %v278_v8 = vld [vmem:[%s1259_s10 + $0x88] sm:$0xff]  ;;  %v279_v10 = vld [vmem:[%s1259_s10 + $0x90] sm:$0xff]  ;;  %1127 = vmatpush.msk.msra.mxu1 %vm395_vm0, %v612_v31  ;;  %1169 = vmatpush.msk.msra.mxu3 %vm395_vm0, %v612_v31 }
  0x10   : > { %412 = vmatpush.msra.mxu0 %v295_v2  ;;  %1166 = vmatpush.msra.mxu2 %v295_v2  ;;  %v264_v11 = vld [vmem:[%s1259_s10 + $0x18] sm:$0xff]  ;;  %v265_v13 = vld [vmem:[%s1259_s10 + $0x20] sm:$0xff]  ;;  %v266_v15 = vld [vmem:[%s1259_s10 + $0x28] sm:$0xff] }
  0x11   : > { %v280_v12 = vld [vmem:[%s1259_s10 + $0x98] sm:$0xff]  ;;  %v281_v14 = vld [vmem:[%s1259_s10 + $0xa0] sm:$0xff]  ;;  %v282_v16 = vld [vmem:[%s1259_s10 + $0xa8] sm:$0xff] }
  0x12   : > { %413 = vmatpush.msra.mxu0 %v294_v3  ;;  %1167 = vmatpush.msra.mxu2 %v294_v3  ;;  %v267_v17 = vld [vmem:[%s1259_s10 + $0x30] sm:$0xff]  ;;  %v268_v19 = vld [vmem:[%s1259_s10 + $0x38] sm:$0xff]  ;;  %v269_v21 = vld [vmem:[%s1259_s10 + $0x40] sm:$0xff] }
  0x13   : > { %v283_v18 = vld [vmem:[%s1259_s10 + $0xb0] sm:$0xff]  ;;  %v284_v20 = vld [vmem:[%s1259_s10 + $0xb8] sm:$0xff]  ;;  %v285_v22 = vld [vmem:[%s1259_s10 + $0xc0] sm:$0xff] }
  0x14   : > { %414 = vmatpush.msra.mxu0 %v293_v4  ;;  %1168 = vmatpush.msra.mxu2 %v293_v4  ;;  %v270_v23 = vld [vmem:[%s1259_s10 + $0x48] sm:$0xff]  ;;  %v271_v25 = vld [vmem:[%s1259_s10 + $0x50] sm:$0xff]  ;;  %v272_v27 = vld [vmem:[%s1259_s10 + $0x58] sm:$0xff] }
  0x15   : > { %1095 = vmatmul.msk.f32.vlgmr.msra.gmra.mxu0 %vm298_vm1, %v261_v5  ;;  %1111 = vmatmul.msk.f32.vlgmr.msra.gmra.mxu2 %vm298_vm1, %v277_v6  ;;  %v286_v24 = vld [vmem:[%s1259_s10 + $0xc8] sm:$0xff]  ;;  %v287_v26 = vld [vmem:[%s1259_s10 + $0xd0] sm:$0xff]  ;;  %v288_v28 = vld [vmem:[%s1259_s10 + $0xd8] sm:$0xff] }
  0x16   : > { %v273_v29 = vld [vmem:[%s1259_s10 + $0x60] sm:$0xff]  ;;  %v274_v32 = vld [vmem:[%s1259_s10 + $0x68] sm:$0xff]  ;;  %v275_v34 = vld [vmem:[%s1259_s10 + $0x70] sm:$0xff] }
  0x17   : > { %v289_v30 = vld [vmem:[%s1259_s10 + $0xe0] sm:$0xff]  ;;  %v290_v33 = vld [vmem:[%s1259_s10 + $0xe8] sm:$0xff]  ;;  %v291_v35 = vld [vmem:[%s1259_s10 + $0xf0] sm:$0xff] }
  0x18   : > { %v276_v36 = vld [vmem:[%s1259_s10 + $0x78] sm:$0xff]  ;;  %v1336_v38 = vld [vmem:[%s1679_s2] ss:$0 sm:$0xff]  ;;  %v1341_v39 = vld [vmem:[%s1679_s2 + $0x1] ss:$0 sm:$0xff] }
  0x19   : > { %v292_v37 = vld [vmem:[%s1259_s10 + $0xf8] sm:$0xff] }
  0x1d   : > { %1096 = vmatmul.msk.f32.gmra.mxu0 %vm298_vm1, %v262_v7  ;;  %1112 = vmatmul.msk.f32.gmra.mxu2 %vm298_vm1, %v278_v8 }
  0x25   : > { %1097 = vmatmul.msk.f32.gmra.mxu0 %vm298_vm1, %v263_v9  ;;  %1113 = vmatmul.msk.f32.gmra.mxu2 %vm298_vm1, %v279_v10 }
  0x2d   : > { %1098 = vmatmul.msk.f32.gmra.mxu0 %vm298_vm1, %v264_v11  ;;  %1114 = vmatmul.msk.f32.gmra.mxu2 %vm298_vm1, %v280_v12 }
  0x35   : > { %1099 = vmatmul.msk.f32.gmra.mxu0 %vm298_vm1, %v265_v13  ;;  %1115 = vmatmul.msk.f32.gmra.mxu2 %vm298_vm1, %v281_v14 }
  0x3d   : > { %1100 = vmatmul.msk.f32.gmra.mxu0 %vm298_vm1, %v266_v15  ;;  %1116 = vmatmul.msk.f32.gmra.mxu2 %vm298_vm1, %v282_v16 }
  0x45   : > { %1101 = vmatmul.msk.f32.gmra.mxu0 %vm298_vm1, %v267_v17  ;;  %1117 = vmatmul.msk.f32.gmra.mxu2 %vm298_vm1, %v283_v18 }
  0x4d   : > { %1102 = vmatmul.msk.f32.gmra.mxu0 %vm298_vm1, %v268_v19  ;;  %1118 = vmatmul.msk.f32.gmra.mxu2 %vm298_vm1, %v284_v20 }
  0x55   : > { %1103 = vmatmul.msk.f32.gmra.mxu0 %vm298_vm1, %v269_v21  ;;  %1119 = vmatmul.msk.f32.gmra.mxu2 %vm298_vm1, %v285_v22 }
  0x5d   : > { %1104 = vmatmul.msk.f32.gmra.mxu0 %vm298_vm1, %v270_v23  ;;  %1120 = vmatmul.msk.f32.gmra.mxu2 %vm298_vm1, %v286_v24 }
  0x65   : > { %1105 = vmatmul.msk.f32.gmra.mxu0 %vm298_vm1, %v271_v25  ;;  %1121 = vmatmul.msk.f32.gmra.mxu2 %vm298_vm1, %v287_v26 }
  0x6d   : > { %1106 = vmatmul.msk.f32.gmra.mxu0 %vm298_vm1, %v272_v27  ;;  %1122 = vmatmul.msk.f32.gmra.mxu2 %vm298_vm1, %v288_v28 }
  0x75   : > { %1107 = vmatmul.msk.f32.gmra.mxu0 %vm298_vm1, %v273_v29  ;;  %1123 = vmatmul.msk.f32.gmra.mxu2 %vm298_vm1, %v289_v30 }
  0x7d   : > { %1108 = vmatmul.msk.f32.gmra.mxu0 %vm298_vm1, %v274_v32  ;;  %1124 = vmatmul.msk.f32.gmra.mxu2 %vm298_vm1, %v290_v33 }
  0x85   : > { %1109 = vmatmul.msk.f32.gmra.mxu0 %vm298_vm1, %v275_v34  ;;  %1125 = vmatmul.msk.f32.gmra.mxu2 %vm298_vm1, %v291_v35 }
  0x8d   : > { %1110 = vmatmul.msk.f32.gmra.mxu0 %vm298_vm1, %v276_v36  ;;  %1126 = vmatmul.msk.f32.gmra.mxu2 %vm298_vm1, %v292_v37 }
  0x92   : > { %v416_v40 = vpop.f32.mrf.mxu0 }
  0x93   : > { %v514_v41 = vmul.f32 %v1336_v38, %v416_v40 }
  0x95   : > { %v548_v42 = vadd.f32 %v1341_v39, %v514_v41 }
  0x97   : > { %v580_v43 = vmax.f32 %v548_v42, 0.0 }
  0x98   : > { %v1345_v44 = vpop.f32.mrf.mxu2 }
  0x99   : > { %1128 = vmatmul.msk.f32.vlgmr.msra.gmra.mxu1 %vm613_vm2, %v580_v43 }
  0x9a   : > { %v419_v45 = vpop.f32.mrf.mxu0 }
  0x9b   : > { %v515_v46 = vmul.f32 %v1336_v38, %v419_v45 }
  0x9d   : > { %v549_v47 = vadd.f32 %v1341_v39, %v515_v46 }
  0x9f   : > { %v581_v48 = vmax.f32 %v549_v47, 0.0 }
  0xa0   : > { %v467_v49 = vpop.f32.mrf.mxu2 }
  0xa1   : > { %1129 = vmatmul.msk.f32.gmra.mxu1 %vm613_vm2, %v581_v48  ;;  %v531_v50 = vmul.f32 %v1336_v38, %v467_v49 }
  0xa2   : > { %v422_v51 = vpop.f32.mrf.mxu0 }
  0xa3   : > { %v516_v52 = vmul.f32 %v1336_v38, %v422_v51  ;;  %v565_v53 = vadd.f32 %v1341_v39, %v531_v50 }
  0xa5   : > { %v550_v54 = vadd.f32 %v1341_v39, %v516_v52  ;;  %v597_v55 = vmax.f32 %v565_v53, 0.0 }
  0xa7   : > { %v582_v56 = vmax.f32 %v550_v54, 0.0  ;;  %1145 = vmatmul.msk.f32.vlgmr.msra.gmra.mxu3 %vm613_vm2, %v597_v55 }
  0xa8   : > { %v470_v57 = vpop.f32.mrf.mxu2 }
  0xa9   : > { %1130 = vmatmul.msk.f32.gmra.mxu1 %vm613_vm2, %v582_v56  ;;  %v532_v58 = vmul.f32 %v1336_v38, %v470_v57 }
  0xaa   : > { %v425_v59 = vpop.f32.mrf.mxu0 }
  0xab   : > { %v517_v60 = vmul.f32 %v1336_v38, %v425_v59  ;;  %v566_v61 = vadd.f32 %v1341_v39, %v532_v58 }
  0xad   : > { %v551_v62 = vadd.f32 %v1341_v39, %v517_v60  ;;  %v598_v63 = vmax.f32 %v566_v61, 0.0 }
  0xaf   : > { %v583_v0 = vmax.f32 %v551_v62, 0.0  ;;  %1146 = vmatmul.msk.f32.gmra.mxu3 %vm613_vm2, %v598_v63 }
  0xb0   : > { %v473_v1 = vpop.f32.mrf.mxu2 }
  0xb1   : > { %1131 = vmatmul.msk.f32.gmra.mxu1 %vm613_vm2, %v583_v0  ;;  %v533_v2 = vmul.f32 %v1336_v38, %v473_v1 }
  0xb2   : > { %v428_v3 = vpop.f32.mrf.mxu0 }
  0xb3   : > { %v518_v4 = vmul.f32 %v1336_v38, %v428_v3  ;;  %v567_v5 = vadd.f32 %v1341_v39, %v533_v2 }
  0xb5   : > { %v552_v6 = vadd.f32 %v1341_v39, %v518_v4  ;;  %v599_v7 = vmax.f32 %v567_v5, 0.0 }
  0xb7   : > { %v584_v8 = vmax.f32 %v552_v6, 0.0  ;;  %1147 = vmatmul.msk.f32.gmra.mxu3 %vm613_vm2, %v599_v7 }
  0xb8   : > { %v476_v9 = vpop.f32.mrf.mxu2 }
  0xb9   : > { %1132 = vmatmul.msk.f32.gmra.mxu1 %vm613_vm2, %v584_v8  ;;  %v534_v10 = vmul.f32 %v1336_v38, %v476_v9 }
  0xba   : > { %v431_v11 = vpop.f32.mrf.mxu0 }
  0xbb   : > { %v519_v12 = vmul.f32 %v1336_v38, %v431_v11  ;;  %v568_v13 = vadd.f32 %v1341_v39, %v534_v10 }
  0xbd   : > { %v553_v14 = vadd.f32 %v1341_v39, %v519_v12  ;;  %v600_v15 = vmax.f32 %v568_v13, 0.0 }
  0xbf   : > { %v585_v16 = vmax.f32 %v553_v14, 0.0  ;;  %1148 = vmatmul.msk.f32.gmra.mxu3 %vm613_vm2, %v600_v15 }
  0xc0   : > { %v479_v17 = vpop.f32.mrf.mxu2 }
  0xc1   : > { %1133 = vmatmul.msk.f32.gmra.mxu1 %vm613_vm2, %v585_v16  ;;  %v535_v18 = vmul.f32 %v1336_v38, %v479_v17 }
  0xc2   : > { %v434_v19 = vpop.f32.mrf.mxu0 }
  0xc3   : > { %v520_v20 = vmul.f32 %v1336_v38, %v434_v19  ;;  %v569_v21 = vadd.f32 %v1341_v39, %v535_v18 }
  0xc5   : > { %v554_v22 = vadd.f32 %v1341_v39, %v520_v20  ;;  %v601_v23 = vmax.f32 %v569_v21, 0.0 }
  0xc7   : > { %v586_v24 = vmax.f32 %v554_v22, 0.0  ;;  %1149 = vmatmul.msk.f32.gmra.mxu3 %vm613_vm2, %v601_v23 }
  0xc8   : > { %v482_v25 = vpop.f32.mrf.mxu2 }
  0xc9   : > { %1134 = vmatmul.msk.f32.gmra.mxu1 %vm613_vm2, %v586_v24  ;;  %v536_v26 = vmul.f32 %v1336_v38, %v482_v25 }
  0xca   : > { %v437_v27 = vpop.f32.mrf.mxu0 }
  0xcb   : > { %v521_v28 = vmul.f32 %v1336_v38, %v437_v27  ;;  %v570_v29 = vadd.f32 %v1341_v39, %v536_v26 }
  0xcd   : > { %v555_v30 = vadd.f32 %v1341_v39, %v521_v28  ;;  %v602_v31 = vmax.f32 %v570_v29, 0.0 }
  0xcf   : > { %v587_v32 = vmax.f32 %v555_v30, 0.0  ;;  %1150 = vmatmul.msk.f32.gmra.mxu3 %vm613_vm2, %v602_v31 }
  0xd0   : > { %v485_v33 = vpop.f32.mrf.mxu2 }
  0xd1   : > { %1135 = vmatmul.msk.f32.gmra.mxu1 %vm613_vm2, %v587_v32  ;;  %v537_v34 = vmul.f32 %v1336_v38, %v485_v33 }
  0xd2   : > { %v440_v35 = vpop.f32.mrf.mxu0 }
  0xd3   : > { %v522_v36 = vmul.f32 %v1336_v38, %v440_v35  ;;  %v571_v37 = vadd.f32 %v1341_v39, %v537_v34  ;;  %v530_v35 = vmul.f32 %v1336_v38, %v1345_v44  ;;  %v1448_v44 = vld [vmem:[%s1681_s4 + $0x1] ss:$0 sm:$0xff] }
  0xd5   : > { %v556_v40 = vadd.f32 %v1341_v39, %v522_v36  ;;  %v603_v41 = vmax.f32 %v571_v37, 0.0 }
  0xd7   : > { %v588_v42 = vmax.f32 %v556_v40, 0.0  ;;  %1151 = vmatmul.msk.f32.gmra.mxu3 %vm613_vm2, %v603_v41  ;;  %v564_v41 = vadd.f32 %v1341_v39, %v530_v35 }
  0xd8   : > { %v488_v43 = vpop.f32.mrf.mxu2 }
  0xd9   : > { %1136 = vmatmul.msk.f32.gmra.mxu1 %vm613_vm2, %v588_v42  ;;  %v538_v45 = vmul.f32 %v1336_v38, %v488_v43  ;;  %v1442_v42 = vld [vmem:[%s1681_s4] ss:$0 sm:$0xff] }
  0xda   : > { %v443_v46 = vpop.f32.mrf.mxu0 }
  0xdb   : > { %v523_v47 = vmul.f32 %v1336_v38, %v443_v46  ;;  %v572_v48 = vadd.f32 %v1341_v39, %v538_v45 }
  0xdd   : > { %v557_v49 = vadd.f32 %v1341_v39, %v523_v47  ;;  %v604_v50 = vmax.f32 %v572_v48, 0.0  ;;  %v596_v47 = vmax.f32 %v564_v41, 0.0 }
  0xdf   : > { %v589_v51 = vmax.f32 %v557_v49, 0.0  ;;  %1152 = vmatmul.msk.f32.gmra.mxu3 %vm613_vm2, %v604_v50 }
  0xe0   : > { %v491_v52 = vpop.f32.mrf.mxu2 }
  0xe1   : > { %1137 = vmatmul.msk.f32.gmra.mxu1 %vm613_vm2, %v589_v51  ;;  %v539_v53 = vmul.f32 %v1336_v38, %v491_v52 }
  0xe2   : > { %v446_v54 = vpop.f32.mrf.mxu0 }
  0xe3   : > { %v524_v55 = vmul.f32 %v1336_v38, %v446_v54  ;;  %v573_v56 = vadd.f32 %v1341_v39, %v539_v53 }
  0xe5   : > { %v558_v57 = vadd.f32 %v1341_v39, %v524_v55  ;;  %v605_v58 = vmax.f32 %v573_v56, 0.0 }
  0xe7   : > { %v590_v59 = vmax.f32 %v558_v57, 0.0  ;;  %1153 = vmatmul.msk.f32.gmra.mxu3 %vm613_vm2, %v605_v58 }
  0xe8   : > { %v494_v60 = vpop.f32.mrf.mxu2 }
  0xe9   : > { %1138 = vmatmul.msk.f32.gmra.mxu1 %vm613_vm2, %v590_v59  ;;  %v540_v61 = vmul.f32 %v1336_v38, %v494_v60 }
  0xea   : > { %v449_v62 = vpop.f32.mrf.mxu0 }
  0xeb   : > { %v525_v63 = vmul.f32 %v1336_v38, %v449_v62  ;;  %v574_v0 = vadd.f32 %v1341_v39, %v540_v61 }
  0xed   : > { %v559_v1 = vadd.f32 %v1341_v39, %v525_v63  ;;  %v606_v2 = vmax.f32 %v574_v0, 0.0 }
  0xef   : > { %v591_v3 = vmax.f32 %v559_v1, 0.0  ;;  %1154 = vmatmul.msk.f32.gmra.mxu3 %vm613_vm2, %v606_v2 }
  0xf0   : > { %v497_v4 = vpop.f32.mrf.mxu2 }
  0xf1   : > { %1139 = vmatmul.msk.f32.gmra.mxu1 %vm613_vm2, %v591_v3  ;;  %v541_v5 = vmul.f32 %v1336_v38, %v497_v4 }
  0xf2   : > { %v452_v6 = vpop.f32.mrf.mxu0 }
  0xf3   : > { %v526_v7 = vmul.f32 %v1336_v38, %v452_v6  ;;  %v575_v8 = vadd.f32 %v1341_v39, %v541_v5 }
  0xf5   : > { %v560_v9 = vadd.f32 %v1341_v39, %v526_v7  ;;  %v607_v10 = vmax.f32 %v575_v8, 0.0 }
  0xf7   : > { %v592_v11 = vmax.f32 %v560_v9, 0.0  ;;  %1155 = vmatmul.msk.f32.gmra.mxu3 %vm613_vm2, %v607_v10 }
  0xf8   : > { %v500_v12 = vpop.f32.mrf.mxu2 }
  0xf9   : > { %1140 = vmatmul.msk.f32.gmra.mxu1 %vm613_vm2, %v592_v11  ;;  %v542_v13 = vmul.f32 %v1336_v38, %v500_v12 }
  0xfa   : > { %v455_v14 = vpop.f32.mrf.mxu0 }
  0xfb   : > { %v527_v15 = vmul.f32 %v1336_v38, %v455_v14  ;;  %v576_v16 = vadd.f32 %v1341_v39, %v542_v13 }
  0xfd   : > { %v561_v17 = vadd.f32 %v1341_v39, %v527_v15  ;;  %v608_v18 = vmax.f32 %v576_v16, 0.0 }
  0xff   : > { %v593_v19 = vmax.f32 %v561_v17, 0.0  ;;  %1156 = vmatmul.msk.f32.gmra.mxu3 %vm613_vm2, %v608_v18 }
 0x100   : > { %v503_v20 = vpop.f32.mrf.mxu2 }
 0x101   : > { %1141 = vmatmul.msk.f32.gmra.mxu1 %vm613_vm2, %v593_v19  ;;  %v543_v21 = vmul.f32 %v1336_v38, %v503_v20 }
 0x102   : > { %v458_v22 = vpop.f32.mrf.mxu0 }
 0x103   : > { %v528_v23 = vmul.f32 %v1336_v38, %v458_v22  ;;  %v577_v24 = vadd.f32 %v1341_v39, %v543_v21 }
 0x105   : > { %v562_v25 = vadd.f32 %v1341_v39, %v528_v23  ;;  %v609_v26 = vmax.f32 %v577_v24, 0.0 }
 0x107   : > { %v594_v27 = vmax.f32 %v562_v25, 0.0  ;;  %1157 = vmatmul.msk.f32.gmra.mxu3 %vm613_vm2, %v609_v26 }
 0x108   : > { %v506_v28 = vpop.f32.mrf.mxu2 }
 0x109   : > { %1142 = vmatmul.msk.f32.gmra.mxu1 %vm613_vm2, %v594_v27  ;;  %v544_v29 = vmul.f32 %v1336_v38, %v506_v28 }
 0x10a   : > { %v461_v30 = vpop.f32.mrf.mxu0 }
 0x10b   : > { %v529_v31 = vmul.f32 %v1336_v38, %v461_v30  ;;  %v578_v32 = vadd.f32 %v1341_v39, %v544_v29 }
 0x10d   : > { %v563_v33 = vadd.f32 %v1341_v39, %v529_v31  ;;  %v610_v34 = vmax.f32 %v578_v32, 0.0 }
 0x10f   : > { %v595_v36 = vmax.f32 %v563_v33, 0.0  ;;  %1158 = vmatmul.msk.f32.gmra.mxu3 %vm613_vm2, %v610_v34 }
 0x110   : > { %v509_v37 = vpop.f32.mrf.mxu2 }
 0x111   : > { %1143 = vmatmul.msk.f32.gmra.mxu1 %vm613_vm2, %v595_v36  ;;  %v545_v40 = vmul.f32 %v1336_v38, %v509_v37 }
 0x113   : > { %v579_v43 = vadd.f32 %v1341_v39, %v545_v40 }
 0x115   : > { %v611_v45 = vmax.f32 %v579_v43, 0.0 }
 0x116   : > { %v730_v46 = vpop.f32.mrf.mxu1 }
 0x117   : > { %v828_v48 = vmul.f32 %v1442_v42, %v730_v46  ;;  %1159 = vmatmul.msk.f32.gmra.mxu3 %vm613_vm2, %v611_v45 }
 0x119   : > { %v862_v38 = vadd.f32 %v1448_v44, %v828_v48  ;;  %1144 = vmatmul.msk.f32.gmra.mxu1 %vm613_vm2, %v596_v47 }
 0x11b   : > { %894 = vst.msk [vmem:[%s1457_s27] sm:$0xff] %vm613_vm2, %v862_v38  ;;  %v926_v51 = vsel %vm613_vm2, %v862_v38, 0.0 }
 0x11e   : > { %v733_v39 = vpop.f32.mrf.mxu1 }
 0x11f   : > { %v829_v49 = vmul.f32 %v1442_v42, %v733_v39 }
 0x121   : > { %v863_v50 = vadd.f32 %v1448_v44, %v829_v49 }
 0x123   : > { %895 = vst.msk [vmem:[%s1457_s27 + $0x8] sm:$0xff] %vm613_vm2, %v863_v50  ;;  %v927_v52 = vsel %vm613_vm2, %v863_v50, 0.0 }
 0x124   : > { %v928_v53 = vadd.f32 %v927_v52, %v926_v51 }
 0x126   : > { %v736_v54 = vpop.f32.mrf.mxu1 }
 0x127   : > { %v830_v55 = vmul.f32 %v1442_v42, %v736_v54 }
 0x129   : > { %v864_v56 = vadd.f32 %v1448_v44, %v830_v55 }
 0x12a   : > { %v781_v57 = vpop.f32.mrf.mxu3 }
 0x12b   : > { %896 = vst.msk [vmem:[%s1457_s27 + $0x10] sm:$0xff] %vm613_vm2, %v864_v56  ;;  %v929_v58 = vsel %vm613_vm2, %v864_v56, 0.0  ;;  %v845_v59 = vmul.f32 %v1442_v42, %v781_v57 }
 0x12c   : > { %v930_v60 = vadd.f32 %v929_v58, %v928_v53 }
 0x12d   : > { %v1476_v61 = vadd.f32 %v1448_v44, %v845_v59 }
 0x12e   : > { %v739_v62 = vpop.f32.mrf.mxu1 }
 0x12f   : > { %v831_v63 = vmul.f32 %v1442_v42, %v739_v62  ;;  %911 = vst.msk [vmem:[%s1457_s27 + $0x88] sm:$0xff] %vm613_vm2, %v1476_v61 }
 0x131   : > { %v865_v0 = vadd.f32 %v1448_v44, %v831_v63 }
 0x132   : > { %v784_v1 = vpop.f32.mrf.mxu3 }
 0x133   : > { %897 = vst.msk [vmem:[%s1457_s27 + $0x18] sm:$0xff] %vm613_vm2, %v865_v0  ;;  %v931_v2 = vsel %vm613_vm2, %v865_v0, 0.0  ;;  %v846_v3 = vmul.f32 %v1442_v42, %v784_v1 }
 0x134   : > { %v932_v4 = vadd.f32 %v931_v2, %v930_v60 }
 0x135   : > { %v1488_v5 = vadd.f32 %v1448_v44, %v846_v3 }
 0x136   : > { %v742_v6 = vpop.f32.mrf.mxu1 }
 0x137   : > { %v832_v7 = vmul.f32 %v1442_v42, %v742_v6  ;;  %912 = vst.msk [vmem:[%s1457_s27 + $0x90] sm:$0xff] %vm613_vm2, %v1488_v5 }
 0x139   : > { %v866_v8 = vadd.f32 %v1448_v44, %v832_v7 }
 0x13a   : > { %v787_v9 = vpop.f32.mrf.mxu3 }
 0x13b   : > { %898 = vst.msk [vmem:[%s1457_s27 + $0x20] sm:$0xff] %vm613_vm2, %v866_v8  ;;  %v933_v10 = vsel %vm613_vm2, %v866_v8, 0.0  ;;  %v847_v11 = vmul.f32 %v1442_v42, %v787_v9 }
 0x13c   : > { %v934_v12 = vadd.f32 %v933_v10, %v932_v4 }
 0x13d   : > { %v1500_v13 = vadd.f32 %v1448_v44, %v847_v11 }
 0x13e   : > { %v745_v14 = vpop.f32.mrf.mxu1 }
 0x13f   : > { %v833_v15 = vmul.f32 %v1442_v42, %v745_v14  ;;  %913 = vst.msk [vmem:[%s1457_s27 + $0x98] sm:$0xff] %vm613_vm2, %v1500_v13 }
 0x141   : > { %v867_v16 = vadd.f32 %v1448_v44, %v833_v15 }
 0x142   : > { %v790_v17 = vpop.f32.mrf.mxu3 }
 0x143   : > { %899 = vst.msk [vmem:[%s1457_s27 + $0x28] sm:$0xff] %vm613_vm2, %v867_v16  ;;  %v935_v18 = vsel %vm613_vm2, %v867_v16, 0.0  ;;  %v848_v19 = vmul.f32 %v1442_v42, %v790_v17 }
 0x144   : > { %v1511_v20 = vadd.f32 %v935_v18, %v934_v12 }
 0x145   : > { %v1514_v21 = vadd.f32 %v1448_v44, %v848_v19 }
 0x146   : > { %v748_v22 = vpop.f32.mrf.mxu1 }
 0x147   : > { %v834_v23 = vmul.f32 %v1442_v42, %v748_v22  ;;  %914 = vst.msk [vmem:[%s1457_s27 + $0xa0] sm:$0xff] %vm613_vm2, %v1514_v21 }
 0x149   : > { %v868_v24 = vadd.f32 %v1448_v44, %v834_v23 }
 0x14a   : > { %v793_v25 = vpop.f32.mrf.mxu3 }
 0x14b   : > { %900 = vst.msk [vmem:[%s1457_s27 + $0x30] sm:$0xff] %vm613_vm2, %v868_v24  ;;  %v849_v26 = vmul.f32 %v1442_v42, %v793_v25  ;;  %v937_v9 = vsel %vm613_vm2, %v868_v24, 0.0 }
 0x14c   : > { %v938_v15 = vadd.f32 %v937_v9, %v1511_v20 }
 0x14d   : > { %v1525_v27 = vadd.f32 %v1448_v44, %v849_v26 }
 0x14e   : > { %v751_v28 = vpop.f32.mrf.mxu1 }
 0x14f   : > { %v835_v29 = vmul.f32 %v1442_v42, %v751_v28  ;;  %915 = vst.msk [vmem:[%s1457_s27 + $0xa8] sm:$0xff] %vm613_vm2, %v1525_v27 }
 0x151   : > { %v869_v30 = vadd.f32 %v1448_v44, %v835_v29 }
 0x152   : > { %v796_v31 = vpop.f32.mrf.mxu3 }
 0x153   : > { %901 = vst.msk [vmem:[%s1457_s27 + $0x38] sm:$0xff] %vm613_vm2, %v869_v30  ;;  %v850_v32 = vmul.f32 %v1442_v42, %v796_v31  ;;  %v939_v12 = vsel %vm613_vm2, %v869_v30, 0.0 }
 0x154   : > { %v940_v18 = vadd.f32 %v939_v12, %v938_v15 }
 0x155   : > { %v1536_v33 = vadd.f32 %v1448_v44, %v850_v32 }
 0x156   : > { %v754_v34 = vpop.f32.mrf.mxu1 }
 0x157   : > { %v836_v35 = vmul.f32 %v1442_v42, %v754_v34  ;;  %916 = vst.msk [vmem:[%s1457_s27 + $0xb0] sm:$0xff] %vm613_vm2, %v1536_v33 }
 0x159   : > { %v870_v36 = vadd.f32 %v1448_v44, %v836_v35 }
 0x15a   : > { %v799_v37 = vpop.f32.mrf.mxu3 }
 0x15b   : > { %902 = vst.msk [vmem:[%s1457_s27 + $0x40] sm:$0xff] %vm613_vm2, %v870_v36  ;;  %v851_v40 = vmul.f32 %v1442_v42, %v799_v37  ;;  %v941_v16 = vsel %vm613_vm2, %v870_v36, 0.0 }
 0x15c   : > { %v942_v24 = vadd.f32 %v941_v16, %v940_v18 }
 0x15d   : > { %v1547_v41 = vadd.f32 %v1448_v44, %v851_v40 }
 0x15e   : > { %v757_v43 = vpop.f32.mrf.mxu1 }
 0x15f   : > { %v837_v45 = vmul.f32 %v1442_v42, %v757_v43  ;;  %917 = vst.msk [vmem:[%s1457_s27 + $0xb8] sm:$0xff] %vm613_vm2, %v1547_v41 }
 0x161   : > { %v871_v46 = vadd.f32 %v1448_v44, %v837_v45 }
 0x162   : > { %v802_v47 = vpop.f32.mrf.mxu3 }
 0x163   : > { %903 = vst.msk [vmem:[%s1457_s27 + $0x48] sm:$0xff] %vm613_vm2, %v871_v46  ;;  %v852_v48 = vmul.f32 %v1442_v42, %v802_v47  ;;  %v943_v22 = vsel %vm613_vm2, %v871_v46, 0.0 }
 0x164   : > { %v944_v28 = vadd.f32 %v943_v22, %v942_v24 }
 0x165   : > { %v1558_v38 = vadd.f32 %v1448_v44, %v852_v48 }
 0x166   : > { %v760_v39 = vpop.f32.mrf.mxu1 }
 0x167   : > { %v838_v49 = vmul.f32 %v1442_v42, %v760_v39  ;;  %918 = vst.msk [vmem:[%s1457_s27 + $0xc0] sm:$0xff] %vm613_vm2, %v1558_v38 }
 0x169   : > { %v872_v50 = vadd.f32 %v1448_v44, %v838_v49 }
 0x16a   : > { %v805_v51 = vpop.f32.mrf.mxu3 }
 0x16b   : > { %904 = vst.msk [vmem:[%s1457_s27 + $0x50] sm:$0xff] %vm613_vm2, %v872_v50  ;;  %v853_v52 = vmul.f32 %v1442_v42, %v805_v51  ;;  %v945_v25 = vsel %vm613_vm2, %v872_v50, 0.0 }
 0x16c   : > { %v946_v31 = vadd.f32 %v945_v25, %v944_v28 }
 0x16d   : > { %v1569_v53 = vadd.f32 %v1448_v44, %v853_v52 }
 0x16e   : > { %v763_v54 = vpop.f32.mrf.mxu1 }
 0x16f   : > { %v839_v55 = vmul.f32 %v1442_v42, %v763_v54  ;;  %919 = vst.msk [vmem:[%s1457_s27 + $0xc8] sm:$0xff] %vm613_vm2, %v1569_v53 }
 0x171   : > { %v873_v56 = vadd.f32 %v1448_v44, %v839_v55 }
 0x172   : > { %v808_v57 = vpop.f32.mrf.mxu3 }
 0x173   : > { %905 = vst.msk [vmem:[%s1457_s27 + $0x58] sm:$0xff] %vm613_vm2, %v873_v56  ;;  %v854_v58 = vmul.f32 %v1442_v42, %v808_v57  ;;  %v947_v29 = vsel %vm613_vm2, %v873_v56, 0.0 }
 0x174   : > { %v948_v35 = vadd.f32 %v947_v29, %v946_v31 }
 0x175   : > { %v1580_v59 = vadd.f32 %v1448_v44, %v854_v58  ;;  %v959_v58 = vsel %vm613_vm2, %v1476_v61, 0.0  ;;  %v967_v61 = vsel %vm613_vm2, %v1525_v27, 0.0 }
 0x176   : > { %v766_v60 = vpop.f32.mrf.mxu1 }
 0x177   : > { %v840_v62 = vmul.f32 %v1442_v42, %v766_v60  ;;  %920 = vst.msk [vmem:[%s1457_s27 + $0xd0] sm:$0xff] %vm613_vm2, %v1580_v59  ;;  %v977_v27 = vsel %vm613_vm2, %v1580_v59, 0.0 }
 0x179   : > { %v874_v63 = vadd.f32 %v1448_v44, %v840_v62 }
 0x17a   : > { %v811_v0 = vpop.f32.mrf.mxu3 }
 0x17b   : > { %906 = vst.msk [vmem:[%s1457_s27 + $0x60] sm:$0xff] %vm613_vm2, %v874_v63  ;;  %v855_v1 = vmul.f32 %v1442_v42, %v811_v0  ;;  %v949_v32 = vsel %vm613_vm2, %v874_v63, 0.0  ;;  %v961_v63 = vsel %vm613_vm2, %v1488_v5, 0.0  ;;  %v971_v5 = vsel %vm613_vm2, %v1547_v41, 0.0 }
 0x17c   : > { %v950_v43 = vadd.f32 %v949_v32, %v948_v35 }
 0x17d   : > { %v1591_v2 = vadd.f32 %v1448_v44, %v855_v1  ;;  %v963_v1 = vsel %vm613_vm2, %v1500_v13, 0.0  ;;  %v973_v13 = vsel %vm613_vm2, %v1558_v38, 0.0 }
 0x17e   : > { %v769_v3 = vpop.f32.mrf.mxu1 }
 0x17f   : > { %v841_v4 = vmul.f32 %v1442_v42, %v769_v3  ;;  %921 = vst.msk [vmem:[%s1457_s27 + $0xd8] sm:$0xff] %vm613_vm2, %v1591_v2 }
 0x181   : > { %v875_v6 = vadd.f32 %v1448_v44, %v841_v4 }
 0x182   : > { %v814_v7 = vpop.f32.mrf.mxu3 }
 0x183   : > { %907 = vst.msk [vmem:[%s1457_s27 + $0x68] sm:$0xff] %vm613_vm2, %v875_v6  ;;  %v856_v8 = vmul.f32 %v1442_v42, %v814_v7  ;;  %v951_v37 = vsel %vm613_vm2, %v875_v6, 0.0 }
 0x184   : > { %v952_v47 = vadd.f32 %v951_v37, %v950_v43 }
 0x185   : > { %v1603_v10 = vadd.f32 %v1448_v44, %v856_v8 }
 0x186   : > { %v772_v11 = vpop.f32.mrf.mxu1 }
 0x187   : > { %v842_v14 = vmul.f32 %v1442_v42, %v772_v11  ;;  %922 = vst.msk [vmem:[%s1457_s27 + $0xe0] sm:$0xff] %vm613_vm2, %v1603_v10  ;;  %v1193_v11 = vmov 256.0   ;;  %v981_v16 = vsel %vm613_vm2, %v1603_v10, 0.0 }
 0x188   : > { %1183 = vrcp.f32 %v1193_v11 }
 0x189   : > { %v876_v17 = vadd.f32 %v1448_v44, %v842_v14 }
 0x18a   : > { %v817_v19 = vpop.f32.mrf.mxu3 }
 0x18b   : > { %908 = vst.msk [vmem:[%s1457_s27 + $0x70] sm:$0xff] %vm613_vm2, %v876_v17  ;;  %v857_v23 = vmul.f32 %v1442_v42, %v817_v19  ;;  %v953_v45 = vsel %vm613_vm2, %v876_v17, 0.0 }
 0x18c   : > { %v954_v50 = vadd.f32 %v953_v45, %v952_v47 }
 0x18d   : > { %v891_v26 = vadd.f32 %v1448_v44, %v857_v23 }
 0x18e   : > { %v775_v20 = vpop.f32.mrf.mxu1  ;;  %v1184_v15 = vpop.eup %1183 }
 0x18f   : > { %v843_v30 = vmul.f32 %v1442_v42, %v775_v20  ;;  %923 = vst.msk [vmem:[%s1457_s27 + $0xe8] sm:$0xff] %vm613_vm2, %v891_v26  ;;  %v983_v17 = vsel %vm613_vm2, %v891_v26, 0.0  ;;  %v996_v18 = vmul.f32 256.0, %v1184_v15  ;;  %vm1000_vm3 = vweird.f32 %v1184_v15 }
 0x191   : > { %v877_v34 = vadd.f32 %v1448_v44, %v843_v30  ;;  %v997_v23 = vsub.f32 1.0, %v996_v18 }
 0x192   : > { %v820_v36 = vpop.f32.mrf.mxu3 }
 0x193   : > { %909 = vst.msk [vmem:[%s1457_s27 + $0x78] sm:$0xff] %vm613_vm2, %v877_v34  ;;  %v858_v40 = vmul.f32 %v1442_v42, %v820_v36  ;;  %v955_v39 = vsel %vm613_vm2, %v877_v34, 0.0 }
 0x194   : > { %v956_v52 = vadd.f32 %v955_v39, %v954_v50 }
 0x195   : > { %v892_v46 = vadd.f32 %v1448_v44, %v858_v40 }
 0x196   : > { %v778_v48 = vpop.f32.mrf.mxu1 }
 0x197   : > { %v844_v49 = vmul.f32 %v1442_v42, %v778_v48  ;;  %924 = vst.msk [vmem:[%s1457_s27 + $0xf0] sm:$0xff] %vm613_vm2, %v892_v46 }
 0x199   : > { %v878_v51 = vadd.f32 %v1448_v44, %v844_v49 }
 0x19a   : > { %v823_v54 = vpop.f32.mrf.mxu3 }
 0x19b   : > { %910 = vst.msk [vmem:[%s1457_s27 + $0x80] sm:$0xff] %vm613_vm2, %v878_v51  ;;  %v957_v55 = vsel %vm613_vm2, %v878_v51, 0.0  ;;  %v859_v56 = vmul.f32 %v1442_v42, %v823_v54  ;;  %v965_v42 = vsel %vm613_vm2, %v1514_v21, 0.0  ;;  %v975_v21 = vsel %vm613_vm2, %v1569_v53, 0.0 }
 0x19c   : > { %v958_v57 = vadd.f32 %v957_v55, %v956_v52  ;;  %v985_v53 = vsel %vm613_vm2, %v892_v46, 0.0 }
 0x19d   : > { %v893_v60 = vadd.f32 %v1448_v44, %v859_v56  ;;  %v969_v44 = vsel %vm613_vm2, %v1536_v33, 0.0  ;;  %v979_v33 = vsel %vm613_vm2, %v1591_v2, 0.0  ;;  %v998_v2 = vmul.f32 %v1184_v15, %v997_v23 }
 0x19e   : > { %v960_v62 = vadd.f32 %v959_v58, %v958_v57 }
 0x19f   : > { %925 = vst.msk [vmem:[%s1457_s27 + $0xf8] sm:$0xff] %vm613_vm2, %v893_v60  ;;  %v987_v22 = vsel %vm613_vm2, %v893_v60, 0.0  ;;  %v999_v29 = vadd.f32 %v1184_v15, %v998_v2 }
 0x1a0   : > { %v962_v0 = vadd.f32 %v961_v63, %v960_v62 }
 0x1a1   : > { %v1001_v31 = vsel %vm1000_vm3, %v1184_v15, %v999_v29 }
 0x1a2   : > { %v964_v3 = vadd.f32 %v963_v1, %v962_v0 }
 0x1a4   : > { %v966_v4 = vadd.f32 %v965_v42, %v964_v3 }
 0x1a6   : > { %v968_v6 = vadd.f32 %v967_v61, %v966_v4 }
 0x1a8   : > { %v970_v7 = vadd.f32 %v969_v44, %v968_v6 }
 0x1aa   : > { %v972_v8 = vadd.f32 %v971_v5, %v970_v7 }
 0x1ac   : > { %v974_v9 = vadd.f32 %v973_v13, %v972_v8 }
 0x1ae   : > { %v976_v12 = vadd.f32 %v975_v21, %v974_v9 }
 0x1b0   : > { %v978_v14 = vadd.f32 %v977_v27, %v976_v12 }
 0x1b2   : > { %v980_v41 = vadd.f32 %v979_v33, %v978_v14 }
 0x1b4   : > { %v982_v38 = vadd.f32 %v981_v16, %v980_v41 }
 0x1b6   : > { %v984_v19 = vadd.f32 %v983_v17, %v982_v38 }
 0x1b8   : > { %v986_v59 = vadd.f32 %v985_v53, %v984_v19 }
 0x1ba   : > { %v988_v24 = vadd.f32 %v987_v22, %v986_v59 }
 0x1bc   : > { %v989_v25 = vrot.slane %v988_v24, 4 }
 0x1be   : > { %v990_v28 = vadd.f32 %v989_v25, %v988_v24 }
 0x1c0   : > { %v991_v20 = vrot.slane %v990_v28, 2 }
 0x1c2   : > { %v992_v30 = vadd.f32 %v991_v20, %v990_v28 }
 0x1c4   : > { %v993_v10 = vrot.slane %v992_v30, 1 }
 0x1c6   : > { %v994_v26 = vadd.f32 %v993_v10, %v992_v30 }
 0x1c8   : > { %v1002_v32 = vmul.f32 %v1001_v31, %v994_v26 }
 0x1ca   : > { %1004 = vst.msk [vmem:[%s260_s30] sm:$0x1] %vm1003_vm4, %v1002_v32 }
 0x1cb PF: > { %s17_s21 = sadd.s32 1, %s1191_s21  }
 0x1cc   : > { %p14_p4 = scmp.ge.s32.totalorder %s17_s21, 4  }
 0x1ce   :  { %16 = sbr.rel (!%p14_p4) target bundleno = 1 (0x1), region = 82 }

// kernel: resblock_cbam_forward.8
= control target key start
LH: loop header
LB: loop body
LE: loop exit
PB: predicated region body
PF: predicated region fallthrough
CT: control target
= control target key end

     0   :  { %s1655_s15 = smov 0   ;;  %s2592_s0 = inlined_call_operand.vmem [shape: f32[2,256,4], index: 0, kind: input, shape index: {}]   ;;  %s2593_s1 = inlined_call_operand.vmem [shape: f32[2,256,98], index: 1, kind: input, shape index: {}]   ;;  %s2594_s2 = inlined_call_operand.vmem [shape: f32[98,4], index: 2, kind: input, shape index: {}]   ;;  %s2595_s3 = inlined_call_operand.vmem [shape: f32[2,256,4], index: 3, kind: output, shape index: {0}]   ;;  %s2596_s4 = inlined_call_operand.vmem [shape: f32[2,1,4], index: 4, kind: output, shape index: {1}]  }
   0x1 LB: > { %s1362_s16 = sadd.s32 4294967295, %s1627_s15   ;;  %p1366_p0 = scmp.ge.s32.totalorder %s1627_s15, 1  ;;  %s1627_s15 = sphi %s1655_s15, %s15_s15  }
   0x2   : > { %p175_p1 = scmp.lt.s32.totalorder %s1627_s15, 3 }
   0x4   : > { %p176_p2 = pnand %p1366_p0, %p175_p1 }
   0x5   : > { %p209_p3 = scmp.lt.s32.totalorder (!%p176_p2), %s1362_s16, 1 }
   0x6   : > { %179 = sbr.rel (%p176_p2) target bundleno = 354 (0x162), region = 32 }
   0xb   : > { %v271_v0 = vld [vmem:[%s2594_s2 + $0x60] sm:$0x3]  ;;  %vm369_vm0 = vcmask 1041408   ;;  %v270_v1 = vld [vmem:[%s2594_s2 + $0x58] sm:$0xff]  ;;  %v269_v2 = vld [vmem:[%s2594_s2 + $0x50] sm:$0xff]  ;;  %s2682_s16 = smov (!%p209_p3, %s1362_s16), 1 }
   0xc   : > { %1373 = vmatpush.msk.msra.mxu0 %vm369_vm0, %v271_v0  ;;  %1443 = vmatpush.msk.msra.mxu1 %vm369_vm0, %v271_v0  ;;  %v268_v3 = vld [vmem:[%s2594_s2 + $0x48] sm:$0xff]  ;;  %v267_v4 = vld [vmem:[%s2594_s2 + $0x40] sm:$0xff]  ;;  %v266_v5 = vld [vmem:[%s2594_s2 + $0x38] sm:$0xff]  ;;  %s1700_s11 = sshll.u32 %s2682_s16, 8  ;;  %vm272_vm1 = vcmask 801792   ;;  %vm1158_vm4 = vcmask 31744   ;;  %s226_s5 = scalar_lea.vmem %s2596_s4, %s2682_s16 }
   0xd   : > { %1444 = vmatpush.msk.msra.mxu2 %vm369_vm0, %v271_v0  ;;  %1445 = vmatpush.msk.msra.mxu3 %vm369_vm0, %v271_v0  ;;  %v265_v6 = vld [vmem:[%s2594_s2 + $0x30] sm:$0xff]  ;;  %v264_v7 = vld [vmem:[%s2594_s2 + $0x28] sm:$0xff]  ;;  %v263_v8 = vld [vmem:[%s2594_s2 + $0x20] sm:$0xff]  ;;  %s1712_s20 = scalar_lea.vmem %s2593_s1, %s1700_s11  ;;  %s1797_s25 = scalar_lea.vmem %s2592_s0, %s1700_s11 }
   0xe   : > { %377 = vmatpush.msra.mxu0 %v270_v1  ;;  %1446 = vmatpush.msra.mxu1 %v270_v1  ;;  %v262_v9 = vld [vmem:[%s2594_s2 + $0x18] sm:$0xff]  ;;  %v261_v10 = vld [vmem:[%s2594_s2 + $0x10] sm:$0xff]  ;;  %v260_v11 = vld [vmem:[%s2594_s2 + $0x8] sm:$0xff]  ;;  %s1833_s28 = scalar_lea.vmem %s2595_s3, %s1700_s11 }
   0xf   : > { %1447 = vmatpush.msra.mxu2 %v270_v1  ;;  %1448 = vmatpush.msra.mxu3 %v270_v1  ;;  %v259_v12 = vld [vmem:[%s2594_s2] sm:$0xff]  ;;  %v228_v17 = vld [vmem:[%s1712_s20 + $0x8] sm:$0xff]  ;;  %v229_v21 = vld [vmem:[%s1712_s20 + $0x10] sm:$0xff] }
  0x10   : > { %378 = vmatpush.msra.mxu0 %v269_v2  ;;  %1449 = vmatpush.msra.mxu1 %v269_v2  ;;  %v227_v13 = vld [vmem:[%s1712_s20] sm:$0xff]  ;;  %v236_v18 = vld [vmem:[%s1712_s20 + $0x48] sm:$0xff]  ;;  %v237_v22 = vld [vmem:[%s1712_s20 + $0x50] sm:$0xff] }
  0x11   : > { %1450 = vmatpush.msra.mxu2 %v269_v2  ;;  %1451 = vmatpush.msra.mxu3 %v269_v2  ;;  %v235_v14 = vld [vmem:[%s1712_s20 + $0x40] sm:$0xff]  ;;  %v244_v19 = vld [vmem:[%s1712_s20 + $0x88] sm:$0xff]  ;;  %v245_v23 = vld [vmem:[%s1712_s20 + $0x90] sm:$0xff] }
  0x12   : > { %379 = vmatpush.msra.mxu0 %v268_v3  ;;  %1452 = vmatpush.msra.mxu1 %v268_v3  ;;  %v243_v15 = vld [vmem:[%s1712_s20 + $0x80] sm:$0xff]  ;;  %v252_v20 = vld [vmem:[%s1712_s20 + $0xc8] sm:$0xff]  ;;  %v253_v24 = vld [vmem:[%s1712_s20 + $0xd0] sm:$0xff] }
  0x13   : > { %1453 = vmatpush.msra.mxu2 %v268_v3  ;;  %1454 = vmatpush.msra.mxu3 %v268_v3  ;;  %v251_v16 = vld [vmem:[%s1712_s20 + $0xc0] sm:$0xff]  ;;  %v230_v25 = vld [vmem:[%s1712_s20 + $0x18] sm:$0xff]  ;;  %v232_v33 = vld [vmem:[%s1712_s20 + $0x28] sm:$0xff] }
  0x14   : > { %380 = vmatpush.msra.mxu0 %v267_v4  ;;  %1455 = vmatpush.msra.mxu1 %v267_v4  ;;  %v238_v26 = vld [vmem:[%s1712_s20 + $0x58] sm:$0xff]  ;;  %v231_v29 = vld [vmem:[%s1712_s20 + $0x20] sm:$0xff]  ;;  %v240_v34 = vld [vmem:[%s1712_s20 + $0x68] sm:$0xff] }
  0x15   : > { %1456 = vmatpush.msra.mxu2 %v267_v4  ;;  %1457 = vmatpush.msra.mxu3 %v267_v4  ;;  %v246_v27 = vld [vmem:[%s1712_s20 + $0x98] sm:$0xff]  ;;  %v239_v30 = vld [vmem:[%s1712_s20 + $0x60] sm:$0xff]  ;;  %v248_v35 = vld [vmem:[%s1712_s20 + $0xa8] sm:$0xff] }
  0x16   : > { %381 = vmatpush.msra.mxu0 %v266_v5  ;;  %1458 = vmatpush.msra.mxu1 %v266_v5  ;;  %v254_v28 = vld [vmem:[%s1712_s20 + $0xd8] sm:$0xff]  ;;  %v247_v31 = vld [vmem:[%s1712_s20 + $0xa0] sm:$0xff]  ;;  %v256_v36 = vld [vmem:[%s1712_s20 + $0xe8] sm:$0xff] }
  0x17   : > { %1459 = vmatpush.msra.mxu2 %v266_v5  ;;  %1460 = vmatpush.msra.mxu3 %v266_v5  ;;  %v255_v32 = vld [vmem:[%s1712_s20 + $0xe0] sm:$0xff]  ;;  %v233_v37 = vld [vmem:[%s1712_s20 + $0x30] sm:$0xff]  ;;  %v234_v41 = vld [vmem:[%s1712_s20 + $0x38] sm:$0xff] }
  0x18   : > { %382 = vmatpush.msra.mxu0 %v265_v6  ;;  %1461 = vmatpush.msra.mxu1 %v265_v6  ;;  %v241_v38 = vld [vmem:[%s1712_s20 + $0x70] sm:$0xff]  ;;  %v242_v42 = vld [vmem:[%s1712_s20 + $0x78] sm:$0xff] }
  0x19   : > { %1462 = vmatpush.msra.mxu2 %v265_v6  ;;  %1463 = vmatpush.msra.mxu3 %v265_v6  ;;  %v249_v39 = vld [vmem:[%s1712_s20 + $0xb0] sm:$0xff]  ;;  %v250_v43 = vld [vmem:[%s1712_s20 + $0xb8] sm:$0xff] }
  0x1a   : > { %383 = vmatpush.msra.mxu0 %v264_v7  ;;  %1464 = vmatpush.msra.mxu1 %v264_v7  ;;  %v257_v40 = vld [vmem:[%s1712_s20 + $0xf0] sm:$0xff]  ;;  %v258_v44 = vld [vmem:[%s1712_s20 + $0xf8] sm:$0xff] }
  0x1b   : > { %1465 = vmatpush.msra.mxu2 %v264_v7  ;;  %1466 = vmatpush.msra.mxu3 %v264_v7 }
  0x1c   : > { %384 = vmatpush.msra.mxu0 %v263_v8  ;;  %1467 = vmatpush.msra.mxu1 %v263_v8 }
  0x1d   : > { %1468 = vmatpush.msra.mxu2 %v263_v8  ;;  %1469 = vmatpush.msra.mxu3 %v263_v8 }
  0x1e   : > { %385 = vmatpush.msra.mxu0 %v262_v9  ;;  %1470 = vmatpush.msra.mxu1 %v262_v9 }
  0x1f   : > { %1471 = vmatpush.msra.mxu2 %v262_v9  ;;  %1472 = vmatpush.msra.mxu3 %v262_v9 }
  0x20   : > { %386 = vmatpush.msra.mxu0 %v261_v10  ;;  %1473 = vmatpush.msra.mxu1 %v261_v10 }
  0x21   : > { %1474 = vmatpush.msra.mxu2 %v261_v10  ;;  %1475 = vmatpush.msra.mxu3 %v261_v10 }
  0x22   : > { %387 = vmatpush.msra.mxu0 %v260_v11  ;;  %1476 = vmatpush.msra.mxu1 %v260_v11 }
  0x23   : > { %1477 = vmatpush.msra.mxu2 %v260_v11  ;;  %1478 = vmatpush.msra.mxu3 %v260_v11 }
  0x24   : > { %388 = vmatpush.msra.mxu0 %v259_v12  ;;  %1479 = vmatpush.msra.mxu1 %v259_v12 }
  0x25   : > { %1374 = vmatmul.msk.f32.vlgmr.msra.gmra.mxu0 %vm272_vm1, %v227_v13  ;;  %1382 = vmatmul.msk.f32.vlgmr.msra.gmra.mxu1 %vm272_vm1, %v235_v14 }
  0x26   : > { %1480 = vmatpush.msra.mxu2 %v259_v12  ;;  %1481 = vmatpush.msra.mxu3 %v259_v12  ;;  %v495_v12 = vld [vmem:[%s1797_s25 + $0x48] sm:$0xff] }
  0x27   : > { %1390 = vmatmul.msk.f32.vlgmr.msra.gmra.mxu2 %vm272_vm1, %v243_v15  ;;  %1398 = vmatmul.msk.f32.vlgmr.msra.gmra.mxu3 %vm272_vm1, %v251_v16 }
  0x2d   : > { %1375 = vmatmul.msk.f32.gmra.mxu0 %vm272_vm1, %v228_v17  ;;  %1383 = vmatmul.msk.f32.gmra.mxu1 %vm272_vm1, %v236_v18 }
  0x2f   : > { %1391 = vmatmul.msk.f32.gmra.mxu2 %vm272_vm1, %v244_v19  ;;  %1399 = vmatmul.msk.f32.gmra.mxu3 %vm272_vm1, %v252_v20 }
  0x35   : > { %1376 = vmatmul.msk.f32.gmra.mxu0 %vm272_vm1, %v229_v21  ;;  %1384 = vmatmul.msk.f32.gmra.mxu1 %vm272_vm1, %v237_v22 }
  0x37   : > { %1392 = vmatmul.msk.f32.gmra.mxu2 %vm272_vm1, %v245_v23  ;;  %1400 = vmatmul.msk.f32.gmra.mxu3 %vm272_vm1, %v253_v24 }
  0x3d   : > { %1377 = vmatmul.msk.f32.gmra.mxu0 %vm272_vm1, %v230_v25  ;;  %1385 = vmatmul.msk.f32.gmra.mxu1 %vm272_vm1, %v238_v26 }
  0x3f   : > { %1393 = vmatmul.msk.f32.gmra.mxu2 %vm272_vm1, %v246_v27  ;;  %1401 = vmatmul.msk.f32.gmra.mxu3 %vm272_vm1, %v254_v28 }
  0x45   : > { %1378 = vmatmul.msk.f32.gmra.mxu0 %vm272_vm1, %v231_v29  ;;  %1386 = vmatmul.msk.f32.gmra.mxu1 %vm272_vm1, %v239_v30  ;;  %v486_v29 = vld [vmem:[%s1797_s25] sm:$0xff] }
  0x47   : > { %1394 = vmatmul.msk.f32.gmra.mxu2 %vm272_vm1, %v247_v31  ;;  %1402 = vmatmul.msk.f32.gmra.mxu3 %vm272_vm1, %v255_v32 }
  0x4d   : > { %1379 = vmatmul.msk.f32.gmra.mxu0 %vm272_vm1, %v232_v33  ;;  %1387 = vmatmul.msk.f32.gmra.mxu1 %vm272_vm1, %v240_v34 }
  0x4f   : > { %1395 = vmatmul.msk.f32.gmra.mxu2 %vm272_vm1, %v248_v35  ;;  %1403 = vmatmul.msk.f32.gmra.mxu3 %vm272_vm1, %v256_v36  ;;  %v494_v35 = vld [vmem:[%s1797_s25 + $0x40] sm:$0xff] }
  0x55   : > { %1380 = vmatmul.msk.f32.gmra.mxu0 %vm272_vm1, %v233_v37  ;;  %1388 = vmatmul.msk.f32.gmra.mxu1 %vm272_vm1, %v241_v38  ;;  %v488_v37 = vld [vmem:[%s1797_s25 + $0x10] sm:$0xff] }
  0x57   : > { %1396 = vmatmul.msk.f32.gmra.mxu2 %vm272_vm1, %v249_v39  ;;  %1404 = vmatmul.msk.f32.gmra.mxu3 %vm272_vm1, %v257_v40 }
  0x5d   : > { %1381 = vmatmul.msk.f32.gmra.mxu0 %vm272_vm1, %v234_v41  ;;  %1389 = vmatmul.msk.f32.gmra.mxu1 %vm272_vm1, %v242_v42 }
  0x5f   : > { %1397 = vmatmul.msk.f32.gmra.mxu2 %vm272_vm1, %v250_v43  ;;  %1405 = vmatmul.msk.f32.gmra.mxu3 %vm272_vm1, %v258_v44 }
  0xa2   : > { %v390_v45 = vpop.f32.mrf.mxu0  ;;  %v414_v46 = vpop.f32.mrf.mxu1 }
  0xa3   : > { %v1406_v47 = vmul.f32 -1.442695, %v390_v45  ;;  %v1414_v48 = vmul.f32 -1.442695, %v414_v46 }
  0xa5   : > { %1491 = vpow2.f32 %v1406_v47 }
  0xa6   : > { %1493 = vpow2.f32 %v1414_v48 }
  0xaa   : > { %v393_v49 = vpop.f32.mrf.mxu0  ;;  %v417_v50 = vpop.f32.mrf.mxu1 }
  0xab   : > { %v1492_v51 = vpop.eup %1491  ;;  %v1407_v52 = vmul.f32 -1.442695, %v393_v49  ;;  %v438_v53 = vpop.f32.mrf.mxu2  ;;  %v1415_v56 = vmul.f32 -1.442695, %v417_v50 }
  0xac   : > { %v1494_v54 = vpop.eup %1493  ;;  %v614_v55 = vadd.f32 1.0, %v1492_v51  ;;  %v1422_v58 = vmul.f32 -1.442695, %v438_v53 }
  0xad   : > { %v622_v57 = vadd.f32 1.0, %v1494_v54  ;;  %1495 = vpow2.f32 %v1407_v52 }
  0xae   : > { %1497 = vrcp.f32 %v614_v55  ;;  %v655_v62 = vand.u32 2147483647, %v614_v55  ;;  %vm651_vm2 = vweird.f32 %v614_v55  ;;  %v657_v5 = vand.u32 2147483648, %v614_v55 }
  0xaf   : > { %1499 = vrcp.f32 %v622_v57  ;;  %vm771_vm3 = vweird.f32 %v622_v57  ;;  %v775_v8 = vand.u32 2147483647, %v622_v57  ;;  %v777_v9 = vand.u32 2147483648, %v622_v57 }
  0xb0   : > { %1501 = vpow2.f32 %v1415_v56  ;;  %vm1784_vm5 = vcmp.eq.f32.partialorder %v655_v62, 8.507059e+37  ;;  %v658_v20 = vor.u32 1.1754944e-38, %v657_v5 }
  0xb1   : > { %1503 = vpow2.f32 %v1422_v58  ;;  %vm1801_vm8 = vcmp.eq.f32.partialorder %v775_v8, 8.507059e+37  ;;  %v778_v23 = vor.u32 1.1754944e-38, %v777_v9 }
  0xb2   : > { %v396_v59 = vpop.f32.mrf.mxu0  ;;  %v420_v60 = vpop.f32.mrf.mxu1 }
  0xb3   : > { %v1496_v61 = vpop.eup %1495  ;;  %v1408_v63 = vmul.f32 -1.442695, %v396_v59  ;;  %v1416_v2 = vmul.f32 -1.442695, %v420_v60  ;;  %v441_v17 = vpop.f32.mrf.mxu2 }
  0xb4   : > { %v1498_v0 = vpop.eup %1497  ;;  %v1781_v1 = vadd.f32 1.0, %v1496_v61  ;;  %v1813_v27 = vmul.f32 -1.442695, %v441_v17 }
  0xb5   : > { %v1500_v3 = vpop.eup %1499  ;;  %v647_v4 = vmul.f32 %v1498_v0, %v614_v55  ;;  %1505 = vpow2.f32 %v1408_v63  ;;  %vm652_vm7 = vweird.f32 %v1498_v0 }
  0xb6   : > { %v1502_v6 = vpop.eup %1501  ;;  %v767_v7 = vmul.f32 %v1500_v3, %v622_v57  ;;  %1507 = vrcp.f32 %v1781_v1  ;;  %vm772_vm6 = vweird.f32 %v1500_v3  ;;  %v672_v15 = vand.u32 2147483648, %v1781_v1  ;;  %vm653_vm11 = vmor %vm651_vm2, %vm652_vm7 }
  0xb7   : > { %v1504_v10 = vpop.eup %1503  ;;  %v648_v11 = vsub.f32 1.0, %v647_v4  ;;  %v1788_v13 = vadd.f32 1.0, %v1502_v6  ;;  %1509 = vpow2.f32 %v1416_v2  ;;  %v670_v19 = vand.u32 2147483647, %v1781_v1  ;;  %vm1807_vm9 = vmor %vm771_vm3, %vm772_vm6 }
  0xb8   : > { %v768_v14 = vsub.f32 1.0, %v767_v7  ;;  %v1791_v16 = vadd.f32 1.0, %v1504_v10  ;;  %vm666_vm10 = vweird.f32 %v1781_v1  ;;  %v673_v31 = vor.u32 1.1754944e-38, %v672_v15 }
  0xb9   : > { %v649_v18 = vmul.f32 %v1498_v0, %v648_v11  ;;  %1511 = vrcp.f32 %v1788_v13  ;;  %v790_v32 = vand.u32 2147483647, %v1788_v13  ;;  %vm1823_vm12 = vcmp.eq.f32.partialorder %v670_v19, 8.507059e+37 }
  0xba   : > { %v769_v21 = vmul.f32 %v1500_v3, %v768_v14  ;;  %1513 = vrcp.f32 %v1791_v16  ;;  %vm786_vm13 = vweird.f32 %v1788_v13  ;;  %v792_v38 = vand.u32 2147483648, %v1788_v13  ;;  %v399_v39 = vpop.f32.mrf.mxu0  ;;  %v423_v52 = vpop.f32.mrf.mxu1 }
  0xbb   : > { %v1506_v24 = vpop.eup %1505  ;;  %v650_v25 = vadd.f32 %v1498_v0, %v649_v18  ;;  %v895_v43 = vand.u32 2147483647, %v1791_v16  ;;  %vm891_vm14 = vweird.f32 %v1791_v16  ;;  %vm1847_vm15 = vcmp.eq.f32.partialorder %v790_v32, 8.507059e+37 }
  0xbc   : > { %v1508_v28 = vpop.eup %1507  ;;  %v770_v30 = vadd.f32 %v1500_v3, %v769_v21  ;;  %v1819_v33 = vadd.f32 1.0, %v1506_v24  ;;  %v793_v55 = vor.u32 1.1754944e-38, %v792_v38  ;;  %v897_v14 = vand.u32 2147483648, %v1791_v16 }
  0xbd   : > { %v654_v34 = vsel %vm653_vm11, %v1498_v0, %v650_v25  ;;  %v662_v36 = vmul.f32 %v1508_v28, %v1781_v1  ;;  %v1510_v40 = vpop.eup %1509  ;;  %vm667_vm0 = vweird.f32 %v1508_v28  ;;  %vm1863_vm2 = vcmp.eq.f32.partialorder %v895_v43, 8.507059e+37  ;;  %v487_v0 = vld [vmem:[%s1797_s25 + $0x8] sm:$0xff] }
  0xbe   : > { %v659_v41 = vsel %vm1784_vm5, %v658_v20, %v654_v34  ;;  %v774_v42 = vsel %vm1807_vm9, %v1500_v3, %v770_v30  ;;  %1515 = vrcp.f32 %v1819_v33  ;;  %v687_v51 = vand.u32 2147483648, %v1819_v33  ;;  %vm668_vm5 = vmor %vm666_vm10, %vm667_vm0 }
  0xbf   : > { %v1512_v44 = vpop.eup %1511  ;;  %v1126_v45 = vmul.f32 %v659_v41, %v486_v29  ;;  %v779_v46 = vsel %vm1801_vm8, %v778_v23, %v774_v42  ;;  %v663_v47 = vsub.f32 1.0, %v662_v36  ;;  %v1856_v56 = vadd.f32 1.0, %v1510_v40  ;;  %v444_v36 = vpop.f32.mrf.mxu2 }
  0xc0   : > { %v1844_v48 = vmul.f32 %v779_v46, %v494_v35  ;;  %v782_v49 = vmul.f32 %v1512_v44, %v1788_v13  ;;  %v1852_v53 = vpop.eup %1513  ;;  %vm787_vm1 = vweird.f32 %v1512_v44  ;;  %vm681_vm3 = vweird.f32 %v1819_v33  ;;  %v462_v46 = vpop.f32.mrf.mxu3 }
  0xc1   : > { %1159 = vst.msk [vmem:[%s1833_s28] sm:$0xff] %vm1158_vm4, %v1126_v45  ;;  %v664_v54 = vmul.f32 %v1508_v28, %v663_v47  ;;  %v887_v58 = vmul.f32 %v1852_v53, %v1791_v16  ;;  %v1191_v60 = vsel %vm1158_vm4, %v1126_v45, 0.0  ;;  %v685_v62 = vand.u32 2147483647, %v1819_v33  ;;  %vm1879_vm7 = vmor %vm786_vm13, %vm787_vm1 }
  0xc2   : > { %1167 = vst.msk [vmem:[%s1833_s28 + $0x40] sm:$0xff] %vm1158_vm4, %v1844_v48  ;;  %v783_v57 = vsub.f32 1.0, %v782_v49  ;;  %1517 = vrcp.f32 %v1856_v56  ;;  %v688_v3 = vor.u32 1.1754944e-38, %v687_v51  ;;  %vm801_vm6 = vweird.f32 %v1856_v56  ;;  %v402_v17 = vpop.f32.mrf.mxu0 }
  0xc3   : > { %v665_v61 = vadd.f32 %v1508_v28, %v664_v54  ;;  %v888_v4 = vsub.f32 1.0, %v887_v58  ;;  %v805_v8 = vand.u32 2147483647, %v1856_v56  ;;  %vm892_vm8 = vweird.f32 %v1852_v53 }
  0xc4   : > { %v1516_v63 = vpop.eup %1515  ;;  %v784_v2 = vmul.f32 %v1512_v44, %v783_v57  ;;  %v1409_v15 = vmul.f32 -1.442695, %v399_v39  ;;  %vm1896_vm10 = vmor %vm891_vm14, %vm892_vm8  ;;  %v1417_v21 = vmul.f32 -1.442695, %v423_v52  ;;  %1519 = vpow2.f32 %v1813_v27  ;;  %v502_v27 = vld [vmem:[%s1797_s25 + $0x80] sm:$0xff] }
  0xc5   : > { %v669_v5 = vsel %vm668_vm5, %v1508_v28, %v665_v61  ;;  %v677_v7 = vmul.f32 %v1516_v63, %v1819_v33  ;;  %vm682_vm9 = vweird.f32 %v1516_v63  ;;  %v889_v10 = vmul.f32 %v1852_v53, %v888_v4 }
  0xc6   : > { %v674_v1 = vsel %vm1823_vm12, %v673_v31, %v669_v5  ;;  %v785_v9 = vadd.f32 %v1512_v44, %v784_v2  ;;  %v898_v26 = vor.u32 1.1754944e-38, %v897_v14  ;;  %v807_v30 = vand.u32 2147483648, %v1856_v56  ;;  %v426_v31 = vpop.f32.mrf.mxu1  ;;  %vm683_vm11 = vmor %vm681_vm3, %vm682_vm9 }
  0xc7   : > { %v1127_v11 = vmul.f32 %v674_v1, %v487_v0  ;;  %v678_v13 = vsub.f32 1.0, %v677_v7  ;;  %v890_v19 = vadd.f32 %v1852_v53, %v889_v10  ;;  %1521 = vpow2.f32 %v1409_v15 }
  0xc8   : > { %v789_v18 = vsel %vm1879_vm7, %v1512_v44, %v785_v9  ;;  %v1518_v22 = vpop.eup %1517  ;;  %v1410_v35 = vmul.f32 -1.442695, %v402_v17  ;;  %1523 = vpow2.f32 %v1417_v21  ;;  %vm686_vm13 = vcmp.eq.f32.partialorder %v685_v62, 8.507059e+37 }
  0xc9   : > { %1160 = vst.msk [vmem:[%s1833_s28 + $0x8] sm:$0xff] %vm1158_vm4, %v1127_v11  ;;  %v1192_v23 = vsel %vm1158_vm4, %v1127_v11, 0.0  ;;  %v794_v24 = vsel %vm1847_vm15, %v793_v55, %v789_v18  ;;  %v679_v25 = vmul.f32 %v1516_v63, %v678_v13  ;;  %v797_v29 = vmul.f32 %v1518_v22, %v1856_v56  ;;  %v496_v55 = vld [vmem:[%s1797_s25 + $0x50] sm:$0xff] }
  0xca   : > { %v1193_v16 = vadd.f32 %v1192_v23, %v1191_v60  ;;  %v1906_v28 = vmul.f32 %v794_v24, %v495_v12  ;;  %v894_v34 = vsel %vm1896_vm10, %v1852_v53, %v890_v19  ;;  %vm802_vm12 = vweird.f32 %v1518_v22  ;;  %v1520_v43 = vpop.eup %1519  ;;  %v405_v57 = vpop.f32.mrf.mxu0 }
  0xcb   : > { %v680_v32 = vadd.f32 %v1516_v63, %v679_v25  ;;  %v798_v38 = vsub.f32 1.0, %v797_v29  ;;  %v899_v39 = vsel %vm1863_vm2, %v898_v26, %v894_v34  ;;  %v1418_v42 = vmul.f32 -1.442695, %v426_v31  ;;  %vm1927_vm14 = vmor %vm801_vm6, %vm802_vm12 }
  0xcc   : > { %1168 = vst.msk [vmem:[%s1833_s28 + $0x48] sm:$0xff] %vm1158_vm4, %v1906_v28  ;;  %v1923_v41 = vmul.f32 %v899_v39, %v502_v27  ;;  %1525 = vpow2.f32 %v1410_v35  ;;  %v1424_v33 = vmul.f32 -1.442695, %v444_v36  ;;  %v808_v50 = vor.u32 1.1754944e-38, %v807_v30 }
  0xcd   : > { %v684_v40 = vsel %vm683_vm11, %v1516_v63, %v680_v32  ;;  %v799_v45 = vmul.f32 %v1518_v22, %v798_v38  ;;  %v631_v51 = vadd.f32 1.0, %v1520_v43  ;;  %1527 = vpow2.f32 %v1418_v42  ;;  %v1522_v53 = vpop.eup %1521  ;;  %v503_v42 = vld [vmem:[%s1797_s25 + $0x88] sm:$0xff] }
  0xce   : > { %v689_v44 = vsel %vm686_vm13, %v688_v3, %v684_v40  ;;  %1175 = vst.msk [vmem:[%s1833_s28 + $0x80] sm:$0xff] %vm1158_vm4, %v1923_v41  ;;  %vm806_vm15 = vcmp.eq.f32.partialorder %v805_v8, 8.507059e+37  ;;  %1529 = vpow2.f32 %v1424_v33  ;;  %v1430_v56 = vmul.f32 -1.442695, %v462_v46  ;;  %v1524_v58 = vpop.eup %1523 }
  0xcf   : > { %v1128_v47 = vmul.f32 %v689_v44, %v488_v37  ;;  %v800_v52 = vadd.f32 %v1518_v22, %v799_v45  ;;  %1531 = vrcp.f32 %v631_v51  ;;  %v1942_v61 = vadd.f32 1.0, %v1522_v53 }
  0xd0   : > { %v910_v62 = vand.u32 2147483647, %v631_v51  ;;  %v1944_v0 = vadd.f32 1.0, %v1524_v58  ;;  %v1411_v4 = vmul.f32 -1.442695, %v405_v57  ;;  %vm906_vm0 = vweird.f32 %v631_v51 }
  0xd1   : > { %1161 = vst.msk [vmem:[%s1833_s28 + $0x10] sm:$0xff] %vm1158_vm4, %v1128_v47  ;;  %v1194_v54 = vsel %vm1158_vm4, %v1128_v47, 0.0  ;;  %v804_v60 = vsel %vm1927_vm14, %v1518_v22, %v800_v52  ;;  %1533 = vrcp.f32 %v1942_v61  ;;  %v912_v8 = vand.u32 2147483648, %v631_v51 }
  0xd2   : > { %v1938_v59 = vadd.f32 %v1194_v54, %v1193_v16  ;;  %v809_v63 = vsel %vm806_vm15, %v808_v50, %v804_v60  ;;  %v1526_v2 = vpop.eup %1525  ;;  %1535 = vrcp.f32 %v1944_v0  ;;  %vm1953_vm1 = vcmp.eq.f32.partialorder %v910_v62, 8.507059e+37 }
  0xd3   : > { %v1946_v3 = vmul.f32 %v809_v63, %v496_v55  ;;  %v1528_v5 = vpop.eup %1527  ;;  %1537 = vpow2.f32 %v1430_v56  ;;  %v700_v9 = vand.u32 2147483647, %v1942_v61  ;;  %v702_v10 = vand.u32 2147483648, %v1942_v61  ;;  %v489_v55 = vld [vmem:[%s1797_s25 + $0x18] sm:$0xff] }
  0xd4   : > { %v1530_v6 = vpop.eup %1529  ;;  %v1959_v11 = vadd.f32 1.0, %v1526_v2  ;;  %v1961_v12 = vadd.f32 1.0, %v1528_v5  ;;  %v820_v13 = vand.u32 2147483647, %v1944_v0  ;;  %v822_v14 = vand.u32 2147483648, %v1944_v0  ;;  %v465_v5 = vpop.f32.mrf.mxu3 }
  0xd5   : > { %1169 = vst.msk [vmem:[%s1833_s28 + $0x50] sm:$0xff] %vm1158_vm4, %v1946_v3  ;;  %v1532_v1 = vpop.eup %1531  ;;  %1539 = vpow2.f32 %v1411_v4  ;;  %vm696_vm2 = vweird.f32 %v1942_v61  ;;  %vm816_vm3 = vweird.f32 %v1944_v0  ;;  %v1968_v17 = vadd.f32 1.0, %v1530_v6  ;;  %v429_v4 = vpop.f32.mrf.mxu1 }
  0xd6   : > { %v902_v15 = vmul.f32 %v1532_v1, %v631_v51  ;;  %1541 = vrcp.f32 %v1959_v11  ;;  %vm907_vm5 = vweird.f32 %v1532_v1  ;;  %v913_v20 = vor.u32 1.1754944e-38, %v912_v8 }
  0xd7   : > { %v1534_v18 = vpop.eup %1533  ;;  %1543 = vrcp.f32 %v1961_v12  ;;  %vm1972_vm6 = vcmp.eq.f32.partialorder %v700_v9, 8.507059e+37  ;;  %v703_v24 = vor.u32 1.1754944e-38, %v702_v10  ;;  %v717_v25 = vand.u32 2147483648, %v1959_v11  ;;  %vm1985_vm8 = vmor %vm906_vm0, %vm907_vm5 }
  0xd8   : > { %v903_v19 = vsub.f32 1.0, %v902_v15  ;;  %v1536_v21 = vpop.eup %1535  ;;  %v692_v22 = vmul.f32 %v1534_v18, %v1942_v61  ;;  %v835_v26 = vand.u32 2147483647, %v1961_v12  ;;  %vm1979_vm7 = vcmp.eq.f32.partialorder %v820_v13, 8.507059e+37  ;;  %v447_v13 = vpop.f32.mrf.mxu2 }
  0xd9   : > { %v1538_v16 = vpop.eup %1537  ;;  %v812_v29 = vmul.f32 %v1536_v21, %v1944_v0  ;;  %v823_v27 = vor.u32 1.1754944e-38, %v822_v14  ;;  %v715_v35 = vand.u32 2147483647, %v1959_v11  ;;  %vm831_vm9 = vweird.f32 %v1961_v12  ;;  %v497_v0 = vld [vmem:[%s1797_s25 + $0x58] sm:$0xff] }
  0xda   : > { %v904_v31 = vmul.f32 %v1532_v1, %v903_v19  ;;  %v693_v32 = vsub.f32 1.0, %v692_v22  ;;  %1545 = vrcp.f32 %v1968_v17  ;;  %vm697_vm10 = vweird.f32 %v1534_v18 }
  0xdb   : > { %v1540_v36 = vpop.eup %1539  ;;  %v813_v37 = vsub.f32 1.0, %v812_v29  ;;  %vm817_vm11 = vweird.f32 %v1536_v21  ;;  %vm711_vm12 = vweird.f32 %v1959_v11  ;;  %v718_v43 = vor.u32 1.1754944e-38, %v717_v25  ;;  %vm698_vm0 = vmor %vm696_vm2, %vm697_vm10  ;;  %v498_v25 = vld [vmem:[%s1797_s25 + $0x60] sm:$0xff] }
  0xdc   : > { %v905_v38 = vadd.f32 %v1532_v1, %v904_v31  ;;  %v1542_v39 = vpop.eup %1541  ;;  %v694_v40 = vmul.f32 %v1534_v18, %v693_v32  ;;  %vm1994_vm13 = vcmp.eq.f32.partialorder %v835_v26, 8.507059e+37  ;;  %v1998_v45 = vadd.f32 1.0, %v1538_v16  ;;  %vm2007_vm14 = vmor %vm816_vm3, %vm817_vm11 }
  0xdd   : > { %v1544_v33 = vpop.eup %1543  ;;  %v814_v46 = vmul.f32 %v1536_v21, %v813_v37  ;;  %v707_v49 = vmul.f32 %v1542_v39, %v1959_v11  ;;  %v837_v50 = vand.u32 2147483648, %v1961_v12  ;;  %vm921_vm15 = vweird.f32 %v1968_v17 }
  0xde   : > { %v909_v47 = vsel %vm1985_vm8, %v1532_v1, %v905_v38  ;;  %v695_v51 = vadd.f32 %v1534_v18, %v694_v40  ;;  %v827_v54 = vmul.f32 %v1544_v33, %v1961_v12  ;;  %v925_v60 = vand.u32 2147483647, %v1968_v17  ;;  %v408_v40 = vpop.f32.mrf.mxu0 }
  0xdf   : > { %v914_v53 = vsel %vm1953_vm1, %v913_v20, %v909_v47  ;;  %v815_v56 = vadd.f32 %v1536_v21, %v814_v46  ;;  %v708_v58 = vsub.f32 1.0, %v707_v49  ;;  %vm832_vm1 = vweird.f32 %v1544_v33  ;;  %v468_v46 = vpop.f32.mrf.mxu3 }
  0xe0   : > { %v2019_v57 = vmul.f32 %v914_v53, %v503_v42  ;;  %v1546_v62 = vpop.eup %1545  ;;  %v699_v63 = vsel %vm698_vm0, %v1534_v18, %v695_v51  ;;  %v828_v2 = vsub.f32 1.0, %v827_v54  ;;  %1547 = vrcp.f32 %v1998_v45  ;;  %vm2041_vm3 = vmor %vm831_vm9, %vm832_vm1  ;;  %v504_v42 = vld [vmem:[%s1797_s25 + $0x90] sm:$0xff]  ;;  %v450_v54 = vpop.f32.mrf.mxu2 }
  0xe1   : > { %v704_v61 = vsel %vm1972_vm6, %v703_v24, %v699_v63  ;;  %v819_v6 = vsel %vm2007_vm14, %v1536_v21, %v815_v56  ;;  %v709_v7 = vmul.f32 %v1542_v39, %v708_v58  ;;  %vm712_vm2 = vweird.f32 %v1542_v39  ;;  %v490_v21 = vld [vmem:[%s1797_s25 + $0x20] sm:$0xff] }
  0xe2   : > { %1176 = vst.msk [vmem:[%s1833_s28 + $0x88] sm:$0xff] %vm1158_vm4, %v2019_v57  ;;  %v2031_v8 = vmul.f32 %v704_v61, %v489_v55  ;;  %v824_v1 = vsel %vm1979_vm7, %v823_v27, %v819_v6  ;;  %v829_v9 = vmul.f32 %v1544_v33, %v828_v2  ;;  %v917_v10 = vmul.f32 %v1546_v62, %v1968_v17  ;;  %vm713_vm5 = vmor %vm711_vm12, %vm712_vm2 }
  0xe3   : > { %v2036_v14 = vmul.f32 %v824_v1, %v497_v0  ;;  %v710_v15 = vadd.f32 %v1542_v39, %v709_v7  ;;  %v838_v19 = vor.u32 1.1754944e-38, %v837_v50  ;;  %v927_v20 = vand.u32 2147483648, %v1968_v17 }
  0xe4   : > { %1162 = vst.msk [vmem:[%s1833_s28 + $0x18] sm:$0xff] %vm1158_vm4, %v2031_v8  ;;  %v830_v22 = vadd.f32 %v1544_v33, %v829_v9  ;;  %v918_v23 = vsub.f32 1.0, %v917_v10  ;;  %vm922_vm6 = vweird.f32 %v1546_v62  ;;  %v2052_v24 = vadd.f32 1.0, %v1540_v36 }
  0xe5   : > { %1170 = vst.msk [vmem:[%s1833_s28 + $0x58] sm:$0xff] %vm1158_vm4, %v2036_v14  ;;  %v714_v12 = vsel %vm713_vm5, %v1542_v39, %v710_v15  ;;  %vm716_vm7 = vcmp.eq.f32.partialorder %v715_v35, 8.507059e+37  ;;  %v1419_v26 = vmul.f32 -1.442695, %v429_v4  ;;  %vm2062_vm8 = vcmp.eq.f32.partialorder %v925_v60, 8.507059e+37  ;;  %vm2072_vm9 = vmor %vm921_vm15, %vm922_vm6 }
  0xe6   : > { %v1548_v16 = vpop.eup %1547  ;;  %v719_v29 = vsel %vm716_vm7, %v718_v43, %v714_v12  ;;  %v834_v30 = vsel %vm2041_vm3, %v1544_v33, %v830_v22  ;;  %v919_v27 = vmul.f32 %v1546_v62, %v918_v23  ;;  %v928_v35 = vor.u32 1.1754944e-38, %v927_v20  ;;  %v432_v33 = vpop.f32.mrf.mxu1 }
  0xe7   : > { %v2066_v32 = vmul.f32 %v719_v29, %v490_v21  ;;  %v839_v11 = vsel %vm1994_vm13, %v838_v19, %v834_v30  ;;  %v1007_v36 = vmul.f32 %v1548_v16, %v1998_v45  ;;  %v1017_v39 = vand.u32 2147483648, %v1998_v45  ;;  %v2140_v22 = vpop.f32.mrf.mxu3 }
  0xe8   : > { %v2077_v37 = vmul.f32 %v839_v11, %v498_v25  ;;  %v920_v38 = vadd.f32 %v1546_v62, %v919_v27  ;;  %1549 = vrcp.f32 %v2052_v24  ;;  %vm1011_vm10 = vweird.f32 %v1998_v45 }
  0xe9   : > { %1163 = vst.msk [vmem:[%s1833_s28 + $0x20] sm:$0xff] %vm1158_vm4, %v2066_v32  ;;  %v1008_v17 = vsub.f32 1.0, %v1007_v36  ;;  %vm1012_vm11 = vweird.f32 %v1548_v16  ;;  %v1015_v43 = vand.u32 2147483647, %v1998_v45  ;;  %1551 = vpow2.f32 %v1419_v26 }
  0xea   : > { %1171 = vst.msk [vmem:[%s1833_s28 + $0x60] sm:$0xff] %vm1158_vm4, %v2077_v37  ;;  %v924_v44 = vsel %vm2072_vm9, %v1546_v62, %v920_v38  ;;  %vm2096_vm12 = vmor %vm1011_vm10, %vm1012_vm11  ;;  %v1018_v45 = vor.u32 1.1754944e-38, %v1017_v39  ;;  %v1425_v52 = vmul.f32 -1.442695, %v447_v13  ;;  %v1431_v53 = vmul.f32 -1.442695, %v465_v5 }
  0xeb   : > { %v929_v47 = vsel %vm2062_vm8, %v928_v35, %v924_v44  ;;  %v1009_v49 = vmul.f32 %v1548_v16, %v1008_v17  ;;  %vm1016_vm13 = vcmp.eq.f32.partialorder %v1015_v43, 8.507059e+37  ;;  %v1412_v56 = vmul.f32 -1.442695, %v408_v40  ;;  %v510_v62 = vld [vmem:[%s1797_s25 + $0xc0] sm:$0xff] }
  0xec   : > { %v2094_v50 = vmul.f32 %v929_v47, %v504_v42  ;;  %v1420_v58 = vmul.f32 -1.442695, %v432_v33  ;;  %1553 = vpow2.f32 %v1425_v52  ;;  %v1426_v2 = vmul.f32 -1.442695, %v450_v54 }
  0xed   : > { %v1010_v55 = vadd.f32 %v1548_v16, %v1009_v49  ;;  %1555 = vpow2.f32 %v1431_v53  ;;  %v2109_v4 = vsel %vm1158_vm4, %v1844_v48, 0.0  ;;  %v2113_v5 = vsel %vm1158_vm4, %v1906_v28, 0.0  ;;  %v411_v28 = vpop.f32.mrf.mxu0 }
  0xee   : > { %v1550_v60 = vpop.eup %1549  ;;  %1177 = vst.msk [vmem:[%s1833_s28 + $0x90] sm:$0xff] %vm1158_vm4, %v2094_v50  ;;  %1557 = vpow2.f32 %v1412_v56  ;;  %v2117_v7 = vsel %vm1158_vm4, %v1923_v41, 0.0  ;;  %v730_v10 = vand.u32 2147483647, %v2052_v24  ;;  %v732_v48 = vand.u32 2147483648, %v2052_v24 }
  0xef   : > { %v1014_v63 = vsel %vm2096_vm12, %v1548_v16, %v1010_v55  ;;  %v722_v0 = vmul.f32 %v1550_v60, %v2052_v24  ;;  %v1552_v6 = vpop.eup %1551  ;;  %1559 = vpow2.f32 %v1420_v58  ;;  %v1432_v15 = vmul.f32 -1.442695, %v468_v46 }
  0xf0   : > { %v1019_v61 = vsel %vm1016_vm13, %v1018_v45, %v1014_v63  ;;  %v2123_v13 = vadd.f32 1.0, %v1552_v6  ;;  %v2127_v18 = vsel %vm1158_vm4, %v1946_v3, 0.0  ;;  %vm727_vm14 = vweird.f32 %v1550_v60  ;;  %v435_v3 = vpop.f32.mrf.mxu1  ;;  %v2200_v6 = vpop.f32.mrf.mxu2 }
  0xf1   : > { %v2119_v1 = vmul.f32 %v1019_v61, %v510_v62  ;;  %v723_v9 = vsub.f32 1.0, %v722_v0  ;;  %1561 = vpow2.f32 %v1426_v2  ;;  %v1196_v20 = vsel %vm1158_vm4, %v2031_v8, 0.0  ;;  %v491_v8 = vld [vmem:[%s1797_s25 + $0x28] sm:$0xff] }
  0xf2   : > { %v1554_v19 = vpop.eup %1553  ;;  %v2136_v21 = vsel %vm1158_vm4, %v2019_v57, 0.0  ;;  %vm726_vm15 = vweird.f32 %v2052_v24  ;;  %1563 = vrcp.f32 %v2123_v13  ;;  %v850_v25 = vand.u32 2147483647, %v2123_v13 }
  0xf3   : > { %1183 = vst.msk [vmem:[%s1833_s28 + $0xc0] sm:$0xff] %vm1158_vm4, %v2119_v1  ;;  %v724_v41 = vmul.f32 %v1550_v60, %v723_v9  ;;  %v1556_v23 = vpop.eup %1555  ;;  %v2143_v26 = vadd.f32 1.0, %v1554_v19  ;;  %v1413_v16 = vmul.f32 -1.442695, %v411_v28  ;;  %vm728_vm0 = vmor %vm726_vm15, %vm727_vm14  ;;  %vm731_vm1 = vcmp.eq.f32.partialorder %v730_v10, 8.507059e+37  ;;  %v492_v9 = vld [vmem:[%s1797_s25 + $0x30] sm:$0xff] }
  0xf4   : > { %v1558_v29 = vpop.eup %1557  ;;  %v733_v57 = vor.u32 1.1754944e-38, %v732_v48  ;;  %v2147_v30 = vadd.f32 1.0, %v1556_v23  ;;  %1565 = vpow2.f32 %v1432_v15  ;;  %v852_v31 = vand.u32 2147483648, %v2123_v13 }
  0xf5   : > { %v725_v12 = vadd.f32 %v1550_v60, %v724_v41  ;;  %v1560_v24 = vpop.eup %1559  ;;  %1567 = vrcp.f32 %v2143_v26  ;;  %v1421_v11 = vmul.f32 -1.442695, %v435_v3  ;;  %v2152_v34 = vadd.f32 %v1196_v20, %v1938_v59 }
  0xf6   : > { %v2156_v35 = vsel %vm1158_vm4, %v2036_v14, 0.0  ;;  %1569 = vrcp.f32 %v2147_v30  ;;  %vm846_vm2 = vweird.f32 %v2123_v13  ;;  %vm2162_vm3 = vcmp.eq.f32.partialorder %v850_v25, 8.507059e+37 }
  0xf7   : > { %v729_v27 = vsel %vm728_vm0, %v1550_v60, %v725_v12  ;;  %v1562_v38 = vpop.eup %1561  ;;  %1571 = vpow2.f32 %v1413_v16  ;;  %v940_v59 = vand.u32 2147483647, %v2143_v26  ;;  %v942_v17 = vand.u32 2147483648, %v2143_v26  ;;  %v2190_v60 = vpop.f32.mrf.mxu3 }
  0xf8   : > { %v734_v36 = vsel %vm731_vm1, %v733_v57, %v729_v27  ;;  %v1564_v42 = vpop.eup %1563  ;;  %v2168_v14 = vadd.f32 1.0, %v1558_v29  ;;  %v2170_v43 = vadd.f32 1.0, %v1560_v24  ;;  %v853_v33 = vor.u32 1.1754944e-38, %v852_v31 }
  0xf9   : > { %v2159_v39 = vmul.f32 %v734_v36, %v491_v8  ;;  %v842_v44 = vmul.f32 %v1564_v42, %v2123_v13  ;;  %v1030_v46 = vand.u32 2147483647, %v2147_v30  ;;  %1573 = vpow2.f32 %v1421_v11  ;;  %v499_v13 = vld [vmem:[%s1797_s25 + $0x68] sm:$0xff] }
  0xfa   : > { %v1566_v47 = vpop.eup %1565  ;;  %vm936_vm5 = vweird.f32 %v2143_v26  ;;  %vm1026_vm6 = vweird.f32 %v2147_v30  ;;  %v1032_v49 = vand.u32 2147483648, %v2147_v30  ;;  %1575 = vrcp.f32 %v2168_v14 }
  0xfb   : > { %1164 = vst.msk [vmem:[%s1833_s28 + $0x28] sm:$0xff] %vm1158_vm4, %v2159_v39  ;;  %v1568_v51 = vpop.eup %1567  ;;  %v843_v45 = vsub.f32 1.0, %v842_v44  ;;  %vm847_vm7 = vweird.f32 %v1564_v42  ;;  %1577 = vrcp.f32 %v2170_v43  ;;  %v2182_v52 = vadd.f32 1.0, %v1562_v38  ;;  %v505_v38 = vld [vmem:[%s1797_s25 + $0x98] sm:$0xff]  ;;  %v511_v44 = vld [vmem:[%s1797_s25 + $0xc8] sm:$0xff] }
  0xfc   : > { %v1570_v53 = vpop.eup %1569  ;;  %v932_v54 = vmul.f32 %v1568_v51, %v2143_v26  ;;  %vm2185_vm8 = vcmp.eq.f32.partialorder %v940_v59, 8.507059e+37  ;;  %v943_v56 = vor.u32 1.1754944e-38, %v942_v17  ;;  %v747_v58 = vand.u32 2147483648, %v2168_v14  ;;  %vm2205_vm10 = vmor %vm846_vm2, %vm847_vm7 }
  0xfd   : > { %v2192_v62 = vpop.eup %1571  ;;  %v844_v63 = vmul.f32 %v1564_v42, %v843_v45  ;;  %v1022_v0 = vmul.f32 %v1570_v53, %v2147_v30  ;;  %vm2195_vm9 = vcmp.eq.f32.partialorder %v1030_v46, 8.507059e+37  ;;  %v865_v61 = vand.u32 2147483647, %v2170_v43 }
  0xfe   : > { %v933_v10 = vsub.f32 1.0, %v932_v54  ;;  %vm937_vm11 = vweird.f32 %v1568_v51  ;;  %vm1027_vm12 = vweird.f32 %v1570_v53  ;;  %v1033_v48 = vor.u32 1.1754944e-38, %v1032_v49 }
  0xff   : > { %v2209_v15 = vpop.eup %1573  ;;  %v845_v28 = vadd.f32 %v1564_v42, %v844_v63  ;;  %v1023_v41 = vsub.f32 1.0, %v1022_v0  ;;  %vm741_vm13 = vweird.f32 %v2168_v14  ;;  %v867_v19 = vand.u32 2147483648, %v2170_v43  ;;  %vm2222_vm15 = vmor %vm936_vm5, %vm937_vm11  ;;  %v2262_v0 = vpop.f32.mrf.mxu3 }
 0x100   : > { %1579 = vrcp.f32 %v2182_v52  ;;  %v1576_v20 = vpop.eup %1575  ;;  %v934_v3 = vmul.f32 %v1568_v51, %v933_v10  ;;  %v745_v23 = vand.u32 2147483647, %v2168_v14  ;;  %v748_v12 = vor.u32 1.1754944e-38, %v747_v58  ;;  %vm2236_vm1 = vmor %vm1026_vm6, %vm1027_vm12 }
 0x101   : > { %vm861_vm14 = vweird.f32 %v2170_v43  ;;  %v1578_v25 = vpop.eup %1577  ;;  %v849_v16 = vsel %vm2205_vm10, %v1564_v42, %v845_v28  ;;  %v1024_v8 = vmul.f32 %v1570_v53, %v1023_v41  ;;  %v737_v57 = vmul.f32 %v1576_v20, %v2168_v14  ;;  %v500_v14 = vld [vmem:[%s1797_s25 + $0x70] sm:$0xff] }
 0x102   : > { %vm2227_vm0 = vcmp.eq.f32.partialorder %v865_v61, 8.507059e+37  ;;  %v854_v27 = vsel %vm2162_vm3, %v853_v33, %v849_v16  ;;  %v935_v31 = vadd.f32 %v1568_v51, %v934_v3  ;;  %v857_v11 = vmul.f32 %v1578_v25, %v2170_v43  ;;  %v456_v61 = vpop.f32.mrf.mxu2 }
 0x103   : > { %vm951_vm2 = vweird.f32 %v2182_v52  ;;  %v2242_v36 = vmul.f32 %v854_v27, %v499_v13  ;;  %v1025_v42 = vadd.f32 %v1570_v53, %v1024_v8  ;;  %v738_v59 = vsub.f32 1.0, %v737_v57 }
 0x104   : > { %v868_v40 = vor.u32 1.1754944e-38, %v867_v19  ;;  %v939_v17 = vsel %vm2222_vm15, %v1568_v51, %v935_v31  ;;  %v858_v33 = vsub.f32 1.0, %v857_v11  ;;  %vm862_vm3 = vweird.f32 %v1578_v25 }
 0x105   : > { %v2248_v30 = vadd.f32 1.0, %v1566_v47  ;;  %1172 = vst.msk [vmem:[%s1833_s28 + $0x68] sm:$0xff] %vm1158_vm4, %v2242_v36  ;;  %v944_v49 = vsel %vm2185_vm8, %v943_v56, %v939_v17  ;;  %v1029_v45 = vsel %vm2236_vm1, %v1570_v53, %v1025_v42  ;;  %v739_v54 = vmul.f32 %v1576_v20, %v738_v59  ;;  %vm2269_vm6 = vmor %vm861_vm14, %vm862_vm3 }
 0x106   : > { %v1580_v46 = vpop.eup %1579  ;;  %vm742_vm5 = vweird.f32 %v1576_v20  ;;  %v2257_v51 = vmul.f32 %v944_v49, %v505_v38  ;;  %v1034_v47 = vsel %vm2195_vm9, %v1033_v48, %v1029_v45  ;;  %v859_v58 = vmul.f32 %v1578_v25, %v858_v33 }
 0x107   : > { %v947_v63 = vmul.f32 %v1580_v46, %v2182_v52  ;;  %v2264_v55 = vmul.f32 %v1034_v47, %v511_v44  ;;  %v740_v56 = vadd.f32 %v1576_v20, %v739_v54  ;;  %v957_v2 = vand.u32 2147483648, %v2182_v52  ;;  %vm743_vm7 = vmor %vm741_vm13, %vm742_vm5 }
 0x108   : > { %1581 = vrcp.f32 %v2248_v30  ;;  %1178 = vst.msk [vmem:[%s1833_s28 + $0x98] sm:$0xff] %vm1158_vm4, %v2257_v51  ;;  %v860_v10 = vadd.f32 %v1578_v25, %v859_v58  ;;  %vm952_vm8 = vweird.f32 %v1580_v46  ;;  %v955_v43 = vand.u32 2147483647, %v2182_v52 }
 0x109   : > { %v948_v48 = vsub.f32 1.0, %v947_v63  ;;  %v1198_v28 = vsel %vm1158_vm4, %v2066_v32, 0.0  ;;  %v2286_v41 = vsel %vm1158_vm4, %v2077_v37, 0.0  ;;  %1184 = vst.msk [vmem:[%s1833_s28 + $0xc8] sm:$0xff] %vm1158_vm4, %v2264_v55  ;;  %v744_v19 = vsel %vm743_vm7, %v1576_v20, %v740_v56  ;;  %vm2304_vm10 = vmor %vm951_vm2, %vm952_vm8 }
 0x10a   : > { %vm746_vm9 = vcmp.eq.f32.partialorder %v745_v23, 8.507059e+37  ;;  %v864_v3 = vsel %vm2269_vm6, %v1578_v25, %v860_v10  ;;  %v2295_v29 = vadd.f32 1.0, %v2192_v62  ;;  %v1200_v32 = vsel %vm1158_vm4, %v2159_v39, 0.0  ;;  %v506_v25 = vld [vmem:[%s1797_s25 + $0xa0] sm:$0xff] }
 0x10b   : > { %v749_v13 = vsel %vm746_vm9, %v748_v12, %v744_v19  ;;  %v949_v16 = vmul.f32 %v1580_v46, %v948_v48  ;;  %v869_v8 = vsel %vm2227_vm0, %v868_v40, %v864_v3  ;;  %v958_v23 = vor.u32 1.1754944e-38, %v957_v2  ;;  %v480_v40 = vpop.f32.mrf.mxu3 }
 0x10c   : > { %v1132_v37 = vmul.f32 %v749_v13, %v492_v9  ;;  %v1140_v12 = vmul.f32 %v869_v8, %v500_v14  ;;  %vm956_vm11 = vcmp.eq.f32.partialorder %v955_v43, 8.507059e+37  ;;  %1583 = vrcp.f32 %v2295_v29 }
 0x10d   : > { %v950_v62 = vadd.f32 %v1580_v46, %v949_v16  ;;  %v1199_v57 = vadd.f32 %v1198_v28, %v2152_v34  ;;  %v1045_v24 = vand.u32 2147483647, %v2248_v30  ;;  %v2315_v52 = vadd.f32 1.0, %v2209_v15 }
 0x10e   : > { %v1582_v39 = vpop.eup %1581  ;;  %1165 = vst.msk [vmem:[%s1833_s28 + $0x30] sm:$0xff] %vm1158_vm4, %v1132_v37  ;;  %v1427_v27 = vmul.f32 -1.442695, %v2200_v6  ;;  %v1047_v11 = vand.u32 2147483648, %v2248_v30  ;;  %v1433_v34 = vmul.f32 -1.442695, %v2140_v22  ;;  %vm1041_vm12 = vweird.f32 %v2248_v30 }
 0x10f   : > { %1173 = vst.msk [vmem:[%s1833_s28 + $0x70] sm:$0xff] %vm1158_vm4, %v1140_v12  ;;  %v954_v31 = vsel %vm2304_vm10, %v1580_v46, %v950_v62  ;;  %v1037_v26 = vmul.f32 %v1582_v39, %v2248_v30  ;;  %v1201_v38 = vadd.f32 %v1200_v32, %v1199_v57  ;;  %v2327_v42 = vsel %vm1158_vm4, %v2242_v36, 0.0  ;;  %v459_v36 = vpop.f32.mrf.mxu2  ;;  %v512_v30 = vld [vmem:[%s1797_s25 + $0xd0] sm:$0xff] }
 0x110   : > { %v959_v15 = vsel %vm956_vm11, %v958_v23, %v954_v31  ;;  %vm1042_vm13 = vweird.f32 %v1582_v39  ;;  %1585 = vrcp.f32 %v2315_v52  ;;  %v1202_v17 = vsel %vm1158_vm4, %v1132_v37, 0.0  ;;  %v493_v23 = vld [vmem:[%s1797_s25 + $0x38] sm:$0xff] }
 0x111   : > { %v2330_v6 = vmul.f32 %v959_v15, %v506_v25  ;;  %v1038_v59 = vsub.f32 1.0, %v1037_v26  ;;  %vm2334_vm14 = vcmp.eq.f32.partialorder %v1045_v24, 8.507059e+37  ;;  %1587 = vpow2.f32 %v1427_v27  ;;  %vm2344_vm15 = vmor %vm1041_vm12, %vm1042_vm13 }
 0x112   : > { %v1428_v44 = vmul.f32 -1.442695, %v456_v61  ;;  %v1584_v33 = vpop.eup %1583  ;;  %v1048_v49 = vor.u32 1.1754944e-38, %v1047_v11  ;;  %1589 = vpow2.f32 %v1433_v34  ;;  %v1434_v45 = vmul.f32 -1.442695, %v2190_v60 }
 0x113   : > { %1179 = vst.msk [vmem:[%s1833_s28 + $0xa0] sm:$0xff] %vm1158_vm4, %v2330_v6  ;;  %v1039_v46 = vmul.f32 %v1582_v39, %v1038_v59  ;;  %v752_v47 = vmul.f32 %v1584_v33, %v2295_v29  ;;  %vm756_vm0 = vweird.f32 %v2295_v29  ;;  %v760_v58 = vand.u32 2147483647, %v2295_v29  ;;  %v483_v62 = vpop.f32.mrf.mxu3 }
 0x114   : > { %v762_v63 = vand.u32 2147483648, %v2295_v29  ;;  %v2352_v56 = vadd.f32 %v1202_v17, %v1201_v38  ;;  %v2355_v53 = vsel %vm1158_vm4, %v1140_v12, 0.0  ;;  %v1429_v2 = vmul.f32 -1.442695, %v459_v36 }
 0x115   : > { %v1040_v60 = vadd.f32 %v1582_v39, %v1039_v46  ;;  %v753_v61 = vsub.f32 1.0, %v752_v47  ;;  %vm876_vm1 = vweird.f32 %v2315_v52  ;;  %1591 = vpow2.f32 %v1428_v44 }
 0x116   : > { %v1435_v9 = vmul.f32 -1.442695, %v2262_v0  ;;  %v1586_v10 = vpop.eup %1585  ;;  %v880_v43 = vand.u32 2147483647, %v2315_v52  ;;  %v882_v28 = vand.u32 2147483648, %v2315_v52  ;;  %1593 = vpow2.f32 %v1434_v45 }
 0x117   : > { %v1044_v48 = vsel %vm2344_vm15, %v1582_v39, %v1040_v60  ;;  %v1588_v19 = vpop.eup %1587  ;;  %v754_v13 = vmul.f32 %v1584_v33, %v753_v61  ;;  %vm757_vm2 = vweird.f32 %v1584_v33  ;;  %v872_v3 = vmul.f32 %v1586_v10, %v2315_v52  ;;  %v501_v52 = vld [vmem:[%s1797_s25 + $0x78] sm:$0xff] }
 0x118   : > { %v1049_v14 = vsel %vm2334_vm14, %v1048_v49, %v1044_v48  ;;  %v1590_v0 = vpop.eup %1589  ;;  %vm877_vm3 = vweird.f32 %v1586_v10  ;;  %v2369_v32 = vadd.f32 1.0, %v1588_v19  ;;  %1595 = vpow2.f32 %v1429_v2  ;;  %vm758_vm5 = vmor %vm756_vm0, %vm757_vm2 }
 0x119   : > { %v2367_v16 = vmul.f32 %v1049_v14, %v512_v30  ;;  %v755_v37 = vadd.f32 %v1584_v33, %v754_v13  ;;  %v873_v8 = vsub.f32 1.0, %v872_v3  ;;  %v2371_v20 = vadd.f32 1.0, %v1590_v0  ;;  %vm2385_vm7 = vmor %vm876_vm1, %vm877_vm3 }
 0x11a   : > { %1597 = vpow2.f32 %v1435_v9  ;;  %vm761_vm6 = vcmp.eq.f32.partialorder %v760_v58, 8.507059e+37  ;;  %v763_v12 = vor.u32 1.1754944e-38, %v762_v63  ;;  %v1436_v25 = vmul.f32 -1.442695, %v480_v40 }
 0x11b   : > { %1185 = vst.msk [vmem:[%s1833_s28 + $0xd0] sm:$0xff] %vm1158_vm4, %v2367_v16  ;;  %1599 = vrcp.f32 %v2369_v32  ;;  %v1592_v39 = vpop.eup %1591  ;;  %v759_v57 = vsel %vm758_vm5, %v1584_v33, %v755_v37  ;;  %v874_v24 = vmul.f32 %v1586_v10, %v873_v8  ;;  %v970_v27 = vand.u32 2147483647, %v2369_v32 }
 0x11c   : > { %1601 = vrcp.f32 %v2371_v20  ;;  %v1594_v31 = vpop.eup %1593  ;;  %v764_v26 = vsel %vm761_vm6, %v763_v12, %v759_v57  ;;  %vm2389_vm8 = vcmp.eq.f32.partialorder %v880_v43, 8.507059e+37  ;;  %v883_v34 = vor.u32 1.1754944e-38, %v882_v28  ;;  %v509_v57 = vld [vmem:[%s1797_s25 + $0xb8] sm:$0xff] }
 0x11d   : > { %v972_v38 = vand.u32 2147483648, %v2369_v32  ;;  %v1133_v15 = vmul.f32 %v764_v26, %v493_v23  ;;  %v875_v59 = vadd.f32 %v1586_v10, %v874_v24  ;;  %v1060_v40 = vand.u32 2147483647, %v2371_v20 }
 0x11e   : > { %v2395_v17 = vmul.f32 -1.442695, %v483_v62  ;;  %v1596_v22 = vpop.eup %1595  ;;  %vm966_vm9 = vweird.f32 %v2369_v32  ;;  %v1062_v44 = vand.u32 2147483648, %v2371_v20  ;;  %v2400_v36 = vadd.f32 1.0, %v1592_v39 }
 0x11f   : > { %1603 = vpow2.f32 %v1436_v25  ;;  %1166 = vst.msk [vmem:[%s1833_s28 + $0x38] sm:$0xff] %vm1158_vm4, %v1133_v15  ;;  %v1204_v46 = vsel %vm1158_vm4, %v1133_v15, 0.0  ;;  %v879_v49 = vsel %vm2385_vm7, %v1586_v10, %v875_v59  ;;  %vm2407_vm10 = vcmp.eq.f32.partialorder %v970_v27, 8.507059e+37 }
 0x120   : > { %v1598_v33 = vpop.eup %1597  ;;  %vm1056_vm11 = vweird.f32 %v2371_v20  ;;  %v2412_v54 = vadd.f32 1.0, %v1594_v31  ;;  %v1205_v58 = vadd.f32 %v1204_v46, %v2352_v56  ;;  %v884_v63 = vsel %vm2389_vm8, %v883_v34, %v879_v49  ;;  %v507_v31 = vld [vmem:[%s1797_s25 + $0xa8] sm:$0xff]  ;;  %v513_v34 = vld [vmem:[%s1797_s25 + $0xd8] sm:$0xff] }
 0x121   : > { %v1600_v47 = vpop.eup %1599  ;;  %v973_v60 = vor.u32 1.1754944e-38, %v972_v38  ;;  %1605 = vrcp.f32 %v2400_v36  ;;  %v1141_v30 = vmul.f32 %v884_v63, %v501_v52  ;;  %vm2419_vm12 = vcmp.eq.f32.partialorder %v1060_v40, 8.507059e+37 }
 0x122   : > { %v1602_v2 = vpop.eup %1601  ;;  %v962_v61 = vmul.f32 %v1600_v47, %v2369_v32  ;;  %v2423_v10 = vadd.f32 1.0, %v1596_v22  ;;  %v1207_v48 = vadd.f32 %v2109_v4, %v1205_v58  ;;  %v1063_v43 = vor.u32 1.1754944e-38, %v1062_v44 }
 0x123   : > { %v1052_v56 = vmul.f32 %v1602_v2, %v2371_v20  ;;  %v987_v28 = vand.u32 2147483648, %v2400_v36  ;;  %1174 = vst.msk [vmem:[%s1833_s28 + $0x78] sm:$0xff] %vm1158_vm4, %v1141_v30  ;;  %vm967_vm13 = vweird.f32 %v1600_v47  ;;  %1607 = vrcp.f32 %v2412_v54 }
 0x124   : > { %v963_v19 = vsub.f32 1.0, %v962_v61  ;;  %v2431_v14 = vadd.f32 1.0, %v1598_v33  ;;  %v1209_v3 = vadd.f32 %v2113_v5, %v1207_v48  ;;  %vm1057_vm14 = vweird.f32 %v1602_v2  ;;  %vm2443_vm0 = vmor %vm966_vm9, %vm967_vm13 }
 0x125   : > { %v2433_v13 = vpop.eup %1603  ;;  %v1053_v0 = vsub.f32 1.0, %v1052_v56  ;;  %vm981_vm15 = vweird.f32 %v2400_v36  ;;  %v1220_v4 = vsel %vm1158_vm4, %v1141_v30, 0.0  ;;  %v985_v8 = vand.u32 2147483647, %v2400_v36  ;;  %vm2450_vm2 = vmor %vm1056_vm11, %vm1057_vm14 }
 0x126   : > { %v964_v37 = vmul.f32 %v1600_v47, %v963_v19  ;;  %1609 = vrcp.f32 %v2423_v10  ;;  %v1211_v12 = vadd.f32 %v2127_v18, %v1209_v3  ;;  %v988_v62 = vor.u32 1.1754944e-38, %v987_v28 }
 0x127   : > { %v1606_v23 = vpop.eup %1605  ;;  %v1054_v5 = vmul.f32 %v1602_v2, %v1053_v0  ;;  %vm1071_vm1 = vweird.f32 %v2412_v54  ;;  %v1075_v32 = vand.u32 2147483647, %v2412_v54  ;;  %v1077_v24 = vand.u32 2147483648, %v2412_v54 }
 0x128   : > { %v965_v39 = vadd.f32 %v1600_v47, %v964_v37  ;;  %v977_v18 = vmul.f32 %v1606_v23, %v2400_v36  ;;  %v1213_v27 = vadd.f32 %v2156_v35, %v1211_v12  ;;  %vm982_vm3 = vweird.f32 %v1606_v23 }
 0x129   : > { %v1055_v26 = vadd.f32 %v1602_v2, %v1054_v5  ;;  %v1000_v29 = vand.u32 2147483647, %v2423_v10  ;;  %v1608_v11 = vpop.eup %1607  ;;  %v1002_v15 = vand.u32 2147483648, %v2423_v10  ;;  %1611 = vrcp.f32 %v2431_v14  ;;  %vm2481_vm6 = vmor %vm981_vm15, %vm982_vm3 }
 0x12a   : > { %v969_v20 = vsel %vm2443_vm0, %v1600_v47, %v965_v39  ;;  %v978_v38 = vsub.f32 1.0, %v977_v18  ;;  %v1215_v59 = vadd.f32 %v2286_v41, %v1213_v27  ;;  %v1067_v22 = vmul.f32 %v1608_v11, %v2412_v54  ;;  %v514_v54 = vld [vmem:[%s1797_s25 + $0xe0] sm:$0xff] }
 0x12b   : > { %v974_v35 = vsel %vm2407_vm10, %v973_v60, %v969_v20  ;;  %v1059_v40 = vsel %vm2450_vm2, %v1602_v2, %v1055_v26  ;;  %vm1072_vm5 = vweird.f32 %v1608_v11  ;;  %vm2489_vm7 = vcmp.eq.f32.partialorder %v985_v8, 8.507059e+37  ;;  %v508_v2 = vld [vmem:[%s1797_s25 + $0xb0] sm:$0xff] }
 0x12c   : > { %v1610_v52 = vpop.eup %1609  ;;  %v2471_v44 = vmul.f32 %v974_v35, %v507_v31  ;;  %v1064_v33 = vsel %vm2419_vm12, %v1063_v43, %v1059_v40  ;;  %v979_v46 = vmul.f32 %v1606_v23, %v978_v38  ;;  %v1217_v41 = vadd.f32 %v2327_v42, %v1215_v59  ;;  %vm2508_vm11 = vmor %vm1071_vm1, %vm1072_vm5 }
 0x12d   : > { %v2476_v49 = vmul.f32 %v1064_v33, %v513_v34  ;;  %v1068_v47 = vsub.f32 1.0, %v1067_v22  ;;  %v992_v58 = vmul.f32 %v1610_v52, %v2423_v10  ;;  %vm2493_vm8 = vcmp.eq.f32.partialorder %v1075_v32, 8.507059e+37  ;;  %v515_v34 = vld [vmem:[%s1797_s25 + $0xe8] sm:$0xff] }
 0x12e   : > { %1180 = vst.msk [vmem:[%s1833_s28 + $0xa8] sm:$0xff] %vm1158_vm4, %v2471_v44  ;;  %v980_v63 = vadd.f32 %v1606_v23, %v979_v46  ;;  %vm996_vm9 = vweird.f32 %v2423_v10  ;;  %v1219_v36 = vadd.f32 %v2355_v53, %v1217_v41  ;;  %vm997_vm10 = vweird.f32 %v1610_v52 }
 0x12f   : > { %1186 = vst.msk [vmem:[%s1833_s28 + $0xd8] sm:$0xff] %vm1158_vm4, %v2476_v49  ;;  %v1069_v30 = vmul.f32 %v1608_v11, %v1068_v47  ;;  %v993_v61 = vsub.f32 1.0, %v992_v58  ;;  %v1612_v9 = vpop.eup %1611  ;;  %v1078_v53 = vor.u32 1.1754944e-38, %v1077_v24  ;;  %vm2512_vm12 = vcmp.eq.f32.partialorder %v1000_v29, 8.507059e+37  ;;  %vm2521_vm13 = vmor %vm996_vm9, %vm997_vm10 }
 0x130   : > { %v984_v48 = vsel %vm2481_vm6, %v1606_v23, %v980_v63  ;;  %v1003_v28 = vor.u32 1.1754944e-38, %v1002_v15  ;;  %v1221_v19 = vadd.f32 %v1220_v4, %v1219_v36  ;;  %v1082_v12 = vmul.f32 %v1612_v9, %v2431_v14 }
 0x131   : > { %v989_v3 = vsel %vm2489_vm7, %v988_v62, %v984_v48  ;;  %v1070_v0 = vadd.f32 %v1608_v11, %v1069_v30  ;;  %v994_v37 = vmul.f32 %v1610_v52, %v993_v61  ;;  %vm1086_vm14 = vweird.f32 %v2431_v14  ;;  %v516_v48 = vld [vmem:[%s1797_s25 + $0xf0] sm:$0xff] }
 0x132   : > { %v1148_v8 = vmul.f32 %v989_v3, %v508_v2  ;;  %v1090_v4 = vand.u32 2147483647, %v2431_v14  ;;  %v1223_v25 = vadd.f32 %v2117_v7, %v1221_v19  ;;  %v1092_v39 = vand.u32 2147483648, %v2431_v14 }
 0x133   : > { %v1074_v5 = vsel %vm2508_vm11, %v1608_v11, %v1070_v0  ;;  %v995_v62 = vadd.f32 %v1610_v52, %v994_v37  ;;  %v1083_v18 = vsub.f32 1.0, %v1082_v12  ;;  %vm1087_vm15 = vweird.f32 %v1612_v9 }
 0x134   : > { %1181 = vst.msk [vmem:[%s1833_s28 + $0xb0] sm:$0xff] %vm1158_vm4, %v1148_v8  ;;  %v1079_v10 = vsel %vm2493_vm8, %v1078_v53, %v1074_v5  ;;  %v644_v32 = vadd.f32 1.0, %v2433_v13  ;;  %v1225_v24 = vadd.f32 %v2136_v21, %v1223_v25  ;;  %1613 = vpow2.f32 %v2395_v17  ;;  %vm1088_vm0 = vmor %vm1086_vm14, %vm1087_vm15 }
 0x135   : > { %v2539_v7 = vmul.f32 %v1079_v10, %v514_v54  ;;  %v999_v27 = vsel %vm2521_vm13, %v1610_v52, %v995_v62  ;;  %v1226_v31 = vsel %vm1158_vm4, %v2094_v50, 0.0  ;;  %v1084_v29 = vmul.f32 %v1612_v9, %v1083_v18  ;;  %v517_v10 = vld [vmem:[%s1797_s25 + $0xf8] sm:$0xff] }
 0x136   : > { %v1004_v26 = vsel %vm2512_vm12, %v1003_v28, %v999_v27  ;;  %1615 = vrcp.f32 %v644_v32  ;;  %v1227_v13 = vadd.f32 %v1226_v31, %v1225_v24  ;;  %v1093_v11 = vor.u32 1.1754944e-38, %v1092_v39 }
 0x137   : > { %1187 = vst.msk [vmem:[%s1833_s28 + $0xe0] sm:$0xff] %vm1158_vm4, %v2539_v7  ;;  %v1149_v21 = vmul.f32 %v1004_v26, %v509_v57  ;;  %v1228_v17 = vsel %vm1158_vm4, %v2257_v51, 0.0  ;;  %v1085_v20 = vadd.f32 %v1612_v9, %v1084_v29  ;;  %vm1091_vm1 = vcmp.eq.f32.partialorder %v1090_v4, 8.507059e+37 }
 0x138   : > { %v1229_v50 = vadd.f32 %v1228_v17, %v1227_v13  ;;  %v1230_v38 = vsel %vm1158_vm4, %v2330_v6, 0.0  ;;  %v1232_v22 = vsel %vm1158_vm4, %v2471_v44, 0.0  ;;  %v1234_v41 = vsel %vm1158_vm4, %v1148_v8, 0.0 }
 0x139   : > { %1182 = vst.msk [vmem:[%s1833_s28 + $0xb8] sm:$0xff] %vm1158_vm4, %v1149_v21  ;;  %v1089_v15 = vsel %vm1088_vm0, %v1612_v9, %v1085_v20  ;;  %vm1101_vm2 = vweird.f32 %v644_v32  ;;  %v1107_v45 = vand.u32 2147483648, %v644_v32  ;;  %v1105_v58 = vand.u32 2147483647, %v644_v32 }
 0x13a   : > { %v1614_v59 = vpop.eup %1613  ;;  %v1231_v35 = vadd.f32 %v1230_v38, %v1229_v50  ;;  %v1094_v40 = vsel %vm1091_vm1, %v1093_v11, %v1089_v15  ;;  %v1236_v63 = vsel %vm1158_vm4, %v1149_v21, 0.0  ;;  %v1238_v42 = vsel %vm1158_vm4, %v2119_v1, 0.0 }
 0x13b   : > { %v1155_v52 = vmul.f32 %v1094_v40, %v515_v34  ;;  %v645_v51 = vadd.f32 1.0, %v1614_v59  ;;  %v1108_v36 = vor.u32 1.1754944e-38, %v1107_v45  ;;  %vm1106_vm6 = vcmp.eq.f32.partialorder %v1105_v58, 8.507059e+37 }
 0x13c   : > { %v1616_v14 = vpop.eup %1615  ;;  %v1233_v33 = vadd.f32 %v1232_v22, %v1231_v35  ;;  %v1240_v9 = vsel %vm1158_vm4, %v2264_v55, 0.0  ;;  %v1629_v56 = vmov 256.0   ;;  %v1242_v53 = vsel %vm1158_vm4, %v2367_v16, 0.0 }
 0x13d   : > { %v1097_v46 = vmul.f32 %v1616_v14, %v644_v32  ;;  %1188 = vst.msk [vmem:[%s1833_s28 + $0xe8] sm:$0xff] %vm1158_vm4, %v1155_v52  ;;  %1617 = vrcp.f32 %v645_v51  ;;  %vm1102_vm3 = vweird.f32 %v1616_v14  ;;  %vm1116_vm7 = vweird.f32 %v645_v51 }
 0x13e   : > { %v1235_v6 = vadd.f32 %v1234_v41, %v1233_v33  ;;  %vm1103_vm5 = vmor %vm1101_vm2, %vm1102_vm3  ;;  %1619 = vrcp.f32 %v1629_v56  ;;  %v1120_v3 = vand.u32 2147483647, %v645_v51  ;;  %v1122_v0 = vand.u32 2147483648, %v645_v51 }
 0x13f   : > { %v1098_v47 = vsub.f32 1.0, %v1097_v46  ;;  %v1244_v55 = vsel %vm1158_vm4, %v2476_v49, 0.0  ;;  %v1246_v4 = vsel %vm1158_vm4, %v2539_v7, 0.0  ;;  %v1248_v39 = vsel %vm1158_vm4, %v1155_v52, 0.0 }
 0x140   : > { %v1237_v60 = vadd.f32 %v1236_v63, %v1235_v6  ;;  %v1123_v25 = vor.u32 1.1754944e-38, %v1122_v0  ;;  %vm1121_vm10 = vcmp.eq.f32.partialorder %v1120_v3, 8.507059e+37  ;;  %vm1268_vm12 = vcmask 24576  }
 0x141   : > { %v1099_v44 = vmul.f32 %v1616_v14, %v1098_v47 }
 0x142   : > { %v1239_v2 = vadd.f32 %v1238_v42, %v1237_v60 }
 0x143   : > { %v1100_v30 = vadd.f32 %v1616_v14, %v1099_v44  ;;  %v1618_v61 = vpop.eup %1617 }
 0x144   : > { %v1241_v43 = vadd.f32 %v1240_v9, %v1239_v2  ;;  %v1112_v19 = vmul.f32 %v1618_v61, %v645_v51  ;;  %vm1117_vm8 = vweird.f32 %v1618_v61  ;;  %v1620_v16 = vpop.eup %1619 }
 0x145   : > { %v1104_v28 = vsel %vm1103_vm5, %v1616_v14, %v1100_v30  ;;  %vm1118_vm9 = vmor %vm1116_vm7, %vm1117_vm8  ;;  %v1261_v49 = vmul.f32 256.0, %v1620_v16  ;;  %vm1265_vm11 = vweird.f32 %v1620_v16 }
 0x146   : > { %v1109_v1 = vsel %vm1106_vm6, %v1108_v36, %v1104_v28  ;;  %v1243_v37 = vadd.f32 %v1242_v53, %v1241_v43  ;;  %v1113_v54 = vsub.f32 1.0, %v1112_v19 }
 0x147   : > { %v1156_v8 = vmul.f32 %v1109_v1, %v516_v48  ;;  %v1262_v26 = vsub.f32 1.0, %v1261_v49 }
 0x148   : > { %v1245_v23 = vadd.f32 %v1244_v55, %v1243_v37  ;;  %v1114_v12 = vmul.f32 %v1618_v61, %v1113_v54 }
 0x149   : > { %1189 = vst.msk [vmem:[%s1833_s28 + $0xf0] sm:$0xff] %vm1158_vm4, %v1156_v8  ;;  %v1250_v32 = vsel %vm1158_vm4, %v1156_v8, 0.0  ;;  %v1263_v21 = vmul.f32 %v1620_v16, %v1262_v26 }
 0x14a   : > { %v1247_v5 = vadd.f32 %v1246_v4, %v1245_v23  ;;  %v1115_v62 = vadd.f32 %v1618_v61, %v1114_v12 }
 0x14b   : > { %v1264_v20 = vadd.f32 %v1620_v16, %v1263_v21 }
 0x14c   : > { %v1249_v57 = vadd.f32 %v1248_v39, %v1247_v5  ;;  %v1119_v18 = vsel %vm1118_vm9, %v1618_v61, %v1115_v62 }
 0x14d   : > { %v1124_v24 = vsel %vm1121_vm10, %v1123_v25, %v1119_v18  ;;  %v1266_v38 = vsel %vm1265_vm11, %v1620_v16, %v1264_v20 }
 0x14e   : > { %v1251_v27 = vadd.f32 %v1250_v32, %v1249_v57  ;;  %v1157_v31 = vmul.f32 %v1124_v24, %v517_v10 }
 0x150   : > { %1190 = vst.msk [vmem:[%s1833_s28 + $0xf8] sm:$0xff] %vm1158_vm4, %v1157_v31  ;;  %v1252_v7 = vsel %vm1158_vm4, %v1157_v31, 0.0 }
 0x151   : > { %v1253_v29 = vadd.f32 %v1252_v7, %v1251_v27 }
 0x153   : > { %v1254_v13 = vrot.slane %v1253_v29, 4 }
 0x155   : > { %v1255_v11 = vadd.f32 %v1254_v13, %v1253_v29 }
 0x157   : > { %v1256_v17 = vrot.slane %v1255_v11, 2 }
 0x159   : > { %v1257_v50 = vadd.f32 %v1256_v17, %v1255_v11 }
 0x15b   : > { %v1258_v34 = vrot.slane %v1257_v50, 1 }
 0x15d   : > { %v1259_v15 = vadd.f32 %v1258_v34, %v1257_v50 }
 0x15f   : > { %v1267_v59 = vmul.f32 %v1266_v38, %v1259_v15 }
 0x161   : > { %1269 = vst.msk [vmem:[%s226_s5] sm:$0x1] %vm1268_vm12, %v1267_v59 }
 0x162 PF: > { %s15_s15 = sadd.s32 1, %s1627_s15  }
 0x163   : > { %p12_p4 = scmp.ge.s32.totalorder %s15_s15, 4  }
 0x165   :  { %14 = sbr.rel (!%p12_p4) target bundleno = 1 (0x1), region = 77 }

// kernel: resblock_cbam_forward.9
= control target key start
LH: loop header
LB: loop body
LE: loop exit
PB: predicated region body
PF: predicated region fallthrough
CT: control target
= control target key end

     0   :  { %s531_s12 = smov 0   ;;  %s722_s0 = inlined_call_operand.vmem [shape: f32[2,256,4], index: 0, kind: input, shape index: {}]   ;;  %s723_s1 = inlined_call_operand.vmem [shape: f32[2,1,4], index: 1, kind: input, shape index: {}]   ;;  %s724_s2 = inlined_call_operand.vmem [shape: f32[2,256,4], index: 2, kind: input, shape index: {}]   ;;  %s725_s3 = inlined_call_operand.vmem [shape: f32[2,256,4], index: 3, kind: output, shape index: {}]  }
   0x1 LB: > { %s478_s13 = sadd.s32 4294967295, %s509_s12   ;;  %p482_p0 = scmp.ge.s32.totalorder %s509_s12, 1  ;;  %s509_s12 = sphi %s531_s12, %s13_s12  }
   0x2   : > { %p155_p1 = scmp.lt.s32.totalorder %s509_s12, 3 }
   0x4   : > { %p156_p2 = pnand %p482_p0, %p155_p1 }
   0x5   : > { %p187_p3 = scmp.lt.s32.totalorder (!%p156_p2), %s478_s13, 1 }
   0x6   : > { %159 = sbr.rel (%p156_p2) target bundleno = 53 (0x35), region = 32 }
   0xb   : > { %s727_s13 = smov (!%p187_p3, %s478_s13), 1  ;;  %vm369_vm0 = vcmask 31744  }
   0xc   : > { %s491_s14 = sshll.u32 %s727_s13, 8  ;;  %s194_s17 = scalar_lea.vmem %s723_s1, %s727_s13 }
   0xd   : > { %s545_s20 = scalar_lea.vmem %s722_s0, %s491_s14  ;;  %s550_s23 = scalar_lea.vmem %s724_s2, %s491_s14  ;;  %v552_v0 = vld [vmem:[%s194_s17] ss:$0 sm:$0xff] }
   0xe   : > { %v205_v1 = vld [vmem:[%s545_s20] sm:$0xff]  ;;  %v206_v3 = vld [vmem:[%s545_s20 + $0x8] sm:$0xff]  ;;  %v207_v7 = vld [vmem:[%s545_s20 + $0x10] sm:$0xff]  ;;  %s574_s26 = scalar_lea.vmem %s725_s3, %s491_s14 }
   0xf   : > { %v273_v2 = vld [vmem:[%s550_s23] sm:$0xff]  ;;  %v241_v4 = vmul.f32 %v552_v0, %v205_v1  ;;  %v242_v5 = vmul.f32 %v552_v0, %v206_v3  ;;  %v274_v6 = vld [vmem:[%s550_s23 + $0x8] sm:$0xff]  ;;  %v275_v8 = vld [vmem:[%s550_s23 + $0x10] sm:$0xff]  ;;  %v243_v9 = vmul.f32 %v552_v0, %v207_v7 }
  0x10   : > { %v208_v10 = vld [vmem:[%s545_s20 + $0x18] sm:$0xff]  ;;  %v209_v12 = vld [vmem:[%s545_s20 + $0x20] sm:$0xff]  ;;  %v210_v18 = vld [vmem:[%s545_s20 + $0x28] sm:$0xff] }
  0x11   : > { %v276_v11 = vld [vmem:[%s550_s23 + $0x18] sm:$0xff]  ;;  %v305_v13 = vadd.f32 %v273_v2, %v241_v4  ;;  %v306_v14 = vadd.f32 %v274_v6, %v242_v5  ;;  %v244_v15 = vmul.f32 %v552_v0, %v208_v10  ;;  %v245_v16 = vmul.f32 %v552_v0, %v209_v12  ;;  %v277_v17 = vld [vmem:[%s550_s23 + $0x20] sm:$0xff]  ;;  %v278_v19 = vld [vmem:[%s550_s23 + $0x28] sm:$0xff] }
  0x12   : > { %v307_v20 = vadd.f32 %v275_v8, %v243_v9  ;;  %v246_v21 = vmul.f32 %v552_v0, %v210_v18  ;;  %v211_v22 = vld [vmem:[%s545_s20 + $0x30] sm:$0xff]  ;;  %v212_v24 = vld [vmem:[%s545_s20 + $0x38] sm:$0xff]  ;;  %v213_v30 = vld [vmem:[%s545_s20 + $0x40] sm:$0xff] }
  0x13   : > { %v279_v23 = vld [vmem:[%s550_s23 + $0x30] sm:$0xff]  ;;  %v337_v25 = vmax.f32 %v305_v13, 0.0  ;;  %v338_v26 = vmax.f32 %v306_v14, 0.0  ;;  %v308_v27 = vadd.f32 %v276_v11, %v244_v15  ;;  %v309_v28 = vadd.f32 %v277_v17, %v245_v16  ;;  %v280_v29 = vld [vmem:[%s550_s23 + $0x38] sm:$0xff]  ;;  %v281_v31 = vld [vmem:[%s550_s23 + $0x40] sm:$0xff] }
  0x14   : > { %v339_v32 = vmax.f32 %v307_v20, 0.0  ;;  %v310_v33 = vadd.f32 %v278_v19, %v246_v21  ;;  %v247_v34 = vmul.f32 %v552_v0, %v211_v22  ;;  %v248_v35 = vmul.f32 %v552_v0, %v212_v24  ;;  %v214_v36 = vld [vmem:[%s545_s20 + $0x48] sm:$0xff]  ;;  %v215_v38 = vld [vmem:[%s545_s20 + $0x50] sm:$0xff]  ;;  %v216_v44 = vld [vmem:[%s545_s20 + $0x58] sm:$0xff] }
  0x15   : > { %v282_v37 = vld [vmem:[%s550_s23 + $0x48] sm:$0xff]  ;;  %370 = vst.msk [vmem:[%s574_s26] sm:$0xff] %vm369_vm0, %v337_v25  ;;  %v340_v39 = vmax.f32 %v308_v27, 0.0  ;;  %v341_v40 = vmax.f32 %v309_v28, 0.0  ;;  %v249_v41 = vmul.f32 %v552_v0, %v213_v30  ;;  %v250_v42 = vmul.f32 %v552_v0, %v214_v36  ;;  %v283_v43 = vld [vmem:[%s550_s23 + $0x50] sm:$0xff]  ;;  %v284_v45 = vld [vmem:[%s550_s23 + $0x58] sm:$0xff] }
  0x16   : > { %371 = vst.msk [vmem:[%s574_s26 + $0x8] sm:$0xff] %vm369_vm0, %v338_v26  ;;  %v342_v46 = vmax.f32 %v310_v33, 0.0  ;;  %v311_v47 = vadd.f32 %v279_v23, %v247_v34  ;;  %v312_v48 = vadd.f32 %v280_v29, %v248_v35  ;;  %v251_v49 = vmul.f32 %v552_v0, %v215_v38  ;;  %v217_v50 = vld [vmem:[%s545_s20 + $0x60] sm:$0xff]  ;;  %v218_v52 = vld [vmem:[%s545_s20 + $0x68] sm:$0xff]  ;;  %v219_v58 = vld [vmem:[%s545_s20 + $0x70] sm:$0xff] }
  0x17   : > { %v285_v51 = vld [vmem:[%s550_s23 + $0x60] sm:$0xff]  ;;  %372 = vst.msk [vmem:[%s574_s26 + $0x10] sm:$0xff] %vm369_vm0, %v339_v32  ;;  %v313_v53 = vadd.f32 %v281_v31, %v249_v41  ;;  %v314_v54 = vadd.f32 %v282_v37, %v250_v42  ;;  %v252_v55 = vmul.f32 %v552_v0, %v216_v44  ;;  %v253_v56 = vmul.f32 %v552_v0, %v217_v50  ;;  %v286_v57 = vld [vmem:[%s550_s23 + $0x68] sm:$0xff]  ;;  %v220_v63 = vld [vmem:[%s545_s20 + $0x78] sm:$0xff] }
  0x18   : > { %373 = vst.msk [vmem:[%s574_s26 + $0x18] sm:$0xff] %vm369_vm0, %v340_v39  ;;  %v343_v59 = vmax.f32 %v311_v47, 0.0  ;;  %v344_v60 = vmax.f32 %v312_v48, 0.0  ;;  %v315_v61 = vadd.f32 %v283_v43, %v251_v49  ;;  %v254_v62 = vmul.f32 %v552_v0, %v218_v52  ;;  %v221_v1 = vld [vmem:[%s545_s20 + $0x80] sm:$0xff]  ;;  %v287_v5 = vld [vmem:[%s550_s23 + $0x70] sm:$0xff]  ;;  %v288_v6 = vld [vmem:[%s550_s23 + $0x78] sm:$0xff] }
  0x19   : > { %374 = vst.msk [vmem:[%s574_s26 + $0x20] sm:$0xff] %vm369_vm0, %v341_v40  ;;  %v345_v2 = vmax.f32 %v313_v53, 0.0  ;;  %v316_v3 = vadd.f32 %v284_v45, %v252_v55  ;;  %v317_v4 = vadd.f32 %v285_v51, %v253_v56  ;;  %v222_v7 = vld [vmem:[%s545_s20 + $0x88] sm:$0xff]  ;;  %v346_v8 = vmax.f32 %v314_v54, 0.0  ;;  %v289_v12 = vld [vmem:[%s550_s23 + $0x80] sm:$0xff]  ;;  %v223_v13 = vld [vmem:[%s545_s20 + $0x90] sm:$0xff] }
  0x1a   : > { %375 = vst.msk [vmem:[%s574_s26 + $0x28] sm:$0xff] %vm369_vm0, %v342_v46  ;;  %v318_v9 = vadd.f32 %v286_v57, %v254_v62  ;;  %v255_v10 = vmul.f32 %v552_v0, %v219_v58  ;;  %v256_v11 = vmul.f32 %v552_v0, %v220_v63  ;;  %v224_v14 = vld [vmem:[%s545_s20 + $0x98] sm:$0xff]  ;;  %v347_v15 = vmax.f32 %v315_v61, 0.0  ;;  %v290_v18 = vld [vmem:[%s550_s23 + $0x88] sm:$0xff]  ;;  %v225_v19 = vld [vmem:[%s545_s20 + $0xa0] sm:$0xff] }
  0x1b   : > { %376 = vst.msk [vmem:[%s574_s26 + $0x30] sm:$0xff] %vm369_vm0, %v343_v59  ;;  %v257_v16 = vmul.f32 %v552_v0, %v221_v1  ;;  %v258_v17 = vmul.f32 %v552_v0, %v222_v7  ;;  %v348_v20 = vmax.f32 %v316_v3, 0.0  ;;  %v259_v23 = vmul.f32 %v552_v0, %v223_v13  ;;  %v291_v24 = vld [vmem:[%s550_s23 + $0x90] sm:$0xff]  ;;  %v226_v25 = vld [vmem:[%s545_s20 + $0xa8] sm:$0xff]  ;;  %v292_v29 = vld [vmem:[%s550_s23 + $0x98] sm:$0xff] }
  0x1c   : > { %377 = vst.msk [vmem:[%s574_s26 + $0x38] sm:$0xff] %vm369_vm0, %v344_v60  ;;  %v319_v21 = vadd.f32 %v287_v5, %v255_v10  ;;  %v320_v22 = vadd.f32 %v288_v6, %v256_v11  ;;  %v349_v26 = vmax.f32 %v317_v4, 0.0  ;;  %v260_v28 = vmul.f32 %v552_v0, %v224_v14  ;;  %v227_v31 = vld [vmem:[%s545_s20 + $0xb0] sm:$0xff]  ;;  %v228_v32 = vld [vmem:[%s545_s20 + $0xb8] sm:$0xff]  ;;  %v293_v35 = vld [vmem:[%s550_s23 + $0xa0] sm:$0xff] }
  0x1d   : > { %378 = vst.msk [vmem:[%s574_s26 + $0x40] sm:$0xff] %vm369_vm0, %v345_v2  ;;  %v321_v27 = vadd.f32 %v289_v12, %v257_v16  ;;  %v261_v30 = vmul.f32 %v552_v0, %v225_v19  ;;  %v350_v33 = vmax.f32 %v318_v9, 0.0  ;;  %v322_v34 = vadd.f32 %v290_v18, %v258_v17  ;;  %v229_v37 = vld [vmem:[%s545_s20 + $0xc0] sm:$0xff]  ;;  %v294_v40 = vld [vmem:[%s550_s23 + $0xa8] sm:$0xff]  ;;  %v295_v45 = vld [vmem:[%s550_s23 + $0xb0] sm:$0xff] }
  0x1e   : > { %379 = vst.msk [vmem:[%s574_s26 + $0x48] sm:$0xff] %vm369_vm0, %v346_v8  ;;  %v262_v36 = vmul.f32 %v552_v0, %v226_v25  ;;  %v351_v38 = vmax.f32 %v319_v21, 0.0  ;;  %v323_v39 = vadd.f32 %v291_v24, %v259_v23  ;;  %v230_v41 = vld [vmem:[%s545_s20 + $0xc8] sm:$0xff]  ;;  %v352_v42 = vmax.f32 %v320_v22, 0.0  ;;  %v231_v47 = vld [vmem:[%s545_s20 + $0xd0] sm:$0xff]  ;;  %v296_v50 = vld [vmem:[%s550_s23 + $0xb8] sm:$0xff] }
  0x1f   : > { %380 = vst.msk [vmem:[%s574_s26 + $0x50] sm:$0xff] %vm369_vm0, %v347_v15  ;;  %v324_v43 = vadd.f32 %v292_v29, %v260_v28  ;;  %v263_v44 = vmul.f32 %v552_v0, %v227_v31  ;;  %v264_v46 = vmul.f32 %v552_v0, %v228_v32  ;;  %v353_v48 = vmax.f32 %v321_v27, 0.0  ;;  %v232_v52 = vld [vmem:[%s545_s20 + $0xd8] sm:$0xff]  ;;  %v297_v55 = vld [vmem:[%s550_s23 + $0xc0] sm:$0xff]  ;;  %v298_v60 = vld [vmem:[%s550_s23 + $0xc8] sm:$0xff] }
  0x20   : > { %381 = vst.msk [vmem:[%s574_s26 + $0x58] sm:$0xff] %vm369_vm0, %v348_v20  ;;  %v325_v49 = vadd.f32 %v293_v35, %v261_v30  ;;  %v265_v51 = vmul.f32 %v552_v0, %v229_v37  ;;  %v354_v53 = vmax.f32 %v322_v34, 0.0  ;;  %v326_v54 = vadd.f32 %v294_v40, %v262_v36  ;;  %v233_v57 = vld [vmem:[%s545_s20 + $0xe0] sm:$0xff]  ;;  %v234_v62 = vld [vmem:[%s545_s20 + $0xe8] sm:$0xff]  ;;  %v299_v2 = vld [vmem:[%s550_s23 + $0xd0] sm:$0xff] }
  0x21   : > { %382 = vst.msk [vmem:[%s574_s26 + $0x60] sm:$0xff] %vm369_vm0, %v349_v26  ;;  %v266_v56 = vmul.f32 %v552_v0, %v230_v41  ;;  %v355_v58 = vmax.f32 %v323_v39, 0.0  ;;  %v327_v59 = vadd.f32 %v295_v45, %v263_v44  ;;  %v267_v61 = vmul.f32 %v552_v0, %v231_v47  ;;  %v235_v4 = vld [vmem:[%s545_s20 + $0xf0] sm:$0xff]  ;;  %v300_v7 = vld [vmem:[%s550_s23 + $0xd8] sm:$0xff]  ;;  %v301_v12 = vld [vmem:[%s550_s23 + $0xe0] sm:$0xff] }
  0x22   : > { %383 = vst.msk [vmem:[%s574_s26 + $0x68] sm:$0xff] %vm369_vm0, %v350_v33  ;;  %v356_v63 = vmax.f32 %v324_v43, 0.0  ;;  %v328_v1 = vadd.f32 %v296_v50, %v264_v46  ;;  %v268_v3 = vmul.f32 %v552_v0, %v232_v52  ;;  %v357_v5 = vmax.f32 %v325_v49, 0.0  ;;  %v236_v9 = vld [vmem:[%s545_s20 + $0xf8] sm:$0xff]  ;;  %v302_v16 = vld [vmem:[%s550_s23 + $0xe8] sm:$0xff]  ;;  %v303_v20 = vld [vmem:[%s550_s23 + $0xf0] sm:$0xff] }
  0x23   : > { %384 = vst.msk [vmem:[%s574_s26 + $0x70] sm:$0xff] %vm369_vm0, %v351_v38  ;;  %v329_v6 = vadd.f32 %v297_v55, %v265_v51  ;;  %v269_v8 = vmul.f32 %v552_v0, %v233_v57  ;;  %v358_v10 = vmax.f32 %v326_v54, 0.0  ;;  %v330_v11 = vadd.f32 %v298_v60, %v266_v56  ;;  %v304_v24 = vld [vmem:[%s550_s23 + $0xf8] sm:$0xff] }
  0x24   : > { %385 = vst.msk [vmem:[%s574_s26 + $0x78] sm:$0xff] %vm369_vm0, %v352_v42  ;;  %v270_v13 = vmul.f32 %v552_v0, %v234_v62  ;;  %v359_v14 = vmax.f32 %v327_v59, 0.0  ;;  %v331_v15 = vadd.f32 %v299_v2, %v267_v61  ;;  %v271_v17 = vmul.f32 %v552_v0, %v235_v4 }
  0x25   : > { %386 = vst.msk [vmem:[%s574_s26 + $0x80] sm:$0xff] %vm369_vm0, %v353_v48  ;;  %v360_v18 = vmax.f32 %v328_v1, 0.0  ;;  %v332_v19 = vadd.f32 %v300_v7, %v268_v3  ;;  %v272_v21 = vmul.f32 %v552_v0, %v236_v9  ;;  %v361_v22 = vmax.f32 %v329_v6, 0.0 }
  0x26   : > { %387 = vst.msk [vmem:[%s574_s26 + $0x88] sm:$0xff] %vm369_vm0, %v354_v53  ;;  %v333_v23 = vadd.f32 %v301_v12, %v269_v8  ;;  %v362_v25 = vmax.f32 %v330_v11, 0.0  ;;  %v334_v26 = vadd.f32 %v302_v16, %v270_v13  ;;  %v363_v27 = vmax.f32 %v331_v15, 0.0 }
  0x27   : > { %388 = vst.msk [vmem:[%s574_s26 + $0x90] sm:$0xff] %vm369_vm0, %v355_v58  ;;  %v335_v0 = vadd.f32 %v303_v20, %v271_v17  ;;  %v364_v28 = vmax.f32 %v332_v19, 0.0  ;;  %v336_v29 = vadd.f32 %v304_v24, %v272_v21 }
  0x28   : > { %389 = vst.msk [vmem:[%s574_s26 + $0x98] sm:$0xff] %vm369_vm0, %v356_v63  ;;  %v365_v30 = vmax.f32 %v333_v23, 0.0  ;;  %v366_v31 = vmax.f32 %v334_v26, 0.0 }
  0x29   : > { %390 = vst.msk [vmem:[%s574_s26 + $0xa0] sm:$0xff] %vm369_vm0, %v357_v5  ;;  %v367_v32 = vmax.f32 %v335_v0, 0.0  ;;  %v368_v33 = vmax.f32 %v336_v29, 0.0 }
  0x2a   : > { %391 = vst.msk [vmem:[%s574_s26 + $0xa8] sm:$0xff] %vm369_vm0, %v358_v10 }
  0x2b   : > { %392 = vst.msk [vmem:[%s574_s26 + $0xb0] sm:$0xff] %vm369_vm0, %v359_v14 }
  0x2c   : > { %393 = vst.msk [vmem:[%s574_s26 + $0xb8] sm:$0xff] %vm369_vm0, %v360_v18 }
  0x2d   : > { %394 = vst.msk [vmem:[%s574_s26 + $0xc0] sm:$0xff] %vm369_vm0, %v361_v22 }
  0x2e   : > { %395 = vst.msk [vmem:[%s574_s26 + $0xc8] sm:$0xff] %vm369_vm0, %v362_v25 }
  0x2f   : > { %396 = vst.msk [vmem:[%s574_s26 + $0xd0] sm:$0xff] %vm369_vm0, %v363_v27 }
  0x30   : > { %397 = vst.msk [vmem:[%s574_s26 + $0xd8] sm:$0xff] %vm369_vm0, %v364_v28 }
  0x31   : > { %398 = vst.msk [vmem:[%s574_s26 + $0xe0] sm:$0xff] %vm369_vm0, %v365_v30 }
  0x32   : > { %399 = vst.msk [vmem:[%s574_s26 + $0xe8] sm:$0xff] %vm369_vm0, %v366_v31 }
  0x33   : > { %400 = vst.msk [vmem:[%s574_s26 + $0xf0] sm:$0xff] %vm369_vm0, %v367_v32 }
  0x34   : > { %401 = vst.msk [vmem:[%s574_s26 + $0xf8] sm:$0xff] %vm369_vm0, %v368_v33 }
  0x35 PF: > { %s13_s12 = sadd.s32 1, %s509_s12  }
  0x36   : > { %p10_p4 = scmp.ge.s32.totalorder %s13_s12, 4  }
  0x38   :  { %12 = sbr.rel (!%p10_p4) target bundleno = 1 (0x1), region = 68 }

</bundles_post_ra>
